<compile_context>
chip_gen: v5e
topology: v5e:2x2
jax: 0.10.0
libtpu: 0.0.40
codegen_flags: <defaults>
</compile_context>

<pallas_src>
import jax
import jax.numpy as jnp
from jax.experimental import pallas as pl
from jax.experimental.pallas import tpu as pltpu

HIDDEN = 768       # roberta-base hidden size
FC1 = 512
NCLS = 2
NCLS_PAD = 128     # lane-dense padded class dimension
NEG_INF = -1e30


def _round_up(x, m):
    return ((x + m - 1) // m) * m


def bert_arch_head_kernel(pooled_ref, wp_ref, bp_ref,
                          w1_ref, b1_ref, w2_ref, b2_ref,
                          out_ref):
    """pooler(dense+tanh) -> fc1 -> relu -> dropout(eval) -> fc2 -> log_softmax.

    pooled_ref : [TB, 768]       bf16  (mask-weighted mean of token embeddings)
    wp_ref     : [768, 768]      bf16  (synthetic BERT pooler dense, pre-transposed)
    bp_ref     : [1, 768]        f32
    w1_ref     : [768, 512]      bf16  (fc1 weight, pre-transposed)
    b1_ref     : [1, 512]        f32
    w2_ref     : [512, 128]      bf16  (fc2 weight, pre-transposed + zero-padded)
    b2_ref     : [1, 128]        f32   (zero-padded)
    out_ref    : [TB, 128]       f32   (log-probabilities; cols >= 2 are padding)
    """
    pooled = pooled_ref[...]                                   # bf16 [TB, 768]

    # --- synthetic BERT pooler: tanh(pooled @ Wp + bp) -> cls_hs [TB, 768] ---
    cls_hs = jnp.tanh(
        jnp.dot(pooled, wp_ref[...], preferred_element_type=jnp.float32)
        + bp_ref[...]
    )

    # --- fc1 + relu ---
    h = jnp.dot(cls_hs.astype(jnp.bfloat16), w1_ref[...],
                preferred_element_type=jnp.float32) + b1_ref[...]
    h = jnp.maximum(h, 0.0)

    # --- dropout (eval mode: identity) ---

    # --- fc2 (lane-padded to 128 classes) ---
    logits = jnp.dot(h.astype(jnp.bfloat16), w2_ref[...],
                     preferred_element_type=jnp.float32) + b2_ref[...]

    # mask padded class columns to -inf so they do not disturb the normalizer
    col = jax.lax.broadcasted_iota(jnp.int32, logits.shape, 1)
    logits = jnp.where(col < NCLS, logits, jnp.full_like(logits, NEG_INF))

    # --- log_softmax over dim=1 (numerically stable) ---
    m = jnp.max(logits, axis=1, keepdims=True)
    shifted = logits - m
    lse = jnp.log(jnp.sum(jnp.exp(shifted), axis=1, keepdims=True))
    out_ref[...] = shifted - lse


def bert_arch_forward(sent_id, mask, packed):
    """Glue: embedding lookup + masked mean pooling (plain JAX, XLA fuses the
    gather+reduction), then the Pallas kernel for the matmul/activation/
    log-softmax hot path."""
    emb = jnp.take(packed["embedding"], sent_id, axis=0)          # [B, S, 768] f32
    mask_f = mask.astype(jnp.float32)                             # [B, S]
    denom = jnp.maximum(jnp.sum(mask_f, axis=1, keepdims=True), 1.0)
    pooled = jnp.einsum("bsd,bs->bd", emb, mask_f) / denom        # [B, 768] f32
    pooled = pooled.astype(jnp.bfloat16)                          # halve input DMA

    B = pooled.shape[0]

    # Batch tiling: sublane-aligned, capped at 256 rows (full MXU pass on v6e/v7x).
    B_pad = _round_up(B, 8)
    TB = 256 if B_pad >= 256 else B_pad
    B_pad = _round_up(B_pad, TB)
    if B_pad != B:
        pooled = jnp.pad(pooled, ((0, B_pad - B), (0, 0)))

    grid = (B_pad // TB,)
    const = lambda shape: pl.BlockSpec(shape, lambda i: (0, 0))   # resident across grid

    out = pl.pallas_call(
        bert_arch_head_kernel,
        out_shape=jax.ShapeDtypeStruct((B_pad, NCLS_PAD), jnp.float32),
        grid=grid,
        in_specs=[
            pl.BlockSpec((TB, HIDDEN), lambda i: (i, 0)),         # pooled: tiled over batch
            const((HIDDEN, HIDDEN)),                              # wp  (bf16)
            const((1, HIDDEN)),                                   # bp
            const((HIDDEN, FC1)),                                 # w1  (bf16)
            const((1, FC1)),                                      # b1
            const((FC1, NCLS_PAD)),                               # w2  (bf16, padded)
            const((1, NCLS_PAD)),                                 # b2  (padded)
        ],
        out_specs=pl.BlockSpec((TB, NCLS_PAD), lambda i: (i, 0)),
        compiler_params=pltpu.CompilerParams(
            dimension_semantics=("parallel",),
            vmem_limit_bytes=16 << 20,
        ),
    )(
        pooled,
        packed["wp"], packed["bp"],
        packed["w1"], packed["b1"],
        packed["w2"], packed["b2"],
    )
    return out[:B, :NCLS]


def init_params(key, vocab_size=128):
    """Raw f32 parameters (PyTorch-equivalent layout, weights pre-transposed)."""
    ks = jax.random.split(key, 7)
    scale = 0.02
    return {
        "embedding": scale * jax.random.normal(ks[0], (vocab_size, HIDDEN), jnp.float32),
        "wp": scale * jax.random.normal(ks[1], (HIDDEN, HIDDEN), jnp.float32),
        "bp": scale * jax.random.normal(ks[2], (1, HIDDEN), jnp.float32),
        "w1": scale * jax.random.normal(ks[3], (HIDDEN, FC1), jnp.float32),
        "b1": scale * jax.random.normal(ks[4], (1, FC1), jnp.float32),
        "w2": scale * jax.random.normal(ks[5], (FC1, NCLS), jnp.float32),
        "b2": scale * jax.random.normal(ks[6], (1, NCLS), jnp.float32),
    }


def pack_params(params):
    """One-time packing: weights to bf16, class dim zero-padded to 128 lanes."""
    w2p = jnp.zeros((FC1, NCLS_PAD), jnp.float32).at[:, :NCLS].set(params["w2"])
    b2p = jnp.zeros((1, NCLS_PAD), jnp.float32).at[:, :NCLS].set(params["b2"])
    return {
        "embedding": params["embedding"],                      # f32 (gather stays in f32)
        "wp": params["wp"].astype(jnp.bfloat16),
        "bp": params["bp"],                                    # f32
        "w1": params["w1"].astype(jnp.bfloat16),
        "b1": params["b1"],                                    # f32
        "w2": w2p.astype(jnp.bfloat16),
        "b2": b2p,                                             # f32
    }


if __name__ == "__main__":
    key = jax.random.PRNGKey(0)
    pkey, ikey = jax.random.split(key)

    B, S, VOCAB = 2, 8, 128
    params = init_params(pkey, vocab_size=VOCAB)
    packed = pack_params(params)

    sent_id = jax.random.randint(ikey, (B, S), 0, VOCAB, dtype=jnp.int32)
    mask = jnp.ones((B, S), dtype=jnp.int32).at[:, S - 2:].set(0)  # pad last 2 tokens

    logprobs = bert_arch_forward(sent_id, mask, packed)
    logprobs = jax.block_until_ready(logprobs)

    assert logprobs.shape == (B, NCLS)
    # sanity: rows of log_softmax must exp-sum to 1
    assert jnp.allclose(jnp.exp(logprobs).sum(axis=1), 1.0, atol=1e-2)
    assert bool(jnp.all(jnp.isfinite(logprobs)))
    print("KERNEL_OK")
</pallas_src>

<mosaic_0001>
module attributes {stable_mosaic.version = 11 : i64} {
  func.func @bert_arch_head_kernel(%arg0: i32, %arg1: memref<8x768xbf16, #tpu.memory_space<vmem>>, %arg2: memref<768x768xbf16, #tpu.memory_space<vmem>>, %arg3: memref<1x768xf32, #tpu.memory_space<vmem>>, %arg4: memref<768x512xbf16, #tpu.memory_space<vmem>>, %arg5: memref<1x512xf32, #tpu.memory_space<vmem>>, %arg6: memref<512x128xbf16, #tpu.memory_space<vmem>>, %arg7: memref<1x128xf32, #tpu.memory_space<vmem>>, %arg8: memref<8x128xf32, #tpu.memory_space<vmem>>) attributes {dimension_semantics = [#tpu.dimension_semantics<parallel>], iteration_bounds = array<i64: 1>, scalar_prefetch = 0 : i64, scratch_operands = 0 : i64, tpu.core_type = #tpu.core_type<tc>, window_params = [{transform_indices = @transform_0, window_bounds = array<i64: 8, 768>}, {pipeline_mode = #tpu.pipeline_mode<synchronous>, transform_indices = @transform_1, window_bounds = array<i64: 768, 768>}, {pipeline_mode = #tpu.pipeline_mode<synchronous>, transform_indices = @transform_2, window_bounds = array<i64: 1, 768>}, {pipeline_mode = #tpu.pipeline_mode<synchronous>, transform_indices = @transform_3, window_bounds = array<i64: 768, 512>}, {pipeline_mode = #tpu.pipeline_mode<synchronous>, transform_indices = @transform_4, window_bounds = array<i64: 1, 512>}, {pipeline_mode = #tpu.pipeline_mode<synchronous>, transform_indices = @transform_5, window_bounds = array<i64: 512, 128>}, {pipeline_mode = #tpu.pipeline_mode<synchronous>, transform_indices = @transform_6, window_bounds = array<i64: 1, 128>}, {transform_indices = @transform_7, window_bounds = array<i64: 8, 128>}]} {
    %c0 = arith.constant 0 : index
    %c0_0 = arith.constant 0 : index
    %0 = vector.load %arg1[%c0, %c0_0] : memref<8x768xbf16, #tpu.memory_space<vmem>>, vector<8x768xbf16>
    %c0_1 = arith.constant 0 : index
    %c0_2 = arith.constant 0 : index
    %1 = vector.load %arg2[%c0_1, %c0_2] : memref<768x768xbf16, #tpu.memory_space<vmem>>, vector<768x768xbf16>
    %cst = arith.constant dense<0.000000e+00> : vector<8x768xf32>
    %2 = tpu.matmul %0, %1, %cst {dimension_numbers = #tpu.dot_dimension_numbers<[1], [0], [0], [1], [0, 0, 1, 1], [], []>} : vector<8x768xbf16>, vector<768x768xbf16>, vector<8x768xf32> -> vector<8x768xf32>
    %c0_3 = arith.constant 0 : index
    %c0_4 = arith.constant 0 : index
    %3 = vector.load %arg3[%c0_3, %c0_4] : memref<1x768xf32, #tpu.memory_space<vmem>>, vector<1x768xf32>
    %4 = vector.broadcast %3 : vector<1x768xf32> to vector<8x768xf32>
    %5 = arith.addf %2, %4 : vector<8x768xf32>
    %6 = math.tanh %5 : vector<8x768xf32>
    %7 = arith.truncf %6 : vector<8x768xf32> to vector<8x768xbf16>
    %c0_5 = arith.constant 0 : index
    %c0_6 = arith.constant 0 : index
    %8 = vector.load %arg4[%c0_5, %c0_6] : memref<768x512xbf16, #tpu.memory_space<vmem>>, vector<768x512xbf16>
    %cst_7 = arith.constant dense<0.000000e+00> : vector<8x512xf32>
    %9 = tpu.matmul %7, %8, %cst_7 {dimension_numbers = #tpu.dot_dimension_numbers<[1], [0], [0], [1], [0, 0, 1, 1], [], []>} : vector<8x768xbf16>, vector<768x512xbf16>, vector<8x512xf32> -> vector<8x512xf32>
    %c0_8 = arith.constant 0 : index
    %c0_9 = arith.constant 0 : index
    %10 = vector.load %arg5[%c0_8, %c0_9] : memref<1x512xf32, #tpu.memory_space<vmem>>, vector<1x512xf32>
    %11 = vector.broadcast %10 : vector<1x512xf32> to vector<8x512xf32>
    %12 = arith.addf %9, %11 : vector<8x512xf32>
    %cst_10 = arith.constant 0.000000e+00 : f32
    %13 = vector.broadcast %cst_10 : f32 to vector<8x512xf32>
    %14 = arith.maximumf %12, %13 : vector<8x512xf32>
    %15 = arith.truncf %14 : vector<8x512xf32> to vector<8x512xbf16>
    %c0_11 = arith.constant 0 : index
    %c0_12 = arith.constant 0 : index
    %16 = vector.load %arg6[%c0_11, %c0_12] : memref<512x128xbf16, #tpu.memory_space<vmem>>, vector<512x128xbf16>
    %cst_13 = arith.constant dense<0.000000e+00> : vector<8x128xf32>
    %17 = tpu.matmul %15, %16, %cst_13 {dimension_numbers = #tpu.dot_dimension_numbers<[1], [0], [0], [1], [0, 0, 1, 1], [], []>} : vector<8x512xbf16>, vector<512x128xbf16>, vector<8x128xf32> -> vector<8x128xf32>
    %c0_14 = arith.constant 0 : index
    %c0_15 = arith.constant 0 : index
    %18 = vector.load %arg7[%c0_14, %c0_15] : memref<1x128xf32, #tpu.memory_space<vmem>>, vector<1x128xf32>
    %19 = vector.broadcast %18 : vector<1x128xf32> to vector<8x128xf32>
    %20 = arith.addf %17, %19 : vector<8x128xf32>
    %21 = tpu.iota {dimensions = array<i32: 1>} : vector<8x128xi32>
    %c2_i32 = arith.constant 2 : i32
    %22 = vector.broadcast %c2_i32 : i32 to vector<8x128xi32>
    %23 = arith.cmpi slt, %21, %22 : vector<8x128xi32>
    %cst_16 = arith.constant -1.000000e+30 : f32
    %24 = vector.broadcast %cst_16 : f32 to vector<8x128xf32>
    %25 = arith.select %23, %20, %24 : vector<8x128xi1>, vector<8x128xf32>
    %cst_17 = arith.constant dense<0xFF800000> : vector<8xf32>
    %26 = vector.multi_reduction <maximumf>, %25, %cst_17 [1] : vector<8x128xf32> to vector<8xf32>
    %27 = vector.shape_cast %26 : vector<8xf32> to vector<8x1xf32>
    %28 = vector.broadcast %27 : vector<8x1xf32> to vector<8x128xf32>
    %29 = arith.subf %25, %28 : vector<8x128xf32>
    %30 = math.exp %29 : vector<8x128xf32>
    %cst_18 = arith.constant dense<0.000000e+00> : vector<8xf32>
    %31 = vector.multi_reduction <add>, %30, %cst_18 [1] : vector<8x128xf32> to vector<8xf32>
    %32 = vector.shape_cast %31 : vector<8xf32> to vector<8x1xf32>
    %33 = math.log %32 : vector<8x1xf32>
    %34 = vector.broadcast %33 : vector<8x1xf32> to vector<8x128xf32>
    %35 = arith.subf %29, %34 : vector<8x128xf32>
    %c0_19 = arith.constant 0 : index
    %c0_20 = arith.constant 0 : index
    %36 = vector.load %arg8[%c0_19, %c0_20] : memref<8x128xf32, #tpu.memory_space<vmem>>, vector<8x128xf32>
    tpu.vector_store %arg8[%c0_19, %c0_20], %35 {strides = array<i32>} : memref<8x128xf32, #tpu.memory_space<vmem>>, vector<8x128xf32>,
    return
  }
  func.func @transform_0(%arg0: i32) -> (i32, i32) {
    %c0_i32 = arith.constant 0 : i32
    %c0_i32_0 = arith.constant 0 : i32
    return %arg0, %c0_i32 : i32, i32
  }
  func.func @transform_1(%arg0: i32) -> (i32, i32) {
    %c0_i32 = arith.constant 0 : i32
    %c0_i32_0 = arith.constant 0 : i32
    %c0_i32_1 = arith.constant 0 : i32
    return %c0_i32, %c0_i32_0 : i32, i32
  }
  func.func @transform_2(%arg0: i32) -> (i32, i32) {
    %c0_i32 = arith.constant 0 : i32
    %c0_i32_0 = arith.constant 0 : i32
    %c0_i32_1 = arith.constant 0 : i32
    return %c0_i32, %c0_i32_0 : i32, i32
  }
  func.func @transform_3(%arg0: i32) -> (i32, i32) {
    %c0_i32 = arith.constant 0 : i32
    %c0_i32_0 = arith.constant 0 : i32
    %c0_i32_1 = arith.constant 0 : i32
    return %c0_i32, %c0_i32_0 : i32, i32
  }
  func.func @transform_4(%arg0: i32) -> (i32, i32) {
    %c0_i32 = arith.constant 0 : i32
    %c0_i32_0 = arith.constant 0 : i32
    %c0_i32_1 = arith.constant 0 : i32
    return %c0_i32, %c0_i32_0 : i32, i32
  }
  func.func @transform_5(%arg0: i32) -> (i32, i32) {
    %c0_i32 = arith.constant 0 : i32
    %c0_i32_0 = arith.constant 0 : i32
    %c0_i32_1 = arith.constant 0 : i32
    return %c0_i32, %c0_i32_0 : i32, i32
  }
  func.func @transform_6(%arg0: i32) -> (i32, i32) {
    %c0_i32 = arith.constant 0 : i32
    %c0_i32_0 = arith.constant 0 : i32
    %c0_i32_1 = arith.constant 0 : i32
    return %c0_i32, %c0_i32_0 : i32, i32
  }
  func.func @transform_7(%arg0: i32) -> (i32, i32) {
    %c0_i32 = arith.constant 0 : i32
    %c0_i32_0 = arith.constant 0 : i32
    return %arg0, %c0_i32 : i32, i32
  }
}

</mosaic_0001>

<bundles_post_ra>
// kernel: tpu_custom_call.1
= control target key start
LH: loop header
LB: loop body
LE: loop exit
PB: predicated region body
PF: predicated region fallthrough
CT: control target
= control target key end

     0   :  { %12 = vsyncpa [#allocation3], 0  ;;  %s7238_s0 = inlined_call_operand.hbm [shape: bf16[8,768], index: 0, kind: input, shape index: {}]   ;;  %s7239_s1 = inlined_call_operand.hbm [shape: bf16[768,768], index: 1, kind: input, shape index: {}]   ;;  %s7240_s2 = inlined_call_operand.hbm [shape: f32[1,768], index: 2, kind: input, shape index: {}]   ;;  %s7241_s3 = inlined_call_operand.hbm [shape: bf16[768,512], index: 3, kind: input, shape index: {}]   ;;  %s7242_s4 = inlined_call_operand.hbm [shape: f32[1,512], index: 4, kind: input, shape index: {}]   ;;  %s7243_s5 = inlined_call_operand.hbm [shape: bf16[512,128], index: 5, kind: input, shape index: {}]   ;;  %s7244_s6 = inlined_call_operand.hbm [shape: f32[1,128], index: 6, kind: input, shape index: {}]   ;;  %s7245_s7 = inlined_call_operand.hbm [shape: f32[8,128], index: 7, kind: output, shape index: {}]  }
   0x1   :  { %13 = vsyncpa [#allocation6], 0 }
   0x2   :  { %14 = vsyncpa [#allocation9], 0 }
   0x3   :  { %15 = vsyncpa [#allocation12], 0  ;;  %s32_s26 = sshll.u32 %s7239_s1, 4  ;;  %s33_s26 = int_to_ptr.hbm [resolvable:$true] %s32_s26 }
   0x4   :  { %16 = vsyncpa [#allocation4], 0  ;;  %s6997_s27 = smov [#allocation5]   ;;  %s56_s8 = sshll.u32 %s7241_s3, 4  ;;  %s57_s8 = int_to_ptr.hbm [resolvable:$true] %s56_s8 }
   0x5   :  { %s34_s28 = sshll.u32 %s6997_s27, 4  ;;  %s6998_s9 = smov 384   ;;  %s35_s28 = int_to_ptr.vmem [resolvable:$true] %s34_s28 }
   0x6   :  { %s6999_s10 = smov 24   ;;  %s7000_s11 = smov [#allocation8]  }
   0x7   :  { %40 = dma.hbm_to_vmem [thread:$0]  %s33_s26, 36864, %s35_s28, [#allocation6], %s6998_s9, %s6998_s9, %s6999_s10  }
   0x8   :  { %s58_s12 = sshll.u32 %s7000_s11, 4  ;;  %s7001_s13 = smov 256   ;;  %s59_s12 = int_to_ptr.vmem [resolvable:$true] %s58_s12 }
   0x9   :  { %s7002_s14 = smov 16   ;;  %s80_s16 = sshll.u32 %s7243_s5, 4  ;;  %s81_s16 = int_to_ptr.hbm [resolvable:$true] %s80_s16 }
   0xa   :  { %64 = dma.hbm_to_vmem [thread:$0]  %s57_s8, 24576, %s59_s12, [#allocation9], %s7001_s13, %s7001_s13, %s7002_s14  }
   0xb   :  { %s7003_s17 = smov [#allocation11]   ;;  %s22_s20 = sshll.u32 %s7238_s0, 4  ;;  %s23_s20 = int_to_ptr.hbm [resolvable:$true] %s22_s20 }
   0xc   :  { %s82_s18 = sshll.u32 %s7003_s17, 4  ;;  %s7004_s21 = smov 64   ;;  %s83_s18 = int_to_ptr.vmem [resolvable:$true] %s82_s18 }
   0xd   :  { %s7005_s22 = smov 4   ;;  %s7006_s23 = smov [#allocation2]  }
   0xe   :  { %88 = dma.hbm_to_vmem [thread:$0]  %s81_s16, 4096, %s83_s18, [#allocation12], %s7004_s21, %s7004_s21, %s7005_s22  }
   0xf   :  { %s24_s24 = sshll.u32 %s7006_s23, 4  ;;  %s46_s27 = sshll.u32 %s7240_s2, 4  ;;  %s25_s24 = int_to_ptr.vmem [resolvable:$true] %s24_s24  ;;  %s47_s27 = int_to_ptr.hbm [resolvable:$true] %s46_s27 }
  0x10   :  { %27 = dma.hbm_to_vmem [thread:$0]  %s23_s20, 384, %s25_s24, [#allocation3]  }
  0x11   :  { %s70_s29 = sshll.u32 %s7242_s4, 4  ;;  %s7007_s30 = smov [#allocation7]   ;;  %s71_s29 = int_to_ptr.hbm [resolvable:$true] %s70_s29 }
  0x12   :  { %s48_s8 = sshll.u32 %s7007_s30, 4  ;;  %s7008_s0 = smov [#allocation10]   ;;  %s49_s8 = int_to_ptr.vmem [resolvable:$true] %s48_s8 }
  0x13   :  { %51 = dma.hbm_to_vmem [thread:$0]  %s47_s27, 96, %s49_s8, [#allocation6]  }
  0x14   :  { %s72_s9 = sshll.u32 %s7008_s0, 4  ;;  %s94_s12 = sshll.u32 %s7244_s6, 4  ;;  %s73_s9 = int_to_ptr.vmem [resolvable:$true] %s72_s9  ;;  %s95_s12 = int_to_ptr.hbm [resolvable:$true] %s94_s12 }
  0x15   :  { %75 = dma.hbm_to_vmem [thread:$0]  %s71_s29, 64, %s73_s9, [#allocation9]  }
  0x16   :  { %s7009_s2 = smov [#allocation13]  }
  0x17   :  { %s96_s13 = sshll.u32 %s7009_s2, 4  ;;  %s97_s13 = int_to_ptr.vmem [resolvable:$true] %s96_s13 }
  0x18   :  { %99 = dma.hbm_to_vmem [thread:$0]  %s95_s12, 16, %s97_s13, [#allocation12]  }
  0x19   :  { %6987 = dma.done.wait [#allocation3], 384  }
  0x1a   :  { %6988 = vsyncadd [#allocation3], 4294966912 }
  0x1b   :  { %6989 = dma.done.wait [#allocation6], 36960  }
  0x1c   :  { %6990 = vsyncadd [#allocation6], 4294930336 }
  0x1d   :  { %6991 = dma.done.wait [#allocation9], 24640  }
  0x1e   :  { %6992 = vsyncadd [#allocation9], 4294942656 }
  0x1f   :  { %6993 = dma.done.wait [#allocation12], 4112  }
  0x20   :  { %6994 = vsyncadd [#allocation12], 4294963184  ;;  %v4373_v0 = vld [vmem:[#allocation5 + $0x150] sm:$0xf]  ;;  %v6296_v1 = vld [vmem:[#allocation5 + $0x164] sm:$0xf0] }
  0x21   :  { %v4565_v2 = vld [vmem:[#allocation5 + $0x2d0] sm:$0xf]  ;;  %v4374_v3 = vor.u32 %v6296_v1, %v4373_v0  ;;  %v6344_v4 = vld [vmem:[#allocation5 + $0x2e4] sm:$0xf0]  ;;  %v4349_v11 = vld [vmem:[#allocation5 + $0x120] sm:$0xf] }
  0x22   :  { %v4757_v5 = vld [vmem:[#allocation5 + $0x450] sm:$0xf]  ;;  %v6392_v6 = vld [vmem:[#allocation5 + $0x464] sm:$0xf0]  ;;  %v4566_v7 = vor.u32 %v6344_v4, %v4565_v2  ;;  %v6290_v13 = vld [vmem:[#allocation5 + $0x134] sm:$0xf0] }
  0x23   :  { %v4758_v8 = vor.u32 %v6392_v6, %v4757_v5  ;;  %v4949_v9 = vld [vmem:[#allocation5 + $0x5d0] sm:$0xf]  ;;  %v6440_v10 = vld [vmem:[#allocation5 + $0x5e4] sm:$0xf0]  ;;  %1894 = vmatpush.bf16.msra.mxu0 %v4374_v3  ;;  %v4541_v14 = vld [vmem:[#allocation5 + $0x2a0] sm:$0xf]  ;;  %v4350_v16 = vor.u32 %v6290_v13, %v4349_v11 }
  0x24   :  { %v4950_v12 = vor.u32 %v6440_v10, %v4949_v9  ;;  %v6338_v15 = vld [vmem:[#allocation5 + $0x2b4] sm:$0xf0]  ;;  %1907 = vmatpush.bf16.msra.mxu1 %v4566_v7  ;;  %v4733_v18 = vld [vmem:[#allocation5 + $0x420] sm:$0xf]  ;;  %v4325_v23 = vld [vmem:[#allocation5 + $0xf0] sm:$0xf] }
  0x25   :  { %1920 = vmatpush.bf16.msra.mxu2 %v4758_v8  ;;  %v4542_v17 = vor.u32 %v6338_v15, %v4541_v14  ;;  %v6386_v19 = vld [vmem:[#allocation5 + $0x434] sm:$0xf0]  ;;  %v4925_v20 = vld [vmem:[#allocation5 + $0x5a0] sm:$0xf]  ;;  %v6284_v24 = vld [vmem:[#allocation5 + $0x104] sm:$0xf0] }
  0x26   :  { %1933 = vmatpush.bf16.msra.mxu3 %v4950_v12  ;;  %v4734_v21 = vor.u32 %v6386_v19, %v4733_v18  ;;  %v6434_v22 = vld [vmem:[#allocation5 + $0x5b4] sm:$0xf0]  ;;  %v4517_v26 = vld [vmem:[#allocation5 + $0x270] sm:$0xf]  ;;  %v6332_v27 = vld [vmem:[#allocation5 + $0x284] sm:$0xf0]  ;;  %v4326_v29 = vor.u32 %v6284_v24, %v4325_v23 }
  0x27   :  { %v4926_v25 = vor.u32 %v6434_v22, %v4925_v20  ;;  %v4709_v28 = vld [vmem:[#allocation5 + $0x3f0] sm:$0xf]  ;;  %1895 = vmatpush.bf16.msra.mxu0 %v4350_v16  ;;  %v6380_v30 = vld [vmem:[#allocation5 + $0x404] sm:$0xf0]  ;;  %v4518_v33 = vor.u32 %v6332_v27, %v4517_v26  ;;  %v4301_v35 = vld [vmem:[#allocation5 + $0xc0] sm:$0xf] }
  0x28   :  { %v4901_v31 = vld [vmem:[#allocation5 + $0x570] sm:$0xf]  ;;  %v6428_v32 = vld [vmem:[#allocation5 + $0x584] sm:$0xf0]  ;;  %1908 = vmatpush.bf16.msra.mxu1 %v4542_v17  ;;  %v4710_v34 = vor.u32 %v6380_v30, %v4709_v28  ;;  %v6278_v36 = vld [vmem:[#allocation5 + $0xd4] sm:$0xf0] }
  0x29   :  { %1921 = vmatpush.bf16.msra.mxu2 %v4734_v21  ;;  %v4493_v37 = vld [vmem:[#allocation5 + $0x240] sm:$0xf]  ;;  %v4902_v38 = vor.u32 %v6428_v32, %v4901_v31  ;;  %v6326_v39 = vld [vmem:[#allocation5 + $0x254] sm:$0xf0]  ;;  %v4302_v44 = vor.u32 %v6278_v36, %v4301_v35  ;;  %v4277_v47 = vld [vmem:[#allocation5 + $0x90] sm:$0xf] }
  0x2a   :  { %1934 = vmatpush.bf16.msra.mxu3 %v4926_v25  ;;  %v4685_v40 = vld [vmem:[#allocation5 + $0x3c0] sm:$0xf]  ;;  %v6374_v41 = vld [vmem:[#allocation5 + $0x3d4] sm:$0xf0]  ;;  %v4494_v45 = vor.u32 %v6326_v39, %v4493_v37  ;;  %v6272_v48 = vld [vmem:[#allocation5 + $0xa4] sm:$0xf0] }
  0x2b   :  { %v4877_v42 = vld [vmem:[#allocation5 + $0x540] sm:$0xf]  ;;  %v6422_v43 = vld [vmem:[#allocation5 + $0x554] sm:$0xf0]  ;;  %1896 = vmatpush.bf16.msra.mxu0 %v4326_v29  ;;  %v4686_v46 = vor.u32 %v6374_v41, %v4685_v40  ;;  %v4469_v49 = vld [vmem:[#allocation5 + $0x210] sm:$0xf]  ;;  %v4278_v56 = vor.u32 %v6272_v48, %v4277_v47 }
  0x2c   :  { %1909 = vmatpush.bf16.msra.mxu1 %v4518_v33  ;;  %v4878_v50 = vor.u32 %v6422_v43, %v4877_v42  ;;  %v6320_v51 = vld [vmem:[#allocation5 + $0x224] sm:$0xf0]  ;;  %v4661_v52 = vld [vmem:[#allocation5 + $0x390] sm:$0xf]  ;;  %v4253_v59 = vld [vmem:[#allocation5 + $0x60] sm:$0xf] }
  0x2d   :  { %1922 = vmatpush.bf16.msra.mxu2 %v4710_v34  ;;  %v6368_v53 = vld [vmem:[#allocation5 + $0x3a4] sm:$0xf0]  ;;  %v4853_v54 = vld [vmem:[#allocation5 + $0x510] sm:$0xf]  ;;  %v4470_v57 = vor.u32 %v6320_v51, %v4469_v49  ;;  %v6266_v60 = vld [vmem:[#allocation5 + $0x74] sm:$0xf0] }
  0x2e   :  { %1935 = vmatpush.bf16.msra.mxu3 %v4902_v38  ;;  %v6416_v55 = vld [vmem:[#allocation5 + $0x524] sm:$0xf0]  ;;  %v4662_v58 = vor.u32 %v6368_v53, %v4661_v52  ;;  %v4445_v61 = vld [vmem:[#allocation5 + $0x1e0] sm:$0xf]  ;;  %v6314_v63 = vld [vmem:[#allocation5 + $0x1f4] sm:$0xf0]  ;;  %v4254_v4 = vor.u32 %v6266_v60, %v4253_v59 }
  0x2f   :  { %1897 = vmatpush.bf16.msra.mxu0 %v4302_v44  ;;  %v4854_v62 = vor.u32 %v6416_v55, %v4853_v54  ;;  %v4637_v0 = vld [vmem:[#allocation5 + $0x360] sm:$0xf]  ;;  %v6362_v1 = vld [vmem:[#allocation5 + $0x374] sm:$0xf0]  ;;  %v4446_v5 = vor.u32 %v6314_v63, %v4445_v61  ;;  %v4229_v7 = vld [vmem:[#allocation5 + $0x30] sm:$0xf] }
  0x30   :  { %1910 = vmatpush.bf16.msra.mxu1 %v4494_v45  ;;  %v4829_v2 = vld [vmem:[#allocation5 + $0x4e0] sm:$0xf]  ;;  %v6410_v3 = vld [vmem:[#allocation5 + $0x4f4] sm:$0xf0]  ;;  %v4638_v6 = vor.u32 %v6362_v1, %v4637_v0  ;;  %v6260_v8 = vld [vmem:[#allocation5 + $0x44] sm:$0xf0] }
  0x31   :  { %1923 = vmatpush.bf16.msra.mxu2 %v4686_v46  ;;  %v4421_v9 = vld [vmem:[#allocation5 + $0x1b0] sm:$0xf]  ;;  %v4830_v10 = vor.u32 %v6410_v3, %v4829_v2  ;;  %v6308_v11 = vld [vmem:[#allocation5 + $0x1c4] sm:$0xf0]  ;;  %v4230_v16 = vor.u32 %v6260_v8, %v4229_v7  ;;  %v4205_v17 = vld [vmem:[#allocation5] sm:$0xf] }
  0x32   :  { %1936 = vmatpush.bf16.msra.mxu3 %v4878_v50  ;;  %v4613_v12 = vld [vmem:[#allocation5 + $0x330] sm:$0xf]  ;;  %v6356_v13 = vld [vmem:[#allocation5 + $0x344] sm:$0xf0]  ;;  %v6254_v18 = vld [vmem:[#allocation5 + $0x14] sm:$0xf0]  ;;  %v4422_v19 = vor.u32 %v6308_v11, %v4421_v9 }
  0x33   :  { %1898 = vmatpush.bf16.msra.mxu0 %v4278_v56  ;;  %v4805_v14 = vld [vmem:[#allocation5 + $0x4b0] sm:$0xf]  ;;  %v6404_v15 = vld [vmem:[#allocation5 + $0x4c4] sm:$0xf0]  ;;  %v4614_v20 = vor.u32 %v6356_v13, %v4613_v12  ;;  %v4397_v21 = vld [vmem:[#allocation5 + $0x180] sm:$0xf]  ;;  %v4206_v31 = vor.u32 %v6254_v18, %v4205_v17 }
  0x34   :  { %1911 = vmatpush.bf16.msra.mxu1 %v4470_v57  ;;  %v6302_v22 = vld [vmem:[#allocation5 + $0x194] sm:$0xf0]  ;;  %v4589_v23 = vld [vmem:[#allocation5 + $0x300] sm:$0xf]  ;;  %v4806_v24 = vor.u32 %v6404_v15, %v4805_v14  ;;  %v5141_v28 = vld [vmem:[#allocation5 + $0x750] sm:$0xf] }
  0x35   :  { %1924 = vmatpush.bf16.msra.mxu2 %v4662_v58  ;;  %v6350_v25 = vld [vmem:[#allocation5 + $0x314] sm:$0xf0]  ;;  %v4781_v26 = vld [vmem:[#allocation5 + $0x480] sm:$0xf]  ;;  %v6488_v29 = vld [vmem:[#allocation5 + $0x764] sm:$0xf0]  ;;  %v4398_v35 = vor.u32 %v6302_v22, %v4397_v21 }
  0x36   :  { %1937 = vmatpush.bf16.msra.mxu3 %v4854_v62  ;;  %v6398_v27 = vld [vmem:[#allocation5 + $0x494] sm:$0xf0]  ;;  %v5333_v30 = vld [vmem:[#allocation5 + $0x8d0] sm:$0xf]  ;;  %v6536_v32 = vld [vmem:[#allocation5 + $0x8e4] sm:$0xf0]  ;;  %v4590_v36 = vor.u32 %v6350_v25, %v4589_v23  ;;  %v5142_v40 = vor.u32 %v6488_v29, %v5141_v28 }
  0x37   :  { %1899 = vmatpush.bf16.msra.mxu0 %v4254_v4  ;;  %v6293_v33 = vld [vmem:[#allocation5 + $0x154] sm:$0xf]  ;;  %v4375_v34 = vld [vmem:[#allocation5 + $0x168] sm:$0xf0]  ;;  %v4782_v39 = vor.u32 %v6398_v27, %v4781_v26  ;;  %v5334_v41 = vor.u32 %v6536_v32, %v5333_v30  ;;  %v5117_v43 = vld [vmem:[#allocation5 + $0x720] sm:$0xf] }
  0x38   :  { %1912 = vmatpush.bf16.msra.mxu1 %v4446_v5  ;;  %v6341_v37 = vld [vmem:[#allocation5 + $0x2d4] sm:$0xf]  ;;  %v4567_v38 = vld [vmem:[#allocation5 + $0x2e8] sm:$0xf0]  ;;  %v4378_v42 = vor.u32 %v6293_v33, %v4375_v34  ;;  %v6482_v44 = vld [vmem:[#allocation5 + $0x734] sm:$0xf0] }
  0x39   :  { %1925 = vmatpush.bf16.msra.mxu2 %v4638_v6  ;;  %v5309_v45 = vld [vmem:[#allocation5 + $0x8a0] sm:$0xf]  ;;  %v4570_v46 = vor.u32 %v6341_v37, %v4567_v38  ;;  %v6530_v47 = vld [vmem:[#allocation5 + $0x8b4] sm:$0xf0]  ;;  %v6287_v48 = vld [vmem:[#allocation5 + $0x124] sm:$0xf]  ;;  %v5118_v52 = vor.u32 %v6482_v44, %v5117_v43 }
  0x3a   :  { %1938 = vmatpush.bf16.msra.mxu3 %v4830_v10  ;;  %v4351_v49 = vld [vmem:[#allocation5 + $0x138] sm:$0xf0]  ;;  %v6335_v50 = vld [vmem:[#allocation5 + $0x2a4] sm:$0xf]  ;;  %v5093_v53 = vld [vmem:[#allocation5 + $0x6f0] sm:$0xf]  ;;  %v5310_v54 = vor.u32 %v6530_v47, %v5309_v45 }
  0x3b   :  { %1900 = vmatpush.bf16.msra.mxu0 %v4230_v16  ;;  %v4543_v51 = vld [vmem:[#allocation5 + $0x2b8] sm:$0xf0]  ;;  %v4354_v55 = vor.u32 %v6287_v48, %v4351_v49  ;;  %v6476_v56 = vld [vmem:[#allocation5 + $0x704] sm:$0xf0]  ;;  %v5285_v57 = vld [vmem:[#allocation5 + $0x870] sm:$0xf] }
  0x3c   :  { %1913 = vmatpush.bf16.msra.mxu1 %v4422_v19  ;;  %v6524_v58 = vld [vmem:[#allocation5 + $0x884] sm:$0xf0]  ;;  %v4546_v59 = vor.u32 %v6335_v50, %v4543_v51  ;;  %v6281_v60 = vld [vmem:[#allocation5 + $0xf4] sm:$0xf]  ;;  %v4327_v61 = vld [vmem:[#allocation5 + $0x108] sm:$0xf0]  ;;  %v5094_v0 = vor.u32 %v6476_v56, %v5093_v53 }
  0x3d   :  { %1926 = vmatpush.bf16.msra.mxu2 %v4614_v20  ;;  %v6329_v62 = vld [vmem:[#allocation5 + $0x274] sm:$0xf]  ;;  %v4519_v63 = vld [vmem:[#allocation5 + $0x288] sm:$0xf0]  ;;  %v5286_v1 = vor.u32 %v6524_v58, %v5285_v57  ;;  %v4330_v4 = vor.u32 %v6281_v60, %v4327_v61  ;;  %v5069_v5 = vld [vmem:[#allocation5 + $0x6c0] sm:$0xf] }
  0x3e   :  { %1939 = vmatpush.bf16.msra.mxu3 %v4806_v24  ;;  %v129_v2 = vld [vmem:[#allocation2 + $0x8] sm:$0xff]  ;;  %v128_v3 = vld [vmem:[#allocation2] sm:$0xff]  ;;  %v6470_v6 = vld [vmem:[#allocation5 + $0x6d4] sm:$0xf0]  ;;  %v4522_v11 = vor.u32 %v6329_v62, %v4519_v63  ;;  %s7010_s4 = smov [#allocation14]   ;;  %s4190_s15 = sshll.u32 %s7245_s7, 4  ;;  %s4191_s15 = int_to_ptr.hbm [resolvable:$true] %s4190_s15 }
  0x3f   :  { %1901 = vmatpush.bf16.msra.mxu0 %v4206_v31  ;;  %v5261_v7 = vld [vmem:[#allocation5 + $0x840] sm:$0xf]  ;;  %v438_v8 = vunpack.c.l.b16 %v129_v2  ;;  %v436_v9 = vunpack.c.l.b16 %v128_v3  ;;  %v439_v10 = vunpack.c.h.b16 %v129_v2  ;;  %v6518_v12 = vld [vmem:[#allocation5 + $0x854] sm:$0xf0]  ;;  %v6275_v13 = vld [vmem:[#allocation5 + $0xc4] sm:$0xf]  ;;  %v437_v15 = vunpack.c.h.b16 %v128_v3 }
  0x40   :  { %1914 = vmatpush.bf16.msra.mxu1 %v4398_v35  ;;  %v4303_v14 = vld [vmem:[#allocation5 + $0xd8] sm:$0xf0]  ;;  %v6323_v16 = vld [vmem:[#allocation5 + $0x244] sm:$0xf]  ;;  %v5070_v21 = vor.u32 %v6470_v6, %v5069_v5  ;;  %v5262_v23 = vor.u32 %v6518_v12, %v5261_v7  ;;  %v5045_v25 = vld [vmem:[#allocation5 + $0x690] sm:$0xf] }
  0x41   :  { %1927 = vmatpush.bf16.msra.mxu2 %v4590_v36  ;;  %v4495_v17 = vld [vmem:[#allocation5 + $0x258] sm:$0xf0]  ;;  %v7072_v18 = vpack.c.b16 %v438_v8, %v438_v8  ;;  %v7074_v19 = vpack.c.b16 %v436_v9, %v436_v9  ;;  %v7076_v20 = vpack.c.b16 %v439_v10, %v439_v10  ;;  %v7078_v22 = vpack.c.b16 %v437_v15, %v437_v15  ;;  %v6464_v26 = vld [vmem:[#allocation5 + $0x6a4] sm:$0xf0]  ;;  %v5237_v27 = vld [vmem:[#allocation5 + $0x810] sm:$0xf] }
  0x42   :  { %1940 = vmatpush.bf16.msra.mxu3 %v4782_v39  ;;  %v4306_v24 = vor.u32 %v6275_v13, %v4303_v14  ;;  %v4498_v28 = vor.u32 %v6323_v16, %v4495_v17  ;;  %v6512_v29 = vld [vmem:[#allocation5 + $0x824] sm:$0xf0]  ;;  %v6269_v30 = vld [vmem:[#allocation5 + $0x94] sm:$0xf]  ;;  %v4279_v31 = vld [vmem:[#allocation5 + $0xa8] sm:$0xf0]  ;;  %v5046_v34 = vor.u32 %v6464_v26, %v5045_v25 }
  0x43   :  { %1946 = vmatpush.bf16.msrb.mxu0 %v5142_v40  ;;  %v6317_v32 = vld [vmem:[#allocation5 + $0x214] sm:$0xf]  ;;  %v4471_v33 = vld [vmem:[#allocation5 + $0x228] sm:$0xf0]  ;;  %1915 = vmatmul.bf16.vlgmr.msra.gmra.mxu1 %v7078_v22  ;;  %v5238_v35 = vor.u32 %v6512_v29, %v5237_v27  ;;  %v4282_v36 = vor.u32 %v6269_v30, %v4279_v31  ;;  %v5021_v37 = vld [vmem:[#allocation5 + $0x660] sm:$0xf] }
  0x44   :  { %1959 = vmatpush.bf16.msrb.mxu1 %v5334_v41  ;;  %1928 = vmatmul.bf16.vlgmr.msra.gmra.mxu2 %v7072_v18  ;;  %v6458_v38 = vld [vmem:[#allocation5 + $0x674] sm:$0xf0]  ;;  %v5213_v39 = vld [vmem:[#allocation5 + $0x7e0] sm:$0xf]  ;;  %v4474_v40 = vor.u32 %v6317_v32, %v4471_v33  ;;  %v4255_v43 = vld [vmem:[#allocation5 + $0x78] sm:$0xf0] }
  0x45   :  { %1972 = vmatpush.bf16.msrb.mxu2 %v4378_v42  ;;  %1902 = vmatmul.bf16.vlgmr.msra.gmra.mxu0 %v7074_v19  ;;  %v6506_v41 = vld [vmem:[#allocation5 + $0x7f4] sm:$0xf0]  ;;  %v6263_v42 = vld [vmem:[#allocation5 + $0x64] sm:$0xf]  ;;  %v4447_v45 = vld [vmem:[#allocation5 + $0x1f8] sm:$0xf0] }
  0x46   :  { %1985 = vmatpush.bf16.msrb.mxu3 %v4570_v46  ;;  %v6311_v44 = vld [vmem:[#allocation5 + $0x1e4] sm:$0xf]  ;;  %v5022_v46 = vor.u32 %v6458_v38, %v5021_v37  ;;  %v5214_v47 = vor.u32 %v6506_v41, %v5213_v39  ;;  %v4258_v48 = vor.u32 %v6263_v42, %v4255_v43  ;;  %v4997_v49 = vld [vmem:[#allocation5 + $0x630] sm:$0xf]  ;;  %v6452_v50 = vld [vmem:[#allocation5 + $0x644] sm:$0xf0] }
  0x47   :  { %1947 = vmatpush.bf16.msrb.mxu0 %v5118_v52  ;;  %1941 = vmatmul.bf16.vlgmr.msra.gmra.mxu3 %v7076_v20  ;;  %v5189_v51 = vld [vmem:[#allocation5 + $0x7b0] sm:$0xf]  ;;  %v4450_v52 = vor.u32 %v6311_v44, %v4447_v45  ;;  %v6500_v53 = vld [vmem:[#allocation5 + $0x7c4] sm:$0xf0]  ;;  %v6305_v56 = vld [vmem:[#allocation5 + $0x1b4] sm:$0xf]  ;;  %v4998_v58 = vor.u32 %v6452_v50, %v4997_v49 }
  0x48   :  { %1960 = vmatpush.bf16.msrb.mxu1 %v5310_v54  ;;  %v6257_v54 = vld [vmem:[#allocation5 + $0x34] sm:$0xf]  ;;  %v4423_v57 = vld [vmem:[#allocation5 + $0x1c8] sm:$0xf0]  ;;  %v6446_v60 = vld [vmem:[#allocation5 + $0x614] sm:$0xf0]  ;;  %v5190_v62 = vor.u32 %v6500_v53, %v5189_v51 }
  0x49   :  { %1973 = vmatpush.bf16.msrb.mxu2 %v4354_v55  ;;  %v4231_v55 = vld [vmem:[#allocation5 + $0x48] sm:$0xf0]  ;;  %v5165_v61 = vld [vmem:[#allocation5 + $0x780] sm:$0xf]  ;;  %v130_v2 = vld [vmem:[#allocation2 + $0x10] sm:$0xff]  ;;  %v4426_v3 = vor.u32 %v6305_v56, %v4423_v57  ;;  %s4188_s6 = sshll.u32 %s7010_s4, 4  ;;  %s4189_s6 = int_to_ptr.vmem [resolvable:$true] %s4188_s6 }
  0x4a   :  { %1986 = vmatpush.bf16.msrb.mxu3 %v4546_v59  ;;  %v4973_v59 = vld [vmem:[#allocation5 + $0x600] sm:$0xf]  ;;  %v4234_v63 = vor.u32 %v6257_v54, %v4231_v55  ;;  %v6299_v5 = vld [vmem:[#allocation5 + $0x184] sm:$0xf]  ;;  %v4399_v6 = vld [vmem:[#allocation5 + $0x198] sm:$0xf0]  ;;  %v440_v14 = vunpack.c.l.b16 %v130_v2 }
  0x4b   :  { %1948 = vmatpush.bf16.msrb.mxu0 %v5094_v0  ;;  %v6494_v0 = vld [vmem:[#allocation5 + $0x794] sm:$0xf0]  ;;  %v6389_v7 = vld [vmem:[#allocation5 + $0x454] sm:$0xf]  ;;  %v4759_v8 = vld [vmem:[#allocation5 + $0x468] sm:$0xf0]  ;;  %v4974_v10 = vor.u32 %v6446_v60, %v4973_v59 }
  0x4c   :  { %1961 = vmatpush.bf16.msrb.mxu1 %v5286_v1  ;;  %v6251_v1 = vld [vmem:[#allocation5 + $0x4] sm:$0xf]  ;;  %v6437_v9 = vld [vmem:[#allocation5 + $0x5d4] sm:$0xf]  ;;  %v5143_v13 = vld [vmem:[#allocation5 + $0x768] sm:$0xf0]  ;;  %v5166_v15 = vor.u32 %v6494_v0, %v5165_v61  ;;  %v4762_v25 = vor.u32 %v6389_v7, %v4759_v8 }
  0x4d   :  { %1974 = vmatpush.bf16.msrb.mxu2 %v4330_v4  ;;  %v4207_v4 = vld [vmem:[#allocation5 + $0x18] sm:$0xf0]  ;;  %v6485_v12 = vld [vmem:[#allocation5 + $0x754] sm:$0xf]  ;;  %v6431_v30 = vld [vmem:[#allocation5 + $0x5a4] sm:$0xf] }
  0x4e   :  { %1987 = vmatpush.bf16.msrb.mxu3 %v4522_v11  ;;  %v4951_v11 = vld [vmem:[#allocation5 + $0x5e8] sm:$0xf0]  ;;  %v4210_v16 = vor.u32 %v6251_v1, %v4207_v4  ;;  %v6533_v17 = vld [vmem:[#allocation5 + $0x8d4] sm:$0xf]  ;;  %v5146_v27 = vor.u32 %v6485_v12, %v5143_v13  ;;  %v4735_v29 = vld [vmem:[#allocation5 + $0x438] sm:$0xf0] }
  0x4f   :  { %1949 = vmatpush.bf16.msrb.mxu0 %v5070_v21  ;;  %v5335_v21 = vld [vmem:[#allocation5 + $0x8e8] sm:$0xf0]  ;;  %v4954_v26 = vor.u32 %v6437_v9, %v4951_v11  ;;  %v4927_v32 = vld [vmem:[#allocation5 + $0x5b8] sm:$0xf0]  ;;  %v6479_v33 = vld [vmem:[#allocation5 + $0x724] sm:$0xf] }
  0x50   :  { %1962 = vmatpush.bf16.msrb.mxu1 %v5262_v23  ;;  %v441_v23 = vunpack.c.h.b16 %v130_v2  ;;  %v5338_v31 = vor.u32 %v6533_v17, %v5335_v21  ;;  %v5311_v37 = vld [vmem:[#allocation5 + $0x8b8] sm:$0xf0]  ;;  %v6377_v42 = vld [vmem:[#allocation5 + $0x3f4] sm:$0xf]  ;;  %v4711_v43 = vld [vmem:[#allocation5 + $0x408] sm:$0xf0] }
  0x51   :  { %1975 = vmatpush.bf16.msrb.mxu2 %v4306_v24  ;;  %v4402_v24 = vor.u32 %v6299_v5, %v4399_v6  ;;  %v6425_v44 = vld [vmem:[#allocation5 + $0x574] sm:$0xf]  ;;  %v5287_v50 = vld [vmem:[#allocation5 + $0x888] sm:$0xf0]  ;;  %v4714_v51 = vor.u32 %v6377_v42, %v4711_v43  ;;  %v6371_v54 = vld [vmem:[#allocation5 + $0x3c4] sm:$0xf] }
  0x52   :  { %1988 = vmatpush.bf16.msrb.mxu3 %v4498_v28  ;;  %v6383_v28 = vld [vmem:[#allocation5 + $0x424] sm:$0xf]  ;;  %v7086_v38 = vpack.c.b16 %v441_v23, %v441_v23  ;;  %v6521_v49 = vld [vmem:[#allocation5 + $0x874] sm:$0xf]  ;;  %v4687_v55 = vld [vmem:[#allocation5 + $0x3d8] sm:$0xf0] }
  0x53   :  { %1950 = vmatpush.bf16.msrb.mxu0 %v5046_v34  ;;  %v5119_v34 = vld [vmem:[#allocation5 + $0x738] sm:$0xf0]  ;;  %v4738_v39 = vor.u32 %v6383_v28, %v4735_v29  ;;  %v6419_v56 = vld [vmem:[#allocation5 + $0x544] sm:$0xf]  ;;  %v5290_v57 = vor.u32 %v6521_v49, %v5287_v50  ;;  %v6365_v2 = vld [vmem:[#allocation5 + $0x394] sm:$0xf] }
  0x54   :  { %1963 = vmatpush.bf16.msrb.mxu1 %v5238_v35  ;;  %v7084_v35 = vpack.c.b16 %v440_v14, %v440_v14  ;;  %v5122_v41 = vor.u32 %v6479_v33, %v5119_v34  ;;  %v6467_v59 = vld [vmem:[#allocation5 + $0x6c4] sm:$0xf]  ;;  %v5071_v60 = vld [vmem:[#allocation5 + $0x6d8] sm:$0xf0]  ;;  %v6413_v4 = vld [vmem:[#allocation5 + $0x514] sm:$0xf] }
  0x55   :  { %1976 = vmatpush.bf16.msrb.mxu2 %v4282_v36  ;;  %v6527_v36 = vld [vmem:[#allocation5 + $0x8a4] sm:$0xf]  ;;  %v5074_v1 = vor.u32 %v6467_v59, %v5071_v60  ;;  %v4855_v6 = vld [vmem:[#allocation5 + $0x528] sm:$0xf0]  ;;  %v6461_v7 = vld [vmem:[#allocation5 + $0x694] sm:$0xf] }
  0x56   :  { %1989 = vmatpush.bf16.msrb.mxu3 %v4474_v40  ;;  %v4930_v40 = vor.u32 %v6431_v30, %v4927_v32  ;;  %v5314_v45 = vor.u32 %v6527_v36, %v5311_v37  ;;  %v6515_v61 = vld [vmem:[#allocation5 + $0x844] sm:$0xf]  ;;  %v5047_v8 = vld [vmem:[#allocation5 + $0x6a8] sm:$0xf0]  ;;  %v6509_v9 = vld [vmem:[#allocation5 + $0x814] sm:$0xf]  ;;  %v4858_v12 = vor.u32 %v6413_v4, %v4855_v6 }
  0x57   :  { %1951 = vmatpush.bf16.msrb.mxu0 %v5022_v46  ;;  %v4903_v46 = vld [vmem:[#allocation5 + $0x588] sm:$0xf0]  ;;  %v5050_v13 = vor.u32 %v6461_v7, %v5047_v8  ;;  %v6359_v14 = vld [vmem:[#allocation5 + $0x364] sm:$0xf]  ;;  %v4831_v21 = vld [vmem:[#allocation5 + $0x4f8] sm:$0xf0] }
  0x58   :  { %1964 = vmatpush.bf16.msrb.mxu1 %v5214_v47  ;;  %v6473_v47 = vld [vmem:[#allocation5 + $0x6f4] sm:$0xf]  ;;  %v6455_v23 = vld [vmem:[#allocation5 + $0x664] sm:$0xf]  ;;  %v4807_v34 = vld [vmem:[#allocation5 + $0x4c8] sm:$0xf0] }
  0x59   :  { %1977 = vmatpush.bf16.msrb.mxu2 %v4258_v48  ;;  %v5095_v48 = vld [vmem:[#allocation5 + $0x708] sm:$0xf0]  ;;  %v6353_v30 = vld [vmem:[#allocation5 + $0x334] sm:$0xf]  ;;  %v6347_v42 = vld [vmem:[#allocation5 + $0x304] sm:$0xf] }
  0x5a   :  { %1990 = vmatpush.bf16.msrb.mxu3 %v4450_v52  ;;  %v4906_v52 = vor.u32 %v6425_v44, %v4903_v46  ;;  %v5098_v53 = vor.u32 %v6473_v47, %v5095_v48  ;;  %v6401_v32 = vld [vmem:[#allocation5 + $0x4b4] sm:$0xf]  ;;  %v4999_v37 = vld [vmem:[#allocation5 + $0x648] sm:$0xf0]  ;;  %v4591_v43 = vld [vmem:[#allocation5 + $0x318] sm:$0xf0] }
  0x5b   :  { %1952 = vmatpush.bf16.msrb.mxu0 %v4998_v58  ;;  %v4879_v58 = vld [vmem:[#allocation5 + $0x558] sm:$0xf0]  ;;  %v6449_v36 = vld [vmem:[#allocation5 + $0x634] sm:$0xf]  ;;  %v4810_v44 = vor.u32 %v6401_v32, %v4807_v34  ;;  %v6395_v46 = vld [vmem:[#allocation5 + $0x484] sm:$0xf] }
  0x5c   :  { %1965 = vmatpush.bf16.msrb.mxu1 %v5190_v62  ;;  %v5263_v62 = vld [vmem:[#allocation5 + $0x858] sm:$0xf0]  ;;  %v4882_v0 = vor.u32 %v6419_v56, %v4879_v58  ;;  %v6443_v48 = vld [vmem:[#allocation5 + $0x604] sm:$0xf]  ;;  %v4594_v56 = vor.u32 %v6347_v42, %v4591_v43  ;;  %v4765_v58 = vld [vmem:[#allocation5 + $0x458] sm:$0xf] }
  0x5d   :  { %1978 = vmatpush.bf16.msrb.mxu2 %v4234_v63  ;;  %v4690_v63 = vor.u32 %v6371_v54, %v4687_v55  ;;  %v5266_v5 = vor.u32 %v6515_v61, %v5263_v62  ;;  %v4783_v47 = vld [vmem:[#allocation5 + $0x498] sm:$0xf0]  ;;  %v6297_v54 = vld [vmem:[#allocation5 + $0x16c] sm:$0xf0]  ;;  %v4573_v55 = vld [vmem:[#allocation5 + $0x2d8] sm:$0xf] }
  0x5e   :  { %1991 = vmatpush.bf16.msrb.mxu3 %v4426_v3  ;;  %v4663_v3 = vld [vmem:[#allocation5 + $0x3a8] sm:$0xf0]  ;;  %v4975_v50 = vld [vmem:[#allocation5 + $0x618] sm:$0xf0]  ;;  %v6393_v59 = vld [vmem:[#allocation5 + $0x46c] sm:$0xf0]  ;;  %v4786_v60 = vor.u32 %v6395_v46, %v4783_v47 }
  0x5f   :  { %1953 = vmatpush.bf16.msrb.mxu0 %v4974_v10  ;;  %v5239_v10 = vld [vmem:[#allocation5 + $0x828] sm:$0xf0]  ;;  %v4666_v11 = vor.u32 %v6365_v2, %v4663_v3  ;;  %v4978_v61 = vor.u32 %v6443_v48, %v4975_v50  ;;  %v4957_v62 = vld [vmem:[#allocation5 + $0x5d8] sm:$0xf]  ;;  %v4766_v3 = vor.u32 %v6393_v59, %v4765_v58  ;;  %v4357_v4 = vld [vmem:[#allocation5 + $0x128] sm:$0xf] }
  0x60   :  { %1966 = vmatpush.bf16.msrb.mxu1 %v5166_v15  ;;  %v4639_v15 = vld [vmem:[#allocation5 + $0x378] sm:$0xf0]  ;;  %v5242_v17 = vor.u32 %v6509_v9, %v5239_v10  ;;  %v4549_v6 = vld [vmem:[#allocation5 + $0x2a8] sm:$0xf]  ;;  %v6339_v8 = vld [vmem:[#allocation5 + $0x2bc] sm:$0xf0] }
  0x61   :  { %1979 = vmatpush.bf16.msrb.mxu2 %v4210_v16  ;;  %v6407_v16 = vld [vmem:[#allocation5 + $0x4e4] sm:$0xf]  ;;  %v4741_v9 = vld [vmem:[#allocation5 + $0x428] sm:$0xf]  ;;  %v6387_v10 = vld [vmem:[#allocation5 + $0x43c] sm:$0xf0] }
  0x62   :  { %1992 = vmatpush.bf16.msrb.mxu3 %v4402_v24  ;;  %1954 = vmatmul.bf16.vlgmr.msrb.gmra.mxu0 %v7084_v35  ;;  %v5023_v24 = vld [vmem:[#allocation5 + $0x678] sm:$0xf0]  ;;  %v4834_v28 = vor.u32 %v6407_v16, %v4831_v21  ;;  %v4333_v16 = vld [vmem:[#allocation5 + $0xf8] sm:$0xf]  ;;  %v4309_v32 = vld [vmem:[#allocation5 + $0xc8] sm:$0xf] }
  0x63   :  { %1998 = vmatpush.bf16.msra.mxu0 %v4762_v25  ;;  %1967 = vmatmul.bf16.vlgmr.msrb.gmra.mxu1 %v7086_v38  ;;  %v6503_v25 = vld [vmem:[#allocation5 + $0x7e4] sm:$0xf]  ;;  %v5026_v29 = vor.u32 %v6455_v23, %v5023_v24  ;;  %v4525_v21 = vld [vmem:[#allocation5 + $0x278] sm:$0xf]  ;;  %v6333_v24 = vld [vmem:[#allocation5 + $0x28c] sm:$0xf0] }
  0x64   :  { %2011 = vmatpush.bf16.msra.mxu1 %v4954_v26  ;;  %1980 = vmatmul.bf16.vlgmr.msrb.gmra.mxu2 %v7074_v19  ;;  %v5215_v26 = vld [vmem:[#allocation5 + $0x7f8] sm:$0xf0]  ;;  %v4501_v34 = vld [vmem:[#allocation5 + $0x248] sm:$0xf]  ;;  %v6423_v42 = vld [vmem:[#allocation5 + $0x55c] sm:$0xf0] }
  0x65   :  { %2024 = vmatpush.bf16.msra.mxu2 %v5146_v27  ;;  %1993 = vmatmul.bf16.vlgmr.msrb.gmra.mxu3 %v7078_v22  ;;  %v4642_v27 = vor.u32 %v6359_v14, %v4639_v15  ;;  %v5218_v33 = vor.u32 %v6503_v25, %v5215_v26  ;;  %v4550_v14 = vor.u32 %v6339_v8, %v4549_v6  ;;  %v4717_v25 = vld [vmem:[#allocation5 + $0x3f8] sm:$0xf]  ;;  %v6381_v26 = vld [vmem:[#allocation5 + $0x40c] sm:$0xf0]  ;;  %v4261_v58 = vld [vmem:[#allocation5 + $0x68] sm:$0xf] }
  0x66   :  { %2037 = vmatpush.bf16.msra.mxu3 %v5338_v31  ;;  %v4615_v31 = vld [vmem:[#allocation5 + $0x348] sm:$0xf0]  ;;  %v4742_v15 = vor.u32 %v6387_v10, %v4741_v9  ;;  %v4285_v46 = vld [vmem:[#allocation5 + $0x98] sm:$0xf]  ;;  %v6273_v47 = vld [vmem:[#allocation5 + $0xac] sm:$0xf0] }
  0x67   :  { %1999 = vmatpush.bf16.msra.mxu0 %v4738_v39  ;;  %v6497_v39 = vld [vmem:[#allocation5 + $0x7b4] sm:$0xf]  ;;  %v4477_v48 = vld [vmem:[#allocation5 + $0x218] sm:$0xf]  ;;  %v6321_v50 = vld [vmem:[#allocation5 + $0x22c] sm:$0xf0] }
  0x68   :  { %2012 = vmatpush.bf16.msra.mxu1 %v4930_v40  ;;  %v5191_v40 = vld [vmem:[#allocation5 + $0x7c8] sm:$0xf0]  ;;  %v6267_v59 = vld [vmem:[#allocation5 + $0x7c] sm:$0xf0]  ;;  %v4237_v6 = vld [vmem:[#allocation5 + $0x38] sm:$0xf] }
  0x69   :  { %2025 = vmatpush.bf16.msra.mxu2 %v5122_v41  ;;  %v4618_v41 = vor.u32 %v6353_v30, %v4615_v31  ;;  %v5194_v49 = vor.u32 %v6497_v39, %v5191_v40  ;;  %v4526_v30 = vor.u32 %v6333_v24, %v4525_v21  ;;  %v4718_v31 = vor.u32 %v6381_v26, %v4717_v25  ;;  %v4693_v39 = vld [vmem:[#allocation5 + $0x3c8] sm:$0xf]  ;;  %v6375_v40 = vld [vmem:[#allocation5 + $0x3dc] sm:$0xf0]  ;;  %v4429_v8 = vld [vmem:[#allocation5 + $0x1b8] sm:$0xf] }
  0x6a   :  { %2038 = vmatpush.bf16.msra.mxu3 %v5314_v45  ;;  %v5002_v45 = vor.u32 %v6449_v36, %v4999_v37  ;;  %v6327_v37 = vld [vmem:[#allocation5 + $0x25c] sm:$0xf0]  ;;  %v6309_v10 = vld [vmem:[#allocation5 + $0x1cc] sm:$0xf0]  ;;  %v4405_v24 = vld [vmem:[#allocation5 + $0x188] sm:$0xf] }
  0x6b   :  { %2000 = vmatpush.bf16.msra.mxu0 %v4714_v51  ;;  %v6491_v51 = vld [vmem:[#allocation5 + $0x784] sm:$0xf]  ;;  %v4430_v21 = vor.u32 %v6309_v10, %v4429_v8  ;;  %v6303_v25 = vld [vmem:[#allocation5 + $0x19c] sm:$0xf0]  ;;  %v4597_v26 = vld [vmem:[#allocation5 + $0x308] sm:$0xf] }
  0x6c   :  { %2013 = vmatpush.bf16.msra.mxu1 %v4906_v52  ;;  %v5167_v52 = vld [vmem:[#allocation5 + $0x798] sm:$0xf0]  ;;  %v5077_v8 = vld [vmem:[#allocation5 + $0x6c8] sm:$0xf] }
  0x6d   :  { %2026 = vmatpush.bf16.msra.mxu2 %v5098_v53  ;;  %v4381_v53 = vld [vmem:[#allocation5 + $0x158] sm:$0xf]  ;;  %v5269_v10 = vld [vmem:[#allocation5 + $0x848] sm:$0xf] }
  0x6e   :  { %2039 = vmatpush.bf16.msra.mxu3 %v5290_v57  ;;  %v6345_v57 = vld [vmem:[#allocation5 + $0x2ec] sm:$0xf0] }
  0x6f   :  { %2001 = vmatpush.bf16.msra.mxu0 %v4690_v63  ;;  %v6441_v63 = vld [vmem:[#allocation5 + $0x5ec] sm:$0xf0]  ;;  %v4574_v2 = vor.u32 %v6345_v57, %v4573_v55  ;;  %v4286_v55 = vor.u32 %v6273_v47, %v4285_v46 }
  0x70   :  { %2014 = vmatpush.bf16.msra.mxu1 %v4882_v0  ;;  %v5170_v0 = vor.u32 %v6491_v51, %v5167_v52  ;;  %v4958_v7 = vor.u32 %v6441_v63, %v4957_v62  ;;  %v4669_v51 = vld [vmem:[#allocation5 + $0x398] sm:$0xf]  ;;  %v6369_v52 = vld [vmem:[#allocation5 + $0x3ac] sm:$0xf0]  ;;  %v6315_v62 = vld [vmem:[#allocation5 + $0x1fc] sm:$0xf0] }
  0x71   :  { %2027 = vmatpush.bf16.msra.mxu2 %v5074_v1  ;;  %v4382_v1 = vor.u32 %v6297_v54, %v4381_v53  ;;  %v4861_v53 = vld [vmem:[#allocation5 + $0x518] sm:$0xf]  ;;  %v6417_v54 = vld [vmem:[#allocation5 + $0x52c] sm:$0xf0]  ;;  %v4670_v57 = vor.u32 %v6369_v52, %v4669_v51  ;;  %v4645_v63 = vld [vmem:[#allocation5 + $0x368] sm:$0xf] }
  0x72   :  { %2040 = vmatpush.bf16.msra.mxu3 %v5266_v5  ;;  %v6291_v5 = vld [vmem:[#allocation5 + $0x13c] sm:$0xf0] }
  0x73   :  { %2002 = vmatpush.bf16.msra.mxu0 %v4666_v11  ;;  %v4933_v11 = vld [vmem:[#allocation5 + $0x5a8] sm:$0xf]  ;;  %v6531_v52 = vld [vmem:[#allocation5 + $0x8bc] sm:$0xf0] }
  0x74   :  { %2015 = vmatpush.bf16.msra.mxu1 %v4858_v12  ;;  %v6435_v12 = vld [vmem:[#allocation5 + $0x5bc] sm:$0xf0] }
  0x75   :  { %2028 = vmatpush.bf16.msra.mxu2 %v5050_v13  ;;  %v4358_v13 = vor.u32 %v6291_v5, %v4357_v4  ;;  %v4934_v23 = vor.u32 %v6435_v12, %v4933_v11  ;;  %v4621_v11 = vld [vmem:[#allocation5 + $0x338] sm:$0xf]  ;;  %v6357_v12 = vld [vmem:[#allocation5 + $0x34c] sm:$0xf0] }
  0x76   :  { %2041 = vmatpush.bf16.msra.mxu3 %v5242_v17  ;;  %v6285_v17 = vld [vmem:[#allocation5 + $0x10c] sm:$0xf0] }
  0x77   :  { %2003 = vmatpush.bf16.msra.mxu0 %v4642_v27  ;;  %v4909_v27 = vld [vmem:[#allocation5 + $0x578] sm:$0xf] }
  0x78   :  { %2016 = vmatpush.bf16.msra.mxu1 %v4834_v28  ;;  %v6429_v28 = vld [vmem:[#allocation5 + $0x58c] sm:$0xf0] }
  0x79   :  { %2029 = vmatpush.bf16.msra.mxu2 %v5026_v29  ;;  %v4334_v29 = vor.u32 %v6285_v17, %v4333_v16  ;;  %v4910_v36 = vor.u32 %v6429_v28, %v4909_v27  ;;  %v4213_v16 = vld [vmem:[#allocation5 + $0x8] sm:$0xf]  ;;  %v6255_v17 = vld [vmem:[#allocation5 + $0x1c] sm:$0xf0] }
  0x7a   :  { %2042 = vmatpush.bf16.msra.mxu3 %v5218_v33  ;;  %v6279_v33 = vld [vmem:[#allocation5 + $0xdc] sm:$0xf0] }
  0x7b   :  { %2004 = vmatpush.bf16.msra.mxu0 %v4618_v41  ;;  %v4885_v41 = vld [vmem:[#allocation5 + $0x548] sm:$0xf]  ;;  %v4310_v43 = vor.u32 %v6279_v33, %v4309_v32  ;;  %v6351_v28 = vld [vmem:[#allocation5 + $0x31c] sm:$0xf0]  ;;  %v6489_v32 = vld [vmem:[#allocation5 + $0x76c] sm:$0xf0] }
  0x7c   :  { %2017 = vmatpush.bf16.msra.mxu1 %v4810_v44  ;;  %v4502_v44 = vor.u32 %v6327_v37, %v4501_v34  ;;  %v5341_v33 = vld [vmem:[#allocation5 + $0x8d8] sm:$0xf]  ;;  %v4214_v34 = vor.u32 %v6255_v17, %v4213_v16  ;;  %v6294_v37 = vld [vmem:[#allocation5 + $0x15c] sm:$0xf]  ;;  %v4503_v16 = vld [vmem:[#allocation5 + $0x260] sm:$0xf0] }
  0x7d   :  { %2030 = vmatpush.bf16.msra.mxu2 %v5002_v45  ;;  %v4694_v45 = vor.u32 %v6375_v40, %v4693_v39  ;;  %v4383_v39 = vld [vmem:[#allocation5 + $0x170] sm:$0xf0]  ;;  %v4406_v40 = vor.u32 %v6303_v25, %v4405_v24  ;;  %v5053_v24 = vld [vmem:[#allocation5 + $0x698] sm:$0xf]  ;;  %v6465_v25 = vld [vmem:[#allocation5 + $0x6ac] sm:$0xf0] }
  0x7e   :  { %2043 = vmatpush.bf16.msra.mxu3 %v5194_v49  ;;  %v4886_v49 = vor.u32 %v6423_v42, %v4885_v41  ;;  %v4598_v41 = vor.u32 %v6351_v28, %v4597_v26  ;;  %v6342_v42 = vld [vmem:[#allocation5 + $0x2dc] sm:$0xf]  ;;  %v4386_v47 = vor.u32 %v6294_v37, %v4383_v39  ;;  %v5245_v26 = vld [vmem:[#allocation5 + $0x818] sm:$0xf]  ;;  %v6513_v28 = vld [vmem:[#allocation5 + $0x82c] sm:$0xf0] }
  0x7f   :  { %2005 = vmatpush.bf16.msra.mxu0 %v4594_v56  ;;  %v4478_v56 = vor.u32 %v6321_v50, %v4477_v48  ;;  %v5125_v48 = vld [vmem:[#allocation5 + $0x728] sm:$0xf]  ;;  %v6459_v39 = vld [vmem:[#allocation5 + $0x67c] sm:$0xf0] }
  0x80   :  { %2018 = vmatpush.bf16.msra.mxu1 %v4786_v60  ;;  %v4453_v60 = vld [vmem:[#allocation5 + $0x1e8] sm:$0xf] }
  0x81   :  { %2031 = vmatpush.bf16.msra.mxu2 %v4978_v61  ;;  %v4862_v61 = vor.u32 %v6417_v54, %v4861_v53  ;;  %v4454_v4 = vor.u32 %v6315_v62, %v4453_v60  ;;  %v5317_v50 = vld [vmem:[#allocation5 + $0x8a8] sm:$0xf]  ;;  %v6288_v53 = vld [vmem:[#allocation5 + $0x12c] sm:$0xf]  ;;  %v4359_v54 = vld [vmem:[#allocation5 + $0x140] sm:$0xf0] }
  0x82   :  { %2044 = vmatpush.bf16.msra.mxu3 %v5170_v0  ;;  %2006 = vmatmul.bf16.vlgmr.msra.gmra.mxu0 %v7072_v18  ;;  %v6363_v0 = vld [vmem:[#allocation5 + $0x37c] sm:$0xf0]  ;;  %v5101_v60 = vld [vmem:[#allocation5 + $0x6f8] sm:$0xf]  ;;  %v5029_v37 = vld [vmem:[#allocation5 + $0x668] sm:$0xf] }
  0x83   :  { %2050 = vmatpush.bf16.msrb.mxu0 %v4382_v1  ;;  %2019 = vmatmul.bf16.vlgmr.msra.gmra.mxu1 %v7076_v20  ;;  %v4837_v1 = vld [vmem:[#allocation5 + $0x4e8] sm:$0xf]  ;;  %v4646_v5 = vor.u32 %v6363_v0, %v4645_v63  ;;  %v5293_v62 = vld [vmem:[#allocation5 + $0x878] sm:$0xf]  ;;  %v6525_v0 = vld [vmem:[#allocation5 + $0x88c] sm:$0xf0] }
  0x84   :  { %2063 = vmatpush.bf16.msrb.mxu1 %v4574_v2  ;;  %2032 = vmatmul.bf16.vlgmr.msra.gmra.mxu2 %v7084_v35  ;;  %v6411_v2 = vld [vmem:[#allocation5 + $0x4fc] sm:$0xf0] }
  0x85   :  { %2076 = vmatpush.bf16.msrb.mxu2 %v4766_v3  ;;  %2045 = vmatmul.bf16.vlgmr.msra.gmra.mxu3 %v7086_v38  ;;  %v4262_v3 = vor.u32 %v6267_v59, %v4261_v58  ;;  %v4838_v9 = vor.u32 %v6411_v2, %v4837_v1  ;;  %v5318_v58 = vor.u32 %v6531_v52, %v5317_v50  ;;  %v6282_v1 = vld [vmem:[#allocation5 + $0xfc] sm:$0xf]  ;;  %v4335_v2 = vld [vmem:[#allocation5 + $0x110] sm:$0xf0]  ;;  %v5005_v50 = vld [vmem:[#allocation5 + $0x638] sm:$0xf] }
  0x86   :  { %2089 = vmatpush.bf16.msrb.mxu3 %v4958_v7  ;;  %v6261_v7 = vld [vmem:[#allocation5 + $0x4c] sm:$0xf0]  ;;  %v4362_v59 = vor.u32 %v6288_v53, %v4359_v54  ;;  %v5197_v52 = vld [vmem:[#allocation5 + $0x7b8] sm:$0xf] }
  0x87   :  { %2051 = vmatpush.bf16.msrb.mxu0 %v4358_v13  ;;  %v4813_v13 = vld [vmem:[#allocation5 + $0x4b8] sm:$0xf]  ;;  %v6501_v54 = vld [vmem:[#allocation5 + $0x7cc] sm:$0xf0] }
  0x88   :  { %2064 = vmatpush.bf16.msrb.mxu1 %v4550_v14  ;;  %v6405_v14 = vld [vmem:[#allocation5 + $0x4cc] sm:$0xf0] }
  0x89   :  { %2077 = vmatpush.bf16.msrb.mxu2 %v4742_v15  ;;  %v4238_v15 = vor.u32 %v6261_v7, %v4237_v6  ;;  %v4814_v27 = vor.u32 %v6405_v14, %v4813_v13  ;;  %v5294_v6 = vor.u32 %v6525_v0, %v5293_v62  ;;  %v4338_v7 = vor.u32 %v6282_v1, %v4335_v2  ;;  %v6276_v13 = vld [vmem:[#allocation5 + $0xcc] sm:$0xf]  ;;  %v4311_v14 = vld [vmem:[#allocation5 + $0xe0] sm:$0xf0]  ;;  %v5173_v0 = vld [vmem:[#allocation5 + $0x788] sm:$0xf] }
  0x8a   :  { %2090 = vmatpush.bf16.msrb.mxu3 %v4934_v23  ;;  %v4622_v23 = vor.u32 %v6357_v12, %v4621_v11  ;;  %v6519_v12 = vld [vmem:[#allocation5 + $0x85c] sm:$0xf0]  ;;  %v5198_v62 = vor.u32 %v6501_v54, %v5197_v52  ;;  %v6252_v2 = vld [vmem:[#allocation5 + $0xc] sm:$0xf] }
  0x8b   :  { %2052 = vmatpush.bf16.msrb.mxu0 %v4334_v29  ;;  %v4789_v29 = vld [vmem:[#allocation5 + $0x488] sm:$0xf]  ;;  %v6495_v1 = vld [vmem:[#allocation5 + $0x79c] sm:$0xf0]  ;;  %v6372_v52 = vld [vmem:[#allocation5 + $0x3cc] sm:$0xf] }
  0x8c   :  { %2065 = vmatpush.bf16.msrb.mxu1 %v4526_v30  ;;  %v6399_v30 = vld [vmem:[#allocation5 + $0x49c] sm:$0xf0]  ;;  %v6420_v54 = vld [vmem:[#allocation5 + $0x54c] sm:$0xf] }
  0x8d   :  { %2078 = vmatpush.bf16.msrb.mxu2 %v4718_v31  ;;  %v5149_v31 = vld [vmem:[#allocation5 + $0x758] sm:$0xf] }
  0x8e   :  { %2091 = vmatpush.bf16.msrb.mxu3 %v4910_v36  ;;  %v6537_v36 = vld [vmem:[#allocation5 + $0x8ec] sm:$0xf0] }
  0x8f   :  { %2053 = vmatpush.bf16.msrb.mxu0 %v4310_v43  ;;  %v4575_v43 = vld [vmem:[#allocation5 + $0x2f0] sm:$0xf0]  ;;  %v5342_v46 = vor.u32 %v6537_v36, %v5341_v33  ;;  %v5054_v33 = vor.u32 %v6465_v25, %v5053_v24 }
  0x90   :  { %2066 = vmatpush.bf16.msrb.mxu1 %v4502_v44  ;;  %v4790_v44 = vor.u32 %v6399_v30, %v4789_v29  ;;  %v4578_v51 = vor.u32 %v6342_v42, %v4575_v43  ;;  %v6270_v29 = vld [vmem:[#allocation5 + $0x9c] sm:$0xf]  ;;  %v4287_v30 = vld [vmem:[#allocation5 + $0xb0] sm:$0xf0]  ;;  %v6507_v42 = vld [vmem:[#allocation5 + $0x7fc] sm:$0xf0] }
  0x91   :  { %2079 = vmatpush.bf16.msrb.mxu2 %v4694_v45  ;;  %v5150_v45 = vor.u32 %v6489_v32, %v5149_v31  ;;  %v6318_v31 = vld [vmem:[#allocation5 + $0x21c] sm:$0xf]  ;;  %v4479_v32 = vld [vmem:[#allocation5 + $0x230] sm:$0xf0]  ;;  %v4290_v36 = vor.u32 %v6270_v29, %v4287_v30  ;;  %v6264_v43 = vld [vmem:[#allocation5 + $0x6c] sm:$0xf] }
  0x92   :  { %2092 = vmatpush.bf16.msrb.mxu3 %v4886_v49  ;;  %v6483_v49 = vld [vmem:[#allocation5 + $0x73c] sm:$0xf0]  ;;  %v4935_v30 = vld [vmem:[#allocation5 + $0x5c0] sm:$0xf0] }
  0x93   :  { %2054 = vmatpush.bf16.msrb.mxu0 %v4286_v55  ;;  %v6336_v55 = vld [vmem:[#allocation5 + $0x2ac] sm:$0xf] }
  0x94   :  { %2067 = vmatpush.bf16.msrb.mxu1 %v4478_v56  ;;  %v4551_v56 = vld [vmem:[#allocation5 + $0x2c0] sm:$0xf0] }
  0x95   :  { %2080 = vmatpush.bf16.msrb.mxu2 %v4670_v57  ;;  %v5126_v57 = vor.u32 %v6483_v49, %v5125_v48  ;;  %v4554_v63 = vor.u32 %v6336_v55, %v4551_v56  ;;  %v6258_v55 = vld [vmem:[#allocation5 + $0x3c] sm:$0xf]  ;;  %v4239_v56 = vld [vmem:[#allocation5 + $0x50] sm:$0xf0] }
  0x96   :  { %2093 = vmatpush.bf16.msrb.mxu3 %v4862_v61  ;;  %v6477_v61 = vld [vmem:[#allocation5 + $0x70c] sm:$0xf0] }
  0x97   :  { %2055 = vmatpush.bf16.msrb.mxu0 %v4262_v3  ;;  %v6330_v3 = vld [vmem:[#allocation5 + $0x27c] sm:$0xf] }
  0x98   :  { %2068 = vmatpush.bf16.msrb.mxu1 %v4454_v4  ;;  %v4527_v4 = vld [vmem:[#allocation5 + $0x290] sm:$0xf0] }
  0x99   :  { %2081 = vmatpush.bf16.msrb.mxu2 %v4646_v5  ;;  %v5102_v5 = vor.u32 %v6477_v61, %v5101_v60  ;;  %v4530_v11 = vor.u32 %v6330_v3, %v4527_v4  ;;  %v4981_v60 = vld [vmem:[#allocation5 + $0x608] sm:$0xf]  ;;  %v6447_v61 = vld [vmem:[#allocation5 + $0x61c] sm:$0xf0]  ;;  %v4215_v4 = vld [vmem:[#allocation5 + $0x20] sm:$0xf0] }
  0x9a   :  { %2094 = vmatpush.bf16.msrb.mxu3 %v4838_v9  ;;  %v6471_v9 = vld [vmem:[#allocation5 + $0x6dc] sm:$0xf0] }
  0x9b   :  { %2056 = vmatpush.bf16.msrb.mxu0 %v4238_v15  ;;  %v6324_v15 = vld [vmem:[#allocation5 + $0x24c] sm:$0xf]  ;;  %v5078_v17 = vor.u32 %v6471_v9, %v5077_v8  ;;  %v4767_v8 = vld [vmem:[#allocation5 + $0x470] sm:$0xf0]  ;;  %v6438_v9 = vld [vmem:[#allocation5 + $0x5dc] sm:$0xf] }
  0x9c   :  { %2069 = vmatpush.bf16.msrb.mxu1 %v4430_v21  ;;  %v5270_v21 = vor.u32 %v6519_v12, %v5269_v10  ;;  %v4982_v10 = vor.u32 %v6447_v61, %v4981_v60  ;;  %v6486_v12 = vld [vmem:[#allocation5 + $0x75c] sm:$0xf]  ;;  %v5271_v60 = vld [vmem:[#allocation5 + $0x860] sm:$0xf0] }
  0x9d   :  { %2082 = vmatpush.bf16.msrb.mxu2 %v4622_v23  ;;  %v4314_v23 = vor.u32 %v6276_v13, %v4311_v14  ;;  %v5151_v13 = vld [vmem:[#allocation5 + $0x770] sm:$0xf0]  ;;  %v5174_v14 = vor.u32 %v6495_v1, %v5173_v0 }
  0x9e   :  { %2095 = vmatpush.bf16.msrb.mxu3 %v4814_v27  ;;  %v4506_v27 = vor.u32 %v6324_v15, %v4503_v16  ;;  %v4218_v15 = vor.u32 %v6252_v2, %v4215_v4  ;;  %v6534_v16 = vld [vmem:[#allocation5 + $0x8dc] sm:$0xf]  ;;  %v5154_v25 = vor.u32 %v6486_v12, %v5151_v13  ;;  %v4671_v1 = vld [vmem:[#allocation5 + $0x3b0] sm:$0xf0] }
  0x9f   :  { %2057 = vmatpush.bf16.msrb.mxu0 %v4214_v34  ;;  %v5246_v34 = vor.u32 %v6513_v28, %v5245_v26  ;;  %v6384_v26 = vld [vmem:[#allocation5 + $0x42c] sm:$0xf]  ;;  %v6414_v2 = vld [vmem:[#allocation5 + $0x51c] sm:$0xf] }
  0xa0   :  { %2070 = vmatpush.bf16.msrb.mxu1 %v4406_v40  ;;  %v5221_v40 = vld [vmem:[#allocation5 + $0x7e8] sm:$0xf]  ;;  %v6432_v28 = vld [vmem:[#allocation5 + $0x5ac] sm:$0xf] }
  0xa1   :  { %2083 = vmatpush.bf16.msrb.mxu2 %v4598_v41  ;;  %v4482_v41 = vor.u32 %v6318_v31, %v4479_v32  ;;  %v5222_v48 = vor.u32 %v6507_v42, %v5221_v40  ;;  %v6480_v31 = vld [vmem:[#allocation5 + $0x72c] sm:$0xf]  ;;  %v5127_v32 = vld [vmem:[#allocation5 + $0x740] sm:$0xf0]  ;;  %v6378_v40 = vld [vmem:[#allocation5 + $0x3fc] sm:$0xf] }
  0xa2   :  { %2096 = vmatpush.bf16.msrb.mxu3 %v4790_v44  ;;  %2058 = vmatmul.bf16.vlgmr.msrb.gmra.mxu0 %v7074_v19  ;;  %v4263_v44 = vld [vmem:[#allocation5 + $0x80] sm:$0xf0]  ;;  %v6426_v42 = vld [vmem:[#allocation5 + $0x57c] sm:$0xf] }
  0xa3   :  { %2102 = vmatpush.bf16.msra.mxu0 %v5150_v45  ;;  %2071 = vmatmul.bf16.vlgmr.msrb.gmra.mxu1 %v7078_v22  ;;  %v6312_v45 = vld [vmem:[#allocation5 + $0x1ec] sm:$0xf]  ;;  %v4266_v49 = vor.u32 %v6264_v43, %v4263_v44  ;;  %v4911_v44 = vld [vmem:[#allocation5 + $0x590] sm:$0xf0] }
  0xa4   :  { %2115 = vmatpush.bf16.msra.mxu1 %v5342_v46  ;;  %2084 = vmatmul.bf16.vlgmr.msrb.gmra.mxu2 %v7072_v18  ;;  %v4455_v46 = vld [vmem:[#allocation5 + $0x200] sm:$0xf0] }
  0xa5   :  { %2128 = vmatpush.bf16.msra.mxu2 %v4386_v47  ;;  %2097 = vmatmul.bf16.vlgmr.msrb.gmra.mxu3 %v7076_v20  ;;  %v5030_v47 = vor.u32 %v6459_v39, %v5029_v37  ;;  %v4458_v53 = vor.u32 %v6312_v45, %v4455_v46  ;;  %v4938_v37 = vor.u32 %v6432_v28, %v4935_v30  ;;  %v6474_v45 = vld [vmem:[#allocation5 + $0x6fc] sm:$0xf]  ;;  %v5103_v46 = vld [vmem:[#allocation5 + $0x710] sm:$0xf0] }
  0xa6   :  { %2141 = vmatpush.bf16.msra.mxu3 %v4578_v51  ;;  %v6453_v51 = vld [vmem:[#allocation5 + $0x64c] sm:$0xf0]  ;;  %v5130_v39 = vor.u32 %v6480_v31, %v5127_v32  ;;  %v6354_v31 = vld [vmem:[#allocation5 + $0x33c] sm:$0xf]  ;;  %v4623_v32 = vld [vmem:[#allocation5 + $0x350] sm:$0xf0] }
  0xa7   :  { %2103 = vmatpush.bf16.msra.mxu0 %v5126_v57  ;;  %v6306_v57 = vld [vmem:[#allocation5 + $0x1bc] sm:$0xf] }
  0xa8   :  { %2116 = vmatpush.bf16.msra.mxu1 %v5318_v58  ;;  %v4431_v58 = vld [vmem:[#allocation5 + $0x1d0] sm:$0xf0] }
  0xa9   :  { %2129 = vmatpush.bf16.msra.mxu2 %v4362_v59  ;;  %v5006_v59 = vor.u32 %v6453_v51, %v5005_v50  ;;  %v4434_v3 = vor.u32 %v6306_v57, %v4431_v58  ;;  %v4914_v50 = vor.u32 %v6426_v42, %v4911_v44  ;;  %v5106_v51 = vor.u32 %v6474_v45, %v5103_v46  ;;  %v6468_v57 = vld [vmem:[#allocation5 + $0x6cc] sm:$0xf]  ;;  %v5079_v58 = vld [vmem:[#allocation5 + $0x6e0] sm:$0xf0]  ;;  %v6498_v42 = vld [vmem:[#allocation5 + $0x7bc] sm:$0xf] }
  0xaa   :  { %2142 = vmatpush.bf16.msra.mxu3 %v4554_v63  ;;  %v4242_v63 = vor.u32 %v6258_v55, %v4239_v56  ;;  %v4887_v56 = vld [vmem:[#allocation5 + $0x560] sm:$0xf0]  ;;  %v5082_v0 = vor.u32 %v6468_v57, %v5079_v58  ;;  %v4626_v45 = vor.u32 %v6354_v31, %v4623_v32  ;;  %v6348_v46 = vld [vmem:[#allocation5 + $0x30c] sm:$0xf] }
  0xab   :  { %2104 = vmatpush.bf16.msra.mxu0 %v5102_v5  ;;  %v6300_v5 = vld [vmem:[#allocation5 + $0x18c] sm:$0xf]  ;;  %v5175_v57 = vld [vmem:[#allocation5 + $0x7a0] sm:$0xf0] }
  0xac   :  { %2117 = vmatpush.bf16.msra.mxu1 %v5294_v6  ;;  %v4407_v6 = vld [vmem:[#allocation5 + $0x1a0] sm:$0xf0] }
  0xad   :  { %2130 = vmatpush.bf16.msra.mxu2 %v4338_v7  ;;  %v6390_v7 = vld [vmem:[#allocation5 + $0x45c] sm:$0xf] }
  0xae   :  { %2143 = vmatpush.bf16.msra.mxu3 %v4530_v11  ;;  %v4959_v11 = vld [vmem:[#allocation5 + $0x5f0] sm:$0xf0] }
  0xaf   :  { %2105 = vmatpush.bf16.msra.mxu0 %v5078_v17  ;;  %v5343_v17 = vld [vmem:[#allocation5 + $0x8f0] sm:$0xf0]  ;;  %v4962_v24 = vor.u32 %v6438_v9, %v4959_v11  ;;  %v6360_v11 = vld [vmem:[#allocation5 + $0x36c] sm:$0xf] }
  0xb0   :  { %2118 = vmatpush.bf16.msra.mxu1 %v5270_v21  ;;  %v4410_v21 = vor.u32 %v6300_v5, %v4407_v6  ;;  %v5346_v29 = vor.u32 %v6534_v16, %v5343_v17  ;;  %v6462_v5 = vld [vmem:[#allocation5 + $0x69c] sm:$0xf]  ;;  %v5055_v6 = vld [vmem:[#allocation5 + $0x6b0] sm:$0xf0] }
  0xb1   :  { %2131 = vmatpush.bf16.msra.mxu2 %v4314_v23  ;;  %v4770_v23 = vor.u32 %v6390_v7, %v4767_v8  ;;  %v7104_v7 = vld [vmem:[#allocation7] sm:$0x3f]  ;;  %v6510_v8 = vld [vmem:[#allocation5 + $0x81c] sm:$0xf]  ;;  %v5247_v9 = vld [vmem:[#allocation5 + $0x830] sm:$0xf0]  ;;  %v5058_v13 = vor.u32 %v6462_v5, %v5055_v6 }
  0xb2   :  { %2144 = vmatpush.bf16.msra.mxu3 %v4506_v27  ;;  %v4743_v27 = vld [vmem:[#allocation5 + $0x440] sm:$0xf0]  ;;  %v421_v16 = vperm.slane %v7104_v7, 0  ;;  %v5250_v17 = vor.u32 %v6510_v8, %v5247_v9  ;;  %v4965_v8 = vld [vmem:[#allocation5 + $0x5e0] sm:$0xf] }
  0xb3   :  { %2106 = vmatpush.bf16.msra.mxu0 %v5054_v33  ;;  %v6528_v33 = vld [vmem:[#allocation5 + $0x8ac] sm:$0xf]  ;;  %v6442_v9 = vld [vmem:[#allocation5 + $0x5f4] sm:$0xf0] }
  0xb4   :  { %2119 = vmatpush.bf16.msra.mxu1 %v5246_v34  ;;  %v5319_v34 = vld [vmem:[#allocation5 + $0x8c0] sm:$0xf0] }
  0xb5   :  { %2132 = vmatpush.bf16.msra.mxu2 %v4290_v36  ;;  %v4746_v36 = vor.u32 %v6384_v26, %v4743_v27  ;;  %v5322_v43 = vor.u32 %v6528_v33, %v5319_v34  ;;  %v5223_v26 = vld [vmem:[#allocation5 + $0x800] sm:$0xf0]  ;;  %v6402_v33 = vld [vmem:[#allocation5 + $0x4bc] sm:$0xf] }
  0xb6   :  { %2145 = vmatpush.bf16.msra.mxu3 %v4482_v41  ;;  %v4719_v41 = vld [vmem:[#allocation5 + $0x410] sm:$0xf0] }
  0xb7   :  { %2107 = vmatpush.bf16.msra.mxu0 %v5030_v47  ;;  %v6522_v47 = vld [vmem:[#allocation5 + $0x87c] sm:$0xf] }
  0xb8   :  { %2120 = vmatpush.bf16.msra.mxu1 %v5222_v48  ;;  %v5295_v48 = vld [vmem:[#allocation5 + $0x890] sm:$0xf0] }
  0xb9   :  { %2133 = vmatpush.bf16.msra.mxu2 %v4266_v49  ;;  %v4722_v49 = vor.u32 %v6378_v40, %v4719_v41  ;;  %v5298_v55 = vor.u32 %v6522_v47, %v5295_v48  ;;  %v6450_v40 = vld [vmem:[#allocation5 + $0x63c] sm:$0xf]  ;;  %v5007_v41 = vld [vmem:[#allocation5 + $0x650] sm:$0xf0]  ;;  %v4599_v47 = vld [vmem:[#allocation5 + $0x320] sm:$0xf0] }
  0xba   :  { %2146 = vmatpush.bf16.msra.mxu3 %v4458_v53  ;;  %v4695_v53 = vld [vmem:[#allocation5 + $0x3e0] sm:$0xf0] }
  0xbb   :  { %2108 = vmatpush.bf16.msra.mxu0 %v5006_v59  ;;  %v6516_v59 = vld [vmem:[#allocation5 + $0x84c] sm:$0xf]  ;;  %v4698_v61 = vor.u32 %v6372_v52, %v4695_v53 }
  0xbc   :  { %2121 = vmatpush.bf16.msra.mxu1 %v5198_v62  ;;  %v6366_v62 = vld [vmem:[#allocation5 + $0x39c] sm:$0xf]  ;;  %v5274_v4 = vor.u32 %v6516_v59, %v5271_v60  ;;  %v6444_v52 = vld [vmem:[#allocation5 + $0x60c] sm:$0xf]  ;;  %v4389_v60 = vld [vmem:[#allocation5 + $0x160] sm:$0xf] }
  0xbd   :  { %2134 = vmatpush.bf16.msra.mxu2 %v4242_v63  ;;  %v4890_v63 = vor.u32 %v6420_v54, %v4887_v56  ;;  %v6492_v56 = vld [vmem:[#allocation5 + $0x78c] sm:$0xf] }
  0xbe   :  { %2147 = vmatpush.bf16.msra.mxu3 %v4434_v3  ;;  %v4863_v3 = vld [vmem:[#allocation5 + $0x530] sm:$0xf0] }
  0xbf   :  { %2109 = vmatpush.bf16.msra.mxu0 %v4982_v10  ;;  %v4674_v10 = vor.u32 %v6366_v62, %v4671_v1  ;;  %v4866_v12 = vor.u32 %v6414_v2, %v4863_v3  ;;  %v4581_v62 = vld [vmem:[#allocation5 + $0x2e0] sm:$0xf]  ;;  %v6394_v2 = vld [vmem:[#allocation5 + $0x474] sm:$0xf0] }
  0xc0   :  { %2122 = vmatpush.bf16.msra.mxu1 %v5174_v14  ;;  %v4647_v14 = vld [vmem:[#allocation5 + $0x380] sm:$0xf0]  ;;  %v4773_v1 = vld [vmem:[#allocation5 + $0x460] sm:$0xf] }
  0xc1   :  { %2135 = vmatpush.bf16.msra.mxu2 %v4218_v15  ;;  %v6408_v15 = vld [vmem:[#allocation5 + $0x4ec] sm:$0xf]  ;;  %v4650_v27 = vor.u32 %v6360_v11, %v4647_v14  ;;  %v5178_v11 = vor.u32 %v6492_v56, %v5175_v57  ;;  %v4774_v14 = vor.u32 %v6394_v2, %v4773_v1  ;;  %v6322_v2 = vld [vmem:[#allocation5 + $0x234] sm:$0xf0] }
  0xc2   :  { %2148 = vmatpush.bf16.msra.mxu3 %v4410_v21  ;;  %2110 = vmatmul.bf16.vlgmr.msra.gmra.mxu0 %v7084_v35  ;;  %v4839_v21 = vld [vmem:[#allocation5 + $0x500] sm:$0xf0]  ;;  %v1903_v28 = vpop.f32.mrf.mxu0 }
  0xc3   :  { %2154 = vmatpush.bf16.msrb.mxu0 %v4770_v23  ;;  %2123 = vmatmul.bf16.vlgmr.msra.gmra.mxu1 %v7086_v38  ;;  %v6456_v23 = vld [vmem:[#allocation5 + $0x66c] sm:$0xf]  ;;  %v1904_v34 = vadd.f32 %v1903_v28, %v421_v16  ;;  %v6292_v16 = vld [vmem:[#allocation5 + $0x144] sm:$0xf0] }
  0xc4   :  { %2167 = vmatpush.bf16.msrb.mxu1 %v4962_v24  ;;  %2136 = vmatmul.bf16.vlgmr.msra.gmra.mxu2 %v7074_v19  ;;  %v5031_v24 = vld [vmem:[#allocation5 + $0x680] sm:$0xf0] }
  0xc5   :  { %2180 = vmatpush.bf16.msrb.mxu2 %v5154_v25  ;;  %2149 = vmatmul.bf16.vlgmr.msra.gmra.mxu3 %v7078_v22  ;;  %v6504_v25 = vld [vmem:[#allocation5 + $0x7ec] sm:$0xf]  ;;  %v5034_v30 = vor.u32 %v6456_v23, %v5031_v24  ;;  %v6340_v23 = vld [vmem:[#allocation5 + $0x2c4] sm:$0xf0]  ;;  %v4749_v24 = vld [vmem:[#allocation5 + $0x430] sm:$0xf] }
  0xc6   :  { %2193 = vmatpush.bf16.msrb.mxu3 %v5346_v29  ;;  %v4842_v29 = vor.u32 %v6408_v15, %v4839_v21  ;;  %v4365_v15 = vld [vmem:[#allocation5 + $0x130] sm:$0xf]  ;;  %v4966_v21 = vor.u32 %v6442_v9, %v4965_v8  ;;  %v4869_v8 = vld [vmem:[#allocation5 + $0x520] sm:$0xf]  ;;  %v6418_v9 = vld [vmem:[#allocation5 + $0x534] sm:$0xf0] }
  0xc7   :  { %2155 = vmatpush.bf16.msrb.mxu0 %v4746_v36  ;;  %v1916_v36 = vpop.f32.mrf.mxu1  ;;  %v1929_v53 = vpop.f32.mrf.mxu2 }
  0xc8   :  { %2168 = vmatpush.bf16.msrb.mxu1 %v4938_v37  ;;  %v5226_v37 = vor.u32 %v6504_v25, %v5223_v26  ;;  %v1917_v44 = vadd.f32 %v1916_v36, %v1904_v34  ;;  %v6388_v25 = vld [vmem:[#allocation5 + $0x444] sm:$0xf0]  ;;  %v4941_v26 = vld [vmem:[#allocation5 + $0x5b0] sm:$0xf]  ;;  %v6286_v34 = vld [vmem:[#allocation5 + $0x114] sm:$0xf0] }
  0xc9   :  { %2181 = vmatpush.bf16.msrb.mxu2 %v5130_v39  ;;  %v4815_v39 = vld [vmem:[#allocation5 + $0x4d0] sm:$0xf0]  ;;  %v4750_v32 = vor.u32 %v6388_v25, %v4749_v24  ;;  %v4533_v36 = vld [vmem:[#allocation5 + $0x280] sm:$0xf]  ;;  %v4845_v25 = vld [vmem:[#allocation5 + $0x4f0] sm:$0xf] }
  0xca   :  { %2194 = vmatpush.bf16.msrb.mxu3 %v5322_v43  ;;  %v5199_v43 = vld [vmem:[#allocation5 + $0x7d0] sm:$0xf0]  ;;  %v4818_v48 = vor.u32 %v6402_v33, %v4815_v39  ;;  %v1930_v58 = vadd.f32 %v1929_v53, %v1917_v44  ;;  %v1942_v59 = vpop.f32.mrf.mxu3  ;;  %v4341_v33 = vld [vmem:[#allocation5 + $0x100] sm:$0xf]  ;;  %v6334_v39 = vld [vmem:[#allocation5 + $0x294] sm:$0xf0] }
  0xcb   :  { %2156 = vmatpush.bf16.msrb.mxu0 %v4722_v49  ;;  %v5010_v49 = vor.u32 %v6450_v40, %v5007_v41  ;;  %v5202_v54 = vor.u32 %v6498_v42, %v5199_v43  ;;  %v4725_v40 = vld [vmem:[#allocation5 + $0x400] sm:$0xf]  ;;  %v6382_v41 = vld [vmem:[#allocation5 + $0x414] sm:$0xf0]  ;;  %v4342_v44 = vor.u32 %v6286_v34, %v4341_v33  ;;  %v6376_v53 = vld [vmem:[#allocation5 + $0x3e4] sm:$0xf0] }
  0xcc   :  { %2169 = vmatpush.bf16.msrb.mxu1 %v4914_v50  ;;  %v6396_v50 = vld [vmem:[#allocation5 + $0x48c] sm:$0xf]  ;;  %v7107_v3 = vadd.f32 %v1942_v59, %v1930_v58  ;;  %v4917_v42 = vld [vmem:[#allocation5 + $0x580] sm:$0xf]  ;;  %v6430_v43 = vld [vmem:[#allocation5 + $0x594] sm:$0xf0] }
  0xcd   :  { %2182 = vmatpush.bf16.msrb.mxu2 %v5106_v51  ;;  %v4791_v51 = vld [vmem:[#allocation5 + $0x4a0] sm:$0xf0]  ;;  %v4245_v34 = vld [vmem:[#allocation5 + $0x40] sm:$0xf] }
  0xce   :  { %2195 = vmatpush.bf16.msrb.mxu3 %v5298_v55  ;;  %v4983_v55 = vld [vmem:[#allocation5 + $0x620] sm:$0xf0]  ;;  %v4794_v5 = vor.u32 %v6396_v50, %v4791_v51  ;;  %v4918_v50 = vor.u32 %v6430_v43, %v4917_v42  ;;  %v6328_v51 = vld [vmem:[#allocation5 + $0x264] sm:$0xf0]  ;;  %v4629_v42 = vld [vmem:[#allocation5 + $0x340] sm:$0xf] }
  0xcf   :  { %2157 = vmatpush.bf16.msrb.mxu0 %v4698_v61  ;;  %v6298_v61 = vld [vmem:[#allocation5 + $0x174] sm:$0xf0]  ;;  %v4986_v6 = vor.u32 %v6444_v52, %v4983_v55  ;;  %v1931_v28 = vpop.f32.mrf.mxu2  ;;  %v4701_v52 = vld [vmem:[#allocation5 + $0x3d0] sm:$0xf]  ;;  %v6424_v55 = vld [vmem:[#allocation5 + $0x564] sm:$0xf0] }
  0xd0   :  { %2170 = vmatpush.bf16.msrb.mxu1 %v4890_v63  ;;  %v4602_v63 = vor.u32 %v6348_v46, %v4599_v47  ;;  %v4726_v46 = vor.u32 %v6382_v41, %v4725_v40  ;;  %v4317_v47 = vld [vmem:[#allocation5 + $0xd0] sm:$0xf]  ;;  %v6310_v41 = vld [vmem:[#allocation5 + $0x1d4] sm:$0xf0] }
  0xd1   :  { %2183 = vmatpush.bf16.msrb.mxu2 %v5082_v0  ;;  %v6346_v0 = vld [vmem:[#allocation5 + $0x2f4] sm:$0xf0] }
  0xd2   :  { %2196 = vmatpush.bf16.msrb.mxu3 %v5274_v4  ;;  %v1905_v4 = vpop.f32.mrf.mxu0  ;;  %v6358_v43 = vld [vmem:[#allocation5 + $0x354] sm:$0xf0] }
  0xd3   :  { %2158 = vmatpush.bf16.msrb.mxu0 %v4674_v10  ;;  %v1918_v10 = vpop.f32.mrf.mxu1  ;;  %v4677_v4 = vld [vmem:[#allocation5 + $0x3a0] sm:$0xf] }
  0xd4   :  { %2171 = vmatpush.bf16.msrb.mxu1 %v4866_v12  ;;  %v4390_v12 = vor.u32 %v6298_v61, %v4389_v60  ;;  %v4702_v61 = vor.u32 %v6376_v53, %v4701_v52  ;;  %v422_v10 = vperm.slane %v7104_v7, 1  ;;  %v6304_v52 = vld [vmem:[#allocation5 + $0x1a4] sm:$0xf0]  ;;  %v4605_v53 = vld [vmem:[#allocation5 + $0x310] sm:$0xf] }
  0xd5   :  { %2184 = vmatpush.bf16.msrb.mxu2 %v5058_v13  ;;  %v4582_v13 = vor.u32 %v6346_v0, %v4581_v62  ;;  %v4293_v62 = vld [vmem:[#allocation5 + $0xa0] sm:$0xf] }
  0xd6   :  { %2197 = vmatpush.bf16.msrb.mxu3 %v5250_v17  ;;  %v4557_v17 = vld [vmem:[#allocation5 + $0x2b0] sm:$0xf]  ;;  %v4485_v0 = vld [vmem:[#allocation5 + $0x220] sm:$0xf] }
  0xd7   :  { %2159 = vmatpush.bf16.msrb.mxu0 %v4650_v27  ;;  %v6436_v27 = vld [vmem:[#allocation5 + $0x5c4] sm:$0xf0]  ;;  %v4558_v31 = vor.u32 %v6340_v23, %v4557_v17 }
  0xd8   :  { %2172 = vmatpush.bf16.msrb.mxu1 %v4842_v29  ;;  %v4366_v29 = vor.u32 %v6292_v16, %v4365_v15  ;;  %v4461_v15 = vld [vmem:[#allocation5 + $0x1f0] sm:$0xf]  ;;  %v4870_v16 = vor.u32 %v6418_v9, %v4869_v8  ;;  %v6316_v17 = vld [vmem:[#allocation5 + $0x204] sm:$0xf0]  ;;  %v6343_v8 = vld [vmem:[#allocation5 + $0x2e4] sm:$0xf] }
  0xd9   :  { %2185 = vmatpush.bf16.msrb.mxu2 %v5034_v30  ;;  %v1944_v30 = vpop.f32.mrf.mxu3  ;;  %v6364_v23 = vld [vmem:[#allocation5 + $0x384] sm:$0xf0]  ;;  %v4583_v9 = vld [vmem:[#allocation5 + $0x2f8] sm:$0xf0] }
  0xda   :  { %2198 = vmatpush.bf16.msrb.mxu3 %v5226_v37  ;;  %v4942_v37 = vor.u32 %v6436_v27, %v4941_v26  ;;  %v6412_v26 = vld [vmem:[#allocation5 + $0x504] sm:$0xf0] }
  0xdb   :  { %2160 = vmatpush.bf16.msrb.mxu0 %v4626_v45  ;;  %v4534_v45 = vor.u32 %v6334_v39, %v4533_v36  ;;  %v6262_v36 = vld [vmem:[#allocation5 + $0x54] sm:$0xf0]  ;;  %v4846_v40 = vor.u32 %v6412_v26, %v4845_v25  ;;  %v4559_v25 = vld [vmem:[#allocation5 + $0x2c8] sm:$0xf0] }
  0xdc   :  { %2173 = vmatpush.bf16.msrb.mxu1 %v4818_v48  ;;  %v6280_v48 = vld [vmem:[#allocation5 + $0xe4] sm:$0xf0] }
  0xdd   :  { %2186 = vmatpush.bf16.msrb.mxu2 %v5010_v49  ;;  %v4509_v49 = vld [vmem:[#allocation5 + $0x250] sm:$0xf]  ;;  %v4318_v57 = vor.u32 %v6280_v48, %v4317_v47  ;;  %v6256_v48 = vld [vmem:[#allocation5 + $0x24] sm:$0xf0] }
  0xde   :  { %2199 = vmatpush.bf16.msrb.mxu3 %v5202_v54  ;;  %v4893_v54 = vld [vmem:[#allocation5 + $0x550] sm:$0xf]  ;;  %v4510_v60 = vor.u32 %v6328_v51, %v4509_v49 }
  0xdf   :  { %2161 = vmatpush.bf16.msrb.mxu0 %v4602_v63  ;;  %v1955_v56 = vpop.f32.mrf.mxu0  ;;  %v6274_v63 = vld [vmem:[#allocation5 + $0xb4] sm:$0xf0]  ;;  %v4894_v1 = vor.u32 %v6424_v55, %v4893_v54  ;;  %v4221_v47 = vld [vmem:[#allocation5 + $0x10] sm:$0xf]  ;;  %v6352_v55 = vld [vmem:[#allocation5 + $0x324] sm:$0xf0] }
  0xe0   :  { %2174 = vmatpush.bf16.msrb.mxu1 %v4794_v5  ;;  %v1956_v58 = vadd.f32 %v1955_v56, %v7107_v3  ;;  %v1968_v59 = vpop.f32.mrf.mxu1  ;;  %v6370_v5 = vld [vmem:[#allocation5 + $0x3b4] sm:$0xf0]  ;;  %v4294_v3 = vor.u32 %v6274_v63, %v4293_v62  ;;  %v4413_v51 = vld [vmem:[#allocation5 + $0x190] sm:$0xf]  ;;  %v4222_v63 = vor.u32 %v6256_v48, %v4221_v47  ;;  %v6520_v48 = vld [vmem:[#allocation5 + $0x864] sm:$0xf0] }
  0xe1   :  { %2187 = vmatpush.bf16.msrb.mxu2 %v4986_v6  ;;  %v4797_v56 = vld [vmem:[#allocation5 + $0x490] sm:$0xf] }
  0xe2   :  { %2200 = vmatpush.bf16.msrb.mxu3 %v5178_v11  ;;  %2162 = vmatmul.bf16.vlgmr.msrb.gmra.mxu0 %v7072_v18  ;;  %v7114_v6 = vadd.f32 %v1968_v59, %v1956_v58  ;;  %v4486_v11 = vor.u32 %v6322_v2, %v4485_v0  ;;  %v5157_v59 = vld [vmem:[#allocation5 + $0x760] sm:$0xf]  ;;  %v6538_v0 = vld [vmem:[#allocation5 + $0x8f4] sm:$0xf0]  ;;  %v4391_v2 = vld [vmem:[#allocation5 + $0x178] sm:$0xf0] }
  0xe3   :  { %2206 = vmatpush.bf16.msra.mxu0 %v4390_v12  ;;  %2175 = vmatmul.bf16.vlgmr.msrb.gmra.mxu1 %v7076_v20  ;;  %v4678_v12 = vor.u32 %v6370_v5, %v4677_v4  ;;  %v4414_v4 = vor.u32 %v6304_v52, %v4413_v51  ;;  %v4606_v5 = vor.u32 %v6352_v55, %v4605_v53  ;;  %v6325_v51 = vld [vmem:[#allocation5 + $0x254] sm:$0xf]  ;;  %v4511_v52 = vld [vmem:[#allocation5 + $0x268] sm:$0xf0] }
  0xe4   :  { %2219 = vmatpush.bf16.msra.mxu1 %v4582_v13  ;;  %2188 = vmatmul.bf16.vlgmr.msrb.gmra.mxu2 %v7084_v35  ;;  %v4269_v13 = vld [vmem:[#allocation5 + $0x70] sm:$0xf] }
  0xe5   :  { %2232 = vmatpush.bf16.msra.mxu2 %v4774_v14  ;;  %2201 = vmatmul.bf16.vlgmr.msrb.gmra.mxu3 %v7086_v38  ;;  %v6268_v14 = vld [vmem:[#allocation5 + $0x84] sm:$0xf0] }
  0xe6   :  { %2245 = vmatpush.bf16.msra.mxu3 %v4966_v21  ;;  %v4653_v21 = vld [vmem:[#allocation5 + $0x370] sm:$0xf]  ;;  %v4270_v30 = vor.u32 %v6268_v14, %v4269_v13  ;;  %v6484_v14 = vld [vmem:[#allocation5 + $0x744] sm:$0xf0] }
  0xe7   :  { %2207 = vmatpush.bf16.msra.mxu0 %v4366_v29  ;;  %v1981_v24 = vpop.f32.mrf.mxu2  ;;  %v1957_v29 = vpop.f32.mrf.mxu0  ;;  %v4654_v33 = vor.u32 %v6364_v23, %v4653_v21  ;;  %v5133_v13 = vld [vmem:[#allocation5 + $0x730] sm:$0xf]  ;;  %v6289_v21 = vld [vmem:[#allocation5 + $0x134] sm:$0xf]  ;;  %v4367_v23 = vld [vmem:[#allocation5 + $0x148] sm:$0xf0] }
  0xe8   :  { %2220 = vmatpush.bf16.msra.mxu1 %v4558_v31  ;;  %v1982_v27 = vadd.f32 %v1981_v24, %v422_v10  ;;  %v1994_v28 = vpop.f32.mrf.mxu3  ;;  %v1970_v31 = vpop.f32.mrf.mxu1  ;;  %v6337_v24 = vld [vmem:[#allocation5 + $0x2b4] sm:$0xf]  ;;  %v5134_v26 = vor.u32 %v6484_v14, %v5133_v13  ;;  %v5109_v29 = vld [vmem:[#allocation5 + $0x700] sm:$0xf]  ;;  %v6508_v14 = vld [vmem:[#allocation5 + $0x804] sm:$0xf0] }
  0xe9   :  { %2233 = vmatpush.bf16.msra.mxu2 %v4750_v32  ;;  %v4462_v32 = vor.u32 %v6316_v17, %v4461_v15  ;;  %v5325_v15 = vld [vmem:[#allocation5 + $0x8b0] sm:$0xf]  ;;  %v6532_v17 = vld [vmem:[#allocation5 + $0x8c4] sm:$0xf0]  ;;  %v5301_v31 = vld [vmem:[#allocation5 + $0x880] sm:$0xf] }
  0xea   :  { %2246 = vmatpush.bf16.msra.mxu3 %v4942_v37  ;;  %v4437_v37 = vld [vmem:[#allocation5 + $0x1c0] sm:$0xf]  ;;  %v7117_v39 = vadd.f32 %v1994_v28, %v1982_v27  ;;  %v5326_v27 = vor.u32 %v6532_v17, %v5325_v15  ;;  %v4370_v28 = vor.u32 %v6289_v21, %v4367_v23  ;;  %v6265_v15 = vld [vmem:[#allocation5 + $0x74] sm:$0xf] }
  0xeb   :  { %2208 = vmatpush.bf16.msra.mxu0 %v4342_v44  ;;  %v4821_v44 = vld [vmem:[#allocation5 + $0x4c0] sm:$0xf]  ;;  %v4438_v49 = vor.u32 %v6310_v41, %v4437_v37  ;;  %v6331_v37 = vld [vmem:[#allocation5 + $0x284] sm:$0xf]  ;;  %v6313_v23 = vld [vmem:[#allocation5 + $0x1f4] sm:$0xf] }
  0xec   :  { %2221 = vmatpush.bf16.msra.mxu1 %v4534_v45  ;;  %v6406_v45 = vld [vmem:[#allocation5 + $0x4d4] sm:$0xf0] }
  0xed   :  { %2234 = vmatpush.bf16.msra.mxu2 %v4726_v46  ;;  %v4246_v46 = vor.u32 %v6262_v36, %v4245_v34  ;;  %v4822_v54 = vor.u32 %v6406_v45, %v4821_v44  ;;  %v6283_v34 = vld [vmem:[#allocation5 + $0x104] sm:$0xf]  ;;  %v4343_v36 = vld [vmem:[#allocation5 + $0x118] sm:$0xf0]  ;;  %v5085_v44 = vld [vmem:[#allocation5 + $0x6d0] sm:$0xf] }
  0xee   :  { %2247 = vmatpush.bf16.msra.mxu3 %v4918_v50  ;;  %v4630_v50 = vor.u32 %v6358_v43, %v4629_v42  ;;  %v4346_v43 = vor.u32 %v6283_v34, %v4343_v36  ;;  %v6472_v45 = vld [vmem:[#allocation5 + $0x6e4] sm:$0xf0]  ;;  %v6502_v36 = vld [vmem:[#allocation5 + $0x7d4] sm:$0xf0] }
  0xef   :  { %2209 = vmatpush.bf16.msra.mxu0 %v4318_v57  ;;  %v6400_v57 = vld [vmem:[#allocation5 + $0x4a4] sm:$0xf0]  ;;  %v1983_v58 = vpop.f32.mrf.mxu2  ;;  %v5086_v53 = vor.u32 %v6472_v45, %v5085_v44  ;;  %v4989_v44 = vld [vmem:[#allocation5 + $0x610] sm:$0xf] }
  0xf0   :  { %2222 = vmatpush.bf16.msra.mxu1 %v4510_v60  ;;  %v6490_v60 = vld [vmem:[#allocation5 + $0x774] sm:$0xf0]  ;;  %v1996_v62 = vpop.f32.mrf.mxu3  ;;  %v4798_v10 = vor.u32 %v6400_v57, %v4797_v56  ;;  %v5061_v57 = vld [vmem:[#allocation5 + $0x6a0] sm:$0xf]  ;;  %v6448_v45 = vld [vmem:[#allocation5 + $0x624] sm:$0xf0] }
  0xf1   :  { %2235 = vmatpush.bf16.msra.mxu2 %v4702_v61  ;;  %v5349_v61 = vld [vmem:[#allocation5 + $0x8e0] sm:$0xf]  ;;  %v6466_v58 = vld [vmem:[#allocation5 + $0x6b4] sm:$0xf0]  ;;  %v4514_v62 = vor.u32 %v6325_v51, %v4511_v52 }
  0xf2   :  { %2248 = vmatpush.bf16.msra.mxu3 %v4894_v1  ;;  %v6295_v1 = vld [vmem:[#allocation5 + $0x164] sm:$0xf] }
  0xf3   :  { %2210 = vmatpush.bf16.msra.mxu0 %v4294_v3  ;;  %v5158_v3 = vor.u32 %v6490_v60, %v5157_v59  ;;  %v5253_v59 = vld [vmem:[#allocation5 + $0x820] sm:$0xf] }
  0xf4   :  { %2223 = vmatpush.bf16.msra.mxu1 %v4486_v11  ;;  %v5350_v11 = vor.u32 %v6538_v0, %v5349_v61  ;;  %v6271_v0 = vld [vmem:[#allocation5 + $0xa4] sm:$0xf] }
  0xf5   :  { %2236 = vmatpush.bf16.msra.mxu2 %v4678_v12  ;;  %v4394_v12 = vor.u32 %v6295_v1, %v4391_v2  ;;  %v4295_v1 = vld [vmem:[#allocation5 + $0xb8] sm:$0xf0]  ;;  %v6319_v2 = vld [vmem:[#allocation5 + $0x224] sm:$0xf] }
  0xf6   :  { %2249 = vmatpush.bf16.msra.mxu3 %v4870_v16  ;;  %v4586_v16 = vor.u32 %v6343_v8, %v4583_v9  ;;  %v5062_v8 = vor.u32 %v6466_v58, %v5061_v57  ;;  %v6391_v57 = vld [vmem:[#allocation5 + $0x464] sm:$0xf]  ;;  %v4775_v58 = vld [vmem:[#allocation5 + $0x478] sm:$0xf0] }
  0xf7   :  { %2211 = vmatpush.bf16.msra.mxu0 %v4270_v30  ;;  %v6478_v30 = vld [vmem:[#allocation5 + $0x714] sm:$0xf0] }
  0xf8   :  { %2224 = vmatpush.bf16.msra.mxu1 %v4462_v32  ;;  %v4562_v32 = vor.u32 %v6337_v24, %v4559_v25  ;;  %v5110_v41 = vor.u32 %v6478_v30, %v5109_v29  ;;  %v4463_v24 = vld [vmem:[#allocation5 + $0x208] sm:$0xf0]  ;;  %v5013_v30 = vld [vmem:[#allocation5 + $0x640] sm:$0xf] }
  0xf9   :  { %2237 = vmatpush.bf16.msra.mxu2 %v4654_v33  ;;  %v6526_v33 = vld [vmem:[#allocation5 + $0x894] sm:$0xf0]  ;;  %v4466_v34 = vor.u32 %v6313_v23, %v4463_v24 }
  0xfa   :  { %2250 = vmatpush.bf16.msra.mxu3 %v4846_v40  ;;  %v4535_v40 = vld [vmem:[#allocation5 + $0x298] sm:$0xf0]  ;;  %v5302_v42 = vor.u32 %v6526_v33, %v5301_v31  ;;  %v6454_v31 = vld [vmem:[#allocation5 + $0x654] sm:$0xf0] }
  0xfb   :  { %2212 = vmatpush.bf16.msra.mxu0 %v4246_v46  ;;  %v5277_v46 = vld [vmem:[#allocation5 + $0x850] sm:$0xf]  ;;  %v4538_v47 = vor.u32 %v6331_v37, %v4535_v40  ;;  %v6259_v37 = vld [vmem:[#allocation5 + $0x44] sm:$0xf]  ;;  %v4247_v40 = vld [vmem:[#allocation5 + $0x58] sm:$0xf0] }
  0xfc   :  { %2225 = vmatpush.bf16.msra.mxu1 %v4438_v49  ;;  %v6277_v49 = vld [vmem:[#allocation5 + $0xd4] sm:$0xf]  ;;  %v5278_v55 = vor.u32 %v6520_v48, %v5277_v46  ;;  %v5181_v48 = vld [vmem:[#allocation5 + $0x790] sm:$0xf] }
  0xfd   :  { %2238 = vmatpush.bf16.msra.mxu2 %v4630_v50  ;;  %v4319_v50 = vld [vmem:[#allocation5 + $0xe8] sm:$0xf0] }
  0xfe   :  { %2251 = vmatpush.bf16.msra.mxu3 %v4822_v54  ;;  %v4322_v56 = vor.u32 %v6277_v49, %v4319_v50  ;;  %v6496_v49 = vld [vmem:[#allocation5 + $0x7a4] sm:$0xf0]  ;;  %v6253_v50 = vld [vmem:[#allocation5 + $0x14] sm:$0xf] }
  0xff   :  { %2213 = vmatpush.bf16.msra.mxu0 %v4222_v63  ;;  %v2007_v54 = vpop.f32.mrf.mxu0  ;;  %v6514_v63 = vld [vmem:[#allocation5 + $0x834] sm:$0xf0] }
 0x100   :  { %2226 = vmatpush.bf16.msra.mxu1 %v4414_v4  ;;  %v2008_v60 = vadd.f32 %v2007_v54, %v7117_v39  ;;  %v2020_v61 = vpop.f32.mrf.mxu1  ;;  %v4487_v4 = vld [vmem:[#allocation5 + $0x238] sm:$0xf0]  ;;  %v5254_v9 = vor.u32 %v6514_v63, %v5253_v59  ;;  %v6301_v54 = vld [vmem:[#allocation5 + $0x194] sm:$0xf]  ;;  %v6439_v59 = vld [vmem:[#allocation5 + $0x5e4] sm:$0xf] }
 0x101   :  { %2239 = vmatpush.bf16.msra.mxu2 %v4606_v5  ;;  %v4490_v39 = vor.u32 %v6319_v2, %v4487_v4  ;;  %v5159_v63 = vld [vmem:[#allocation5 + $0x778] sm:$0xf0]  ;;  %v6535_v2 = vld [vmem:[#allocation5 + $0x8e4] sm:$0xf] }
 0x102   :  { %2252 = vmatpush.bf16.msra.mxu3 %v4798_v10  ;;  %2214 = vmatmul.bf16.vlgmr.msra.gmra.mxu0 %v7074_v19  ;;  %v2021_v5 = vadd.f32 %v2020_v61, %v2008_v60  ;;  %v4298_v10 = vor.u32 %v6271_v0, %v4295_v1  ;;  %v4990_v60 = vor.u32 %v6448_v45, %v4989_v44  ;;  %v4967_v61 = vld [vmem:[#allocation5 + $0x5f8] sm:$0xf0]  ;;  %v4895_v45 = vld [vmem:[#allocation5 + $0x568] sm:$0xf0] }
 0x103   :  { %2258 = vmatpush.bf16.msrb.mxu0 %v5158_v3  ;;  %2227 = vmatmul.bf16.vlgmr.msra.gmra.mxu1 %v7078_v22  ;;  %v5037_v3 = vld [vmem:[#allocation5 + $0x670] sm:$0xf]  ;;  %v5182_v0 = vor.u32 %v6496_v49, %v5181_v48  ;;  %v5351_v4 = vld [vmem:[#allocation5 + $0x8f8] sm:$0xf0]  ;;  %v6517_v48 = vld [vmem:[#allocation5 + $0x854] sm:$0xf] }
 0x104   :  { %2271 = vmatpush.bf16.msrb.mxu1 %v5350_v11  ;;  %2240 = vmatmul.bf16.vlgmr.msra.gmra.mxu2 %v7072_v18  ;;  %v6460_v11 = vld [vmem:[#allocation5 + $0x684] sm:$0xf0] }
 0x105   :  { %2284 = vmatpush.bf16.msrb.mxu2 %v4394_v12  ;;  %2253 = vmatmul.bf16.vlgmr.msra.gmra.mxu3 %v7076_v20  ;;  %v5229_v12 = vld [vmem:[#allocation5 + $0x7f0] sm:$0xf]  ;;  %v5038_v25 = vor.u32 %v6460_v11, %v5037_v3  ;;  %v6385_v3 = vld [vmem:[#allocation5 + $0x434] sm:$0xf]  ;;  %v4751_v11 = vld [vmem:[#allocation5 + $0x448] sm:$0xf0] }
 0x106   :  { %2297 = vmatpush.bf16.msrb.mxu3 %v4586_v16  ;;  %v4271_v16 = vld [vmem:[#allocation5 + $0x88] sm:$0xf0] }
 0x107   :  { %2259 = vmatpush.bf16.msrb.mxu0 %v5134_v26  ;;  %v2033_v13 = vpop.f32.mrf.mxu2  ;;  %v4274_v29 = vor.u32 %v6265_v15, %v4271_v16  ;;  %v5135_v15 = vld [vmem:[#allocation5 + $0x748] sm:$0xf0]  ;;  %v6529_v16 = vld [vmem:[#allocation5 + $0x8b4] sm:$0xf] }
 0x108   :  { %2272 = vmatpush.bf16.msrb.mxu1 %v5326_v27  ;;  %v2034_v17 = vadd.f32 %v2033_v13, %v2021_v5  ;;  %v2046_v21 = vpop.f32.mrf.mxu3  ;;  %v2009_v27 = vpop.f32.mrf.mxu0  ;;  %v5354_v13 = vor.u32 %v6535_v2, %v5351_v4  ;;  %v4655_v2 = vld [vmem:[#allocation5 + $0x388] sm:$0xf0]  ;;  %v6409_v4 = vld [vmem:[#allocation5 + $0x4f4] sm:$0xf] }
 0x109   :  { %2285 = vmatpush.bf16.msrb.mxu2 %v4370_v28  ;;  %v5230_v28 = vor.u32 %v6508_v14, %v5229_v12  ;;  %v2022_v33 = vpop.f32.mrf.mxu1  ;;  %v6433_v12 = vld [vmem:[#allocation5 + $0x5b4] sm:$0xf]  ;;  %v4727_v27 = vld [vmem:[#allocation5 + $0x418] sm:$0xf0] }
 0x10a   :  { %2298 = vmatpush.bf16.msrb.mxu3 %v4562_v32  ;;  %v7124_v26 = vadd.f32 %v2046_v21, %v2034_v17  ;;  %v5205_v32 = vld [vmem:[#allocation5 + $0x7c0] sm:$0xf]  ;;  %v6481_v14 = vld [vmem:[#allocation5 + $0x734] sm:$0xf]  ;;  %v5327_v17 = vld [vmem:[#allocation5 + $0x8c8] sm:$0xf0]  ;;  %v4754_v21 = vor.u32 %v6385_v3, %v4751_v11 }
 0x10b   :  { %2260 = vmatpush.bf16.msrb.mxu0 %v5110_v41  ;;  %v6307_v41 = vld [vmem:[#allocation5 + $0x1c4] sm:$0xf]  ;;  %v5206_v46 = vor.u32 %v6502_v36, %v5205_v32  ;;  %v5138_v24 = vor.u32 %v6481_v14, %v5135_v15  ;;  %v5111_v32 = vld [vmem:[#allocation5 + $0x718] sm:$0xf0]  ;;  %v6505_v11 = vld [vmem:[#allocation5 + $0x7f4] sm:$0xf] }
 0x10c   :  { %2273 = vmatpush.bf16.msrb.mxu1 %v5302_v42  ;;  %v4439_v42 = vld [vmem:[#allocation5 + $0x1d8] sm:$0xf0]  ;;  %v6523_v33 = vld [vmem:[#allocation5 + $0x884] sm:$0xf] }
 0x10d   :  { %2286 = vmatpush.bf16.msrb.mxu2 %v4346_v43  ;;  %v5014_v43 = vor.u32 %v6454_v31, %v5013_v30  ;;  %v4442_v52 = vor.u32 %v6307_v41, %v4439_v42  ;;  %v4919_v30 = vld [vmem:[#allocation5 + $0x598] sm:$0xf0]  ;;  %v6475_v31 = vld [vmem:[#allocation5 + $0x704] sm:$0xf]  ;;  %v6373_v41 = vld [vmem:[#allocation5 + $0x3d4] sm:$0xf] }
 0x10e   :  { %2299 = vmatpush.bf16.msrb.mxu3 %v4538_v47  ;;  %v4250_v47 = vor.u32 %v6259_v37, %v4247_v40  ;;  %v5114_v40 = vor.u32 %v6475_v31, %v5111_v32  ;;  %v4703_v42 = vld [vmem:[#allocation5 + $0x3e8] sm:$0xf0]  ;;  %v5207_v31 = vld [vmem:[#allocation5 + $0x7d8] sm:$0xf0] }
 0x10f   :  { %2261 = vmatpush.bf16.msrb.mxu0 %v5086_v53  ;;  %v2035_v51 = vpop.f32.mrf.mxu2  ;;  %v4223_v53 = vld [vmem:[#allocation5 + $0x28] sm:$0xf0] }
 0x110   :  { %2274 = vmatpush.bf16.msrb.mxu1 %v5278_v55  ;;  %v4415_v55 = vld [vmem:[#allocation5 + $0x1a8] sm:$0xf0]  ;;  %v4226_v1 = vor.u32 %v6253_v50, %v4223_v53  ;;  %v4706_v50 = vor.u32 %v6373_v41, %v4703_v42  ;;  %v6367_v53 = vld [vmem:[#allocation5 + $0x3a4] sm:$0xf]  ;;  %v6445_v42 = vld [vmem:[#allocation5 + $0x614] sm:$0xf] }
 0x111   :  { %2287 = vmatpush.bf16.msrb.mxu2 %v4322_v56  ;;  %v2048_v56 = vpop.f32.mrf.mxu3  ;;  %v4418_v5 = vor.u32 %v6301_v54, %v4415_v55  ;;  %v4679_v54 = vld [vmem:[#allocation5 + $0x3b8] sm:$0xf0]  ;;  %v6415_v55 = vld [vmem:[#allocation5 + $0x524] sm:$0xf]  ;;  %v4799_v41 = vld [vmem:[#allocation5 + $0x4a8] sm:$0xf0] }
 0x112   :  { %2300 = vmatpush.bf16.msrb.mxu3 %v4514_v62  ;;  %v6487_v62 = vld [vmem:[#allocation5 + $0x764] sm:$0xf] }
 0x113   :  { %2262 = vmatpush.bf16.msrb.mxu0 %v5062_v8  ;;  %v4778_v8 = vor.u32 %v6391_v57, %v4775_v58  ;;  %v4871_v57 = vld [vmem:[#allocation5 + $0x538] sm:$0xf0]  ;;  %v6463_v58 = vld [vmem:[#allocation5 + $0x6a4] sm:$0xf] }
 0x114   :  { %2275 = vmatpush.bf16.msrb.mxu1 %v5254_v9  ;;  %v4970_v9 = vor.u32 %v6439_v59, %v4967_v61  ;;  %v5063_v59 = vld [vmem:[#allocation5 + $0x6b8] sm:$0xf0] }
 0x115   :  { %2288 = vmatpush.bf16.msrb.mxu2 %v4298_v10  ;;  %v5162_v10 = vor.u32 %v6487_v62, %v5159_v63  ;;  %v5255_v61 = vld [vmem:[#allocation5 + $0x838] sm:$0xf0]  ;;  %v4682_v62 = vor.u32 %v6367_v53, %v4679_v54  ;;  %v4874_v63 = vor.u32 %v6415_v55, %v4871_v57  ;;  %v6601_v54 = vld [vmem:[#allocation8 + $0x1ec] sm:$0xf0]  ;;  %v5725_v55 = vld [vmem:[#allocation8 + $0x2e0] sm:$0xf] }
 0x116   :  { %2301 = vmatpush.bf16.msrb.mxu3 %v4490_v39  ;;  %v4943_v39 = vld [vmem:[#allocation5 + $0x5c8] sm:$0xf0] }
 0x117   :  { %2263 = vmatpush.bf16.msrb.mxu0 %v5038_v25  ;;  %v4946_v23 = vor.u32 %v6433_v12, %v4943_v39  ;;  %v6379_v25 = vld [vmem:[#allocation5 + $0x404] sm:$0xf]  ;;  %v5231_v12 = vld [vmem:[#allocation5 + $0x808] sm:$0xf0] }
 0x118   :  { %2276 = vmatpush.bf16.msrb.mxu1 %v5230_v28  ;;  %v6427_v28 = vld [vmem:[#allocation5 + $0x584] sm:$0xf]  ;;  %v4730_v36 = vor.u32 %v6379_v25, %v4727_v27  ;;  %v5234_v25 = vor.u32 %v6505_v11, %v5231_v12  ;;  %v4823_v27 = vld [vmem:[#allocation5 + $0x4d8] sm:$0xf0]  ;;  %v6561_v12 = vld [vmem:[#allocation8 + $0xac] sm:$0xf0] }
 0x119   :  { %2289 = vmatpush.bf16.msrb.mxu2 %v4274_v29  ;;  %v5330_v29 = vor.u32 %v6529_v16, %v5327_v17  ;;  %v4922_v37 = vor.u32 %v6427_v28, %v4919_v30  ;;  %v6451_v28 = vld [vmem:[#allocation5 + $0x644] sm:$0xf] }
 0x11a   :  { %2302 = vmatpush.bf16.msrb.mxu3 %v4466_v34  ;;  %v5303_v34 = vld [vmem:[#allocation5 + $0x898] sm:$0xf0]  ;;  %v6499_v30 = vld [vmem:[#allocation5 + $0x7c4] sm:$0xf] }
 0x11b   :  { %2264 = vmatpush.bf16.msrb.mxu0 %v5014_v43  ;;  %v6421_v43 = vld [vmem:[#allocation5 + $0x554] sm:$0xf]  ;;  %v5306_v44 = vor.u32 %v6523_v33, %v5303_v34  ;;  %v4607_v34 = vld [vmem:[#allocation5 + $0x328] sm:$0xf0]  ;;  %v5437_v11 = vld [vmem:[#allocation8 + $0xa0] sm:$0xf] }
 0x11c   :  { %2277 = vmatpush.bf16.msrb.mxu1 %v5206_v46  ;;  %v6469_v46 = vld [vmem:[#allocation5 + $0x6d4] sm:$0xf] }
 0x11d   :  { %2290 = vmatpush.bf16.msrb.mxu2 %v4250_v47  ;;  %v5087_v47 = vld [vmem:[#allocation5 + $0x6e8] sm:$0xf0]  ;;  %v6349_v33 = vld [vmem:[#allocation5 + $0x314] sm:$0xf] }
 0x11e   :  { %2303 = vmatpush.bf16.msrb.mxu3 %v4442_v52  ;;  %v5090_v52 = vor.u32 %v6469_v46, %v5087_v47  ;;  %v6493_v46 = vld [vmem:[#allocation5 + $0x794] sm:$0xf]  ;;  %v5183_v47 = vld [vmem:[#allocation5 + $0x7a8] sm:$0xf0]  ;;  %v4610_v53 = vor.u32 %v6349_v33, %v4607_v34 }
 0x11f   :  { %2265 = vmatpush.bf16.msrb.mxu0 %v4990_v60  ;;  %v7130_v49 = vpop.f32.mrf.mxu0  ;;  %v6511_v60 = vld [vmem:[#allocation5 + $0x824] sm:$0xf]  ;;  %v6657_v33 = vld [vmem:[#allocation8 + $0x3ac] sm:$0xf0] }
 0x120   :  { %2278 = vmatpush.bf16.msrb.mxu1 %v5182_v0  ;;  %v7132_v51 = vpop.f32.mrf.mxu1  ;;  %v5066_v0 = vor.u32 %v6463_v58, %v5063_v59  ;;  %v5186_v59 = vor.u32 %v6493_v46, %v5183_v47  ;;  %v6589_v34 = vld [vmem:[#allocation8 + $0x18c] sm:$0xf0]  ;;  %v5533_v46 = vld [vmem:[#allocation8 + $0x160] sm:$0xf] }
 0x121   :  { %2291 = vmatpush.bf16.msrb.mxu2 %v4226_v1  ;;  %v6361_v1 = vld [vmem:[#allocation5 + $0x374] sm:$0xf]  ;;  %v5805_v47 = vld [vmem:[#allocation8 + $0x380] sm:$0xf] }
 0x122   :  { %2304 = vmatpush.bf16.msrb.mxu3 %v4418_v5  ;;  %2266 = vmatmul.bf16.vlgmr.msrb.gmra.mxu0 %v7084_v35  ;;  %v5258_v5 = vor.u32 %v6511_v60, %v5255_v61  ;;  %v4658_v14 = vor.u32 %v6361_v1, %v4655_v2  ;;  %v5453_v61 = vld [vmem:[#allocation8 + $0xc0] sm:$0xf] }
 0x123   :  { %2310 = vmatpush.bf16.msra.mxu0 %v4778_v8  ;;  %2279 = vmatmul.bf16.vlgmr.msrb.gmra.mxu1 %v7086_v38  ;;  %v4847_v8 = vld [vmem:[#allocation5 + $0x508] sm:$0xf0]  ;;  %v5581_v1 = vld [vmem:[#allocation8 + $0x1c0] sm:$0xf] }
 0x124   :  { %2323 = vmatpush.bf16.msra.mxu1 %v4970_v9  ;;  %2292 = vmatmul.bf16.vlgmr.msrb.gmra.mxu2 %v7074_v19  ;;  %v5279_v19 = vld [vmem:[#allocation5 + $0x868] sm:$0xf0]  ;;  %v6457_v9 = vld [vmem:[#allocation5 + $0x674] sm:$0xf]  ;;  %v4850_v16 = vor.u32 %v6409_v4, %v4847_v8  ;;  %v5853_v2 = vld [vmem:[#allocation8 + $0x3e0] sm:$0xf] }
 0x125   :  { %2336 = vmatpush.bf16.msra.mxu2 %v5162_v10  ;;  %2305 = vmatmul.bf16.vlgmr.msrb.gmra.mxu3 %v7078_v22  ;;  %v4898_v22 = vor.u32 %v6421_v43, %v4895_v45  ;;  %v5282_v56 = vor.u32 %v6517_v48, %v5279_v19  ;;  %v5039_v10 = vld [vmem:[#allocation5 + $0x688] sm:$0xf0]  ;;  %v423_v43 = vperm.slane %v7104_v7, 2  ;;  %v5469_v19 = vld [vmem:[#allocation8 + $0xe0] sm:$0xf] }
 0x126   :  { %2349 = vmatpush.bf16.msra.mxu3 %v5354_v13  ;;  %v5042_v17 = vor.u32 %v6457_v9, %v5039_v10  ;;  %v4991_v45 = vld [vmem:[#allocation5 + $0x628] sm:$0xf0]  ;;  %v6665_v4 = vld [vmem:[#allocation8 + $0x3ec] sm:$0xf0]  ;;  %v5709_v8 = vld [vmem:[#allocation8 + $0x2c0] sm:$0xf] }
 0x127   :  { %2311 = vmatpush.bf16.msra.mxu0 %v4754_v21  ;;  %v7134_v3 = vpop.f32.mrf.mxu2  ;;  %v2061_v13 = vpop.f32.mrf.mxu0  ;;  %v6355_v21 = vld [vmem:[#allocation5 + $0x344] sm:$0xf]  ;;  %v4994_v58 = vor.u32 %v6445_v42, %v4991_v45  ;;  %v2060_v7 = vadd.f32 %v7130_v49, %v423_v43  ;;  %v6629_v9 = vld [vmem:[#allocation8 + $0x2cc] sm:$0xf0] }
 0x128   :  { %2324 = vmatpush.bf16.msra.mxu1 %v4946_v23  ;;  %v7136_v39 = vpop.f32.mrf.mxu3  ;;  %v2074_v15 = vpop.f32.mrf.mxu1  ;;  %v4631_v23 = vld [vmem:[#allocation5 + $0x358] sm:$0xf0]  ;;  %v5854_v13 = vor.u32 %v6665_v4, %v5853_v2 }
 0x129   :  { %2337 = vmatpush.bf16.msra.mxu2 %v5138_v24  ;;  %v6403_v24 = vld [vmem:[#allocation5 + $0x4c4] sm:$0xf]  ;;  %v4634_v32 = vor.u32 %v6355_v21, %v4631_v23  ;;  %v2073_v10 = vadd.f32 %v7132_v51, %v2060_v7  ;;  %v5710_v15 = vor.u32 %v6629_v9, %v5709_v8  ;;  %v6661_v21 = vld [vmem:[#allocation8 + $0x3cc] sm:$0xf0] }
 0x12a   :  { %2350 = vmatpush.bf16.msra.mxu3 %v5330_v29  ;;  %v5015_v29 = vld [vmem:[#allocation5 + $0x658] sm:$0xf0]  ;;  %v6593_v23 = vld [vmem:[#allocation8 + $0x1ac] sm:$0xf0]  ;;  %v5789_v7 = vld [vmem:[#allocation8 + $0x360] sm:$0xf] }
 0x12b   :  { %2312 = vmatpush.bf16.msra.mxu0 %v4730_v36  ;;  %v6397_v36 = vld [vmem:[#allocation5 + $0x494] sm:$0xf] }
 0x12c   :  { %2325 = vmatpush.bf16.msra.mxu1 %v4922_v37  ;;  %v4826_v37 = vor.u32 %v6403_v24, %v4823_v27  ;;  %v4802_v57 = vor.u32 %v6397_v36, %v4799_v41  ;;  %v5693_v24 = vld [vmem:[#allocation8 + $0x2a0] sm:$0xf]  ;;  %v6625_v51 = vld [vmem:[#allocation8 + $0x2ac] sm:$0xf0]  ;;  %v5438_v27 = vor.u32 %v6561_v12, %v5437_v11 }
 0x12d   :  { %2338 = vmatpush.bf16.msra.mxu2 %v5114_v40  ;;  %v5018_v40 = vor.u32 %v6451_v28, %v5015_v29  ;;  %v5421_v28 = vld [vmem:[#allocation8 + $0x80] sm:$0xf]  ;;  %v6557_v29 = vld [vmem:[#allocation8 + $0x8c] sm:$0xf0] }
 0x12e   :  { %2351 = vmatpush.bf16.msra.mxu3 %v5306_v44  ;;  %v5210_v44 = vor.u32 %v6499_v30, %v5207_v31  ;;  %v5694_v31 = vor.u32 %v6625_v51, %v5693_v24  ;;  %v5677_v36 = vld [vmem:[#allocation8 + $0x280] sm:$0xf]  ;;  %v6553_v41 = vld [vmem:[#allocation8 + $0x6c] sm:$0xf0] }
 0x12f   :  { %2313 = vmatpush.bf16.msra.mxu0 %v4706_v50  ;;  %v2087_v48 = vpop.f32.mrf.mxu2  ;;  %v6569_v50 = vld [vmem:[#allocation8 + $0xec] sm:$0xf0]  ;;  %v5501_v12 = vld [vmem:[#allocation8 + $0x120] sm:$0xf] }
 0x130   :  { %2326 = vmatpush.bf16.msra.mxu1 %v4898_v22  ;;  %v5597_v22 = vld [vmem:[#allocation8 + $0x1e0] sm:$0xf]  ;;  %v5470_v60 = vor.u32 %v6569_v50, %v5469_v19  ;;  %v6653_v48 = vld [vmem:[#allocation8 + $0x38c] sm:$0xf0] }
 0x131   :  { %2339 = vmatpush.bf16.msra.mxu2 %v5090_v52  ;;  %v2100_v52 = vpop.f32.mrf.mxu3  ;;  %v6585_v19 = vld [vmem:[#allocation8 + $0x16c] sm:$0xf0]  ;;  %v5661_v50 = vld [vmem:[#allocation8 + $0x260] sm:$0xf] }
 0x132   :  { %2352 = vmatpush.bf16.msra.mxu3 %v5282_v56  ;;  %v6633_v56 = vld [vmem:[#allocation8 + $0x2ec] sm:$0xf0]  ;;  %v5485_v51 = vld [vmem:[#allocation8 + $0x100] sm:$0xf] }
 0x133   :  { %2314 = vmatpush.bf16.msra.mxu0 %v4682_v62  ;;  %v6565_v62 = vld [vmem:[#allocation8 + $0xcc] sm:$0xf0] }
 0x134   :  { %2327 = vmatpush.bf16.msra.mxu1 %v4874_v63  ;;  %v5598_v63 = vor.u32 %v6601_v54, %v5597_v22  ;;  %v5454_v49 = vor.u32 %v6565_v62, %v5453_v61  ;;  %v6617_v22 = vld [vmem:[#allocation8 + $0x26c] sm:$0xf0]  ;;  %v5645_v61 = vld [vmem:[#allocation8 + $0x240] sm:$0xf] }
 0x135   :  { %2340 = vmatpush.bf16.msra.mxu2 %v5066_v0  ;;  %v5726_v0 = vor.u32 %v6633_v56, %v5725_v55  ;;  %v6549_v54 = vld [vmem:[#allocation8 + $0x4c] sm:$0xf0]  ;;  %v5806_v55 = vor.u32 %v6653_v48, %v5805_v47  ;;  %v5534_v56 = vor.u32 %v6585_v19, %v5533_v46  ;;  %v5741_v46 = vld [vmem:[#allocation8 + $0x300] sm:$0xf] }
 0x136   :  { %2353 = vmatpush.bf16.msra.mxu3 %v5258_v5  ;;  %v6597_v5 = vld [vmem:[#allocation8 + $0x1cc] sm:$0xf0] }
 0x137   :  { %2315 = vmatpush.bf16.msra.mxu0 %v4658_v14  ;;  %v5582_v14 = vor.u32 %v6597_v5, %v5581_v1  ;;  %v6613_v62 = vld [vmem:[#allocation8 + $0x24c] sm:$0xf0]  ;;  %v5373_v5 = vld [vmem:[#allocation8 + $0x20] sm:$0xf] }
 0x138   :  { %2328 = vmatpush.bf16.msra.mxu1 %v4850_v16  ;;  %v5565_v16 = vld [vmem:[#allocation8 + $0x1a0] sm:$0xf]  ;;  %v6545_v8 = vld [vmem:[#allocation8 + $0x2c] sm:$0xf0]  ;;  %v5646_v11 = vor.u32 %v6613_v62, %v5645_v61  ;;  %v5439_v61 = vld [vmem:[#allocation8 + $0xb0] sm:$0xf0] }
 0x139   :  { %2341 = vmatpush.bf16.msra.mxu2 %v5042_v17  ;;  %v5837_v17 = vld [vmem:[#allocation8 + $0x3c0] sm:$0xf]  ;;  %v6541_v24 = vld [vmem:[#allocation8 + $0xc] sm:$0xf0]  ;;  %v6595_v62 = vld [vmem:[#allocation8 + $0x1c4] sm:$0xf] }
 0x13a   :  { %2354 = vmatpush.bf16.msra.mxu3 %v5234_v25  ;;  %v2086_v25 = vadd.f32 %v7134_v3, %v2073_v10  ;;  %v5838_v30 = vor.u32 %v6661_v21, %v5837_v17  ;;  %v5422_v3 = vor.u32 %v6557_v29, %v5421_v28  ;;  %v6609_v17 = vld [vmem:[#allocation8 + $0x22c] sm:$0xf0]  ;;  %v5374_v21 = vor.u32 %v6545_v8, %v5373_v5 }
 0x13b   :  { %2316 = vmatpush.bf16.msra.mxu0 %v4634_v32  ;;  %v5821_v32 = vld [vmem:[#allocation8 + $0x3a0] sm:$0xf]  ;;  %v6573_v29 = vld [vmem:[#allocation8 + $0x10c] sm:$0xf0] }
 0x13c   :  { %2329 = vmatpush.bf16.msra.mxu1 %v4826_v37  ;;  %v5822_v43 = vor.u32 %v6657_v33, %v5821_v32  ;;  %v6567_v32 = vld [vmem:[#allocation8 + $0xe4] sm:$0xf]  ;;  %v5471_v33 = vld [vmem:[#allocation8 + $0xf0] sm:$0xf0]  ;;  %v6637_v47 = vld [vmem:[#allocation8 + $0x30c] sm:$0xf0] }
 0x13d   :  { %2342 = vmatpush.bf16.msra.mxu2 %v5018_v40  ;;  %v5405_v40 = vld [vmem:[#allocation8 + $0x60] sm:$0xf]  ;;  %v6689_v5 = vld [vmem:[#allocation8 + $0x4ac] sm:$0xf0] }
 0x13e   :  { %2355 = vmatpush.bf16.msra.mxu3 %v5210_v44 }
 0x13f   :  { %2317 = vmatpush.bf16.msra.mxu0 %v4610_v53  ;;  %v2111_v37 = vpop.f32.mrf.mxu0  ;;  %v5389_v53 = vld [vmem:[#allocation8 + $0x40] sm:$0xf] }
 0x140   :  { %2330 = vmatpush.bf16.msra.mxu1 %v4802_v57  ;;  %v2124_v42 = vpop.f32.mrf.mxu1  ;;  %v5662_v57 = vor.u32 %v6617_v22, %v5661_v50  ;;  %v5390_v4 = vor.u32 %v6549_v54, %v5389_v53  ;;  %v5455_v50 = vld [vmem:[#allocation8 + $0xd0] sm:$0xf0]  ;;  %v6599_v22 = vld [vmem:[#allocation8 + $0x1e4] sm:$0xf]  ;;  %v5965_v53 = vld [vmem:[#allocation8 + $0x4c0] sm:$0xf] }
 0x141   :  { %2343 = vmatpush.bf16.msra.mxu2 %v4994_v58  ;;  %v5517_v58 = vld [vmem:[#allocation8 + $0x140] sm:$0xf]  ;;  %v6693_v54 = vld [vmem:[#allocation8 + $0x4cc] sm:$0xf0] }
 0x142   :  { %2356 = vmatpush.bf16.msra.mxu3 %v5186_v59  ;;  %2318 = vmatmul.bf16.vlgmr.msra.gmra.mxu0 %v7072_v18  ;;  %v5566_v18 = vor.u32 %v6593_v23, %v5565_v16  ;;  %v6649_v59 = vld [vmem:[#allocation8 + $0x36c] sm:$0xf0]  ;;  %v5629_v16 = vld [vmem:[#allocation8 + $0x220] sm:$0xf] }
 0x143   :  { %3536 = vmatpush.bf16.msrb.mxu0 %v5470_v60  ;;  %2331 = vmatmul.bf16.vlgmr.msra.gmra.mxu1 %v7076_v20  ;;  %v5549_v20 = vld [vmem:[#allocation8 + $0x180] sm:$0xf]  ;;  %v6581_v60 = vld [vmem:[#allocation8 + $0x14c] sm:$0xf0]  ;;  %v5790_v9 = vor.u32 %v6649_v59, %v5789_v7  ;;  %v5630_v28 = vor.u32 %v6609_v17, %v5629_v16  ;;  %v6559_v7 = vld [vmem:[#allocation8 + $0xa4] sm:$0xf] }
 0x144   :  { %3549 = vmatpush.bf16.msrb.mxu1 %v5598_v63  ;;  %2344 = vmatmul.bf16.vlgmr.msra.gmra.mxu2 %v7084_v35  ;;  %v6621_v35 = vld [vmem:[#allocation8 + $0x28c] sm:$0xf0]  ;;  %v5550_v44 = vor.u32 %v6589_v34, %v5549_v20  ;;  %v5357_v23 = vld [vmem:[#allocation8] sm:$0xf]  ;;  %v5442_v8 = vor.u32 %v6559_v7, %v5439_v61  ;;  %v6695_v7 = vld [vmem:[#allocation8 + $0x4e4] sm:$0xf] }
 0x145   :  { %3562 = vmatpush.bf16.msrb.mxu2 %v5726_v0  ;;  %2357 = vmatmul.bf16.vlgmr.msra.gmra.mxu3 %v7086_v38  ;;  %v2099_v38 = vadd.f32 %v7136_v39, %v2086_v25  ;;  %v5678_v45 = vor.u32 %v6621_v35, %v5677_v36  ;;  %v5406_v39 = vor.u32 %v6553_v41, %v5405_v40  ;;  %v6605_v20 = vld [vmem:[#allocation8 + $0x20c] sm:$0xf0]  ;;  %v5981_v36 = vld [vmem:[#allocation8 + $0x4e0] sm:$0xf]  ;;  %v7153_v41 = vld [vmem:[#allocation7] sm:$0x3f] }
 0x146   :  { %3575 = vmatpush.bf16.msrb.mxu3 %v5854_v13  ;;  %v5773_v13 = vld [vmem:[#allocation8 + $0x340] sm:$0xf]  ;;  %v6697_v35 = vld [vmem:[#allocation8 + $0x4ec] sm:$0xf0] }
 0x147   :  { %3537 = vmatpush.bf16.msrb.mxu0 %v5454_v49  ;;  %v2112_v52 = vadd.f32 %v2111_v37, %v2099_v38  ;;  %v7147_v63 = vpop.f32.mrf.mxu2  ;;  %v2113_v2 = vpop.f32.mrf.mxu0  ;;  %v5518_v49 = vor.u32 %v6581_v60, %v5517_v58  ;;  %v5358_v38 = vor.u32 %v6541_v24, %v5357_v23  ;;  %v5982_v48 = vor.u32 %v6697_v35, %v5981_v36  ;;  %v5535_v36 = vld [vmem:[#allocation8 + $0x170] sm:$0xf0] }
 0x148   :  { %3550 = vmatpush.bf16.msrb.mxu1 %v5582_v14  ;;  %v7149_v1 = vpop.f32.mrf.mxu3  ;;  %v2126_v10 = vpop.f32.mrf.mxu1  ;;  %v6645_v14 = vld [vmem:[#allocation8 + $0x34c] sm:$0xf0]  ;;  %v5966_v2 = vor.u32 %v6693_v54, %v5965_v53  ;;  %v6539_v54 = vld [vmem:[#allocation8 + $0x4] sm:$0xf] }
 0x149   :  { %3563 = vmatpush.bf16.msrb.mxu2 %v5710_v15  ;;  %v2125_v0 = vadd.f32 %v2124_v42, %v2112_v52  ;;  %v6577_v15 = vld [vmem:[#allocation8 + $0x12c] sm:$0xf0]  ;;  %v5774_v25 = vor.u32 %v6645_v14, %v5773_v13  ;;  %v424_v42 = vperm.slane %v7153_v41, 3  ;;  %v5599_v52 = vld [vmem:[#allocation8 + $0x1f0] sm:$0xf0] }
 0x14a   :  { %3576 = vmatpush.bf16.msrb.mxu3 %v5838_v30  ;;  %v5757_v30 = vld [vmem:[#allocation8 + $0x320] sm:$0xf]  ;;  %v5602_v59 = vor.u32 %v6599_v22, %v5599_v52  ;;  %v6673_v52 = vld [vmem:[#allocation8 + $0x42c] sm:$0xf0] }
 0x14b   :  { %3538 = vmatpush.bf16.msrb.mxu0 %v5438_v27  ;;  %6778 = vtanh.f32 %v2125_v0  ;;  %v5502_v27 = vor.u32 %v6577_v15, %v5501_v12  ;;  %v2138_v60 = vadd.f32 %v7147_v63, %v424_v42  ;;  %v5583_v0 = vld [vmem:[#allocation8 + $0x1d0] sm:$0xf0]  ;;  %v5933_v14 = vld [vmem:[#allocation8 + $0x480] sm:$0xf]  ;;  %v6685_v15 = vld [vmem:[#allocation8 + $0x48c] sm:$0xf0] }
 0x14c   :  { %3551 = vmatpush.bf16.msrb.mxu1 %v5566_v18  ;;  %6780 = vtanh.f32 %v7114_v6  ;;  %v6641_v18 = vld [vmem:[#allocation8 + $0x32c] sm:$0xf0]  ;;  %v5586_v10 = vor.u32 %v6595_v62, %v5583_v0  ;;  %v5567_v12 = vld [vmem:[#allocation8 + $0x1b0] sm:$0xf0]  ;;  %v5885_v22 = vld [vmem:[#allocation8 + $0x420] sm:$0xf] }
 0x14d   :  { %3564 = vmatpush.bf16.msrb.mxu2 %v5694_v31  ;;  %6782 = vtanh.f32 %v7124_v26  ;;  %v5613_v31 = vld [vmem:[#allocation8 + $0x200] sm:$0xf]  ;;  %v5758_v37 = vor.u32 %v6641_v18, %v5757_v30  ;;  %v2151_v63 = vadd.f32 %v7149_v1, %v2138_v60  ;;  %v5934_v1 = vor.u32 %v6685_v15, %v5933_v14  ;;  %v6681_v30 = vld [vmem:[#allocation8 + $0x46c] sm:$0xf0]  ;;  %v5503_v60 = vld [vmem:[#allocation8 + $0x130] sm:$0xf0] }
 0x14e   :  { %3577 = vmatpush.bf16.msrb.mxu3 %v5822_v43  ;;  %v5614_v40 = vor.u32 %v6605_v20, %v5613_v31  ;;  %v6547_v20 = vld [vmem:[#allocation8 + $0x44] sm:$0xf]  ;;  %v5886_v62 = vor.u32 %v6673_v52, %v5885_v22  ;;  %v5983_v0 = vld [vmem:[#allocation8 + $0x4f0] sm:$0xf0] }
 0x14f   :  { %3539 = vmatpush.bf16.msrb.mxu0 %v5422_v3  ;;  %v2139_v6 = vpop.f32.mrf.mxu2  ;;  %v5486_v3 = vor.u32 %v6573_v29, %v5485_v51  ;;  %v5917_v29 = vld [vmem:[#allocation8 + $0x460] sm:$0xf]  ;;  %v5986_v14 = vor.u32 %v6695_v7, %v5983_v0  ;;  %v5487_v15 = vld [vmem:[#allocation8 + $0x110] sm:$0xf0]  ;;  %v6679_v52 = vld [vmem:[#allocation8 + $0x464] sm:$0xf] }
 0x150   :  { %3552 = vmatpush.bf16.msrb.mxu1 %v5550_v44  ;;  %v2152_v34 = vpop.f32.mrf.mxu3  ;;  %v5474_v44 = vor.u32 %v6567_v32, %v5471_v33  ;;  %v5391_v33 = vld [vmem:[#allocation8 + $0x50] sm:$0xf0]  ;;  %v5918_v35 = vor.u32 %v6681_v30, %v5917_v29 }
 0x151   :  { %3565 = vmatpush.bf16.msrb.mxu2 %v5678_v45  ;;  %v6779_v26 = vpop.eup %6778  ;;  %v6563_v45 = vld [vmem:[#allocation8 + $0xc4] sm:$0xf]  ;;  %v5394_v42 = vor.u32 %v6547_v20, %v5391_v33  ;;  %v6093_v20 = vld [vmem:[#allocation8 + $0x5c0] sm:$0xf]  ;;  %v5919_v7 = vld [vmem:[#allocation8 + $0x470] sm:$0xf0] }
 0x152   :  { %3578 = vmatpush.bf16.msrb.mxu3 %v5806_v55  ;;  %v6781_v43 = vpop.eup %6780  ;;  %v5458_v58 = vor.u32 %v6563_v45, %v5455_v50  ;;  %v6583_v34 = vld [vmem:[#allocation8 + $0x164] sm:$0xf]  ;;  %v6063_v0 = vld [vmem:[#allocation8 + $0x590] sm:$0xf0] }
 0x153   :  { %3540 = vmatpush.bf16.msrb.mxu0 %v5406_v39  ;;  %v6783_v19 = vpop.eup %6782  ;;  %v7156_v39 = vpack.c.bf16 %v6779_v26, %v6779_v26  ;;  %v7158_v55 = vpack.c.bf16 %v6781_v43, %v6781_v43  ;;  %v5901_v26 = vld [vmem:[#allocation8 + $0x440] sm:$0xf]  ;;  %v6543_v43 = vld [vmem:[#allocation8 + $0x24] sm:$0xf] }
 0x154   :  { %3553 = vmatpush.bf16.msrb.mxu1 %v5534_v56  ;;  %v5742_v56 = vor.u32 %v6637_v47, %v5741_v46  ;;  %v5375_v46 = vld [vmem:[#allocation8 + $0x30] sm:$0xf0]  ;;  %v6579_v47 = vld [vmem:[#allocation8 + $0x144] sm:$0xf] }
 0x155   :  { %3566 = vmatpush.bf16.msrb.mxu2 %v5662_v57  ;;  %v7160_v57 = vpack.c.bf16 %v6783_v19, %v6783_v19  ;;  %v5378_v53 = vor.u32 %v6543_v43, %v5375_v46  ;;  %v6721_v43 = vld [vmem:[#allocation8 + $0x5ac] sm:$0xf0] }
 0x156   :  { %3579 = vmatpush.bf16.msrb.mxu3 %v5790_v9  ;;  %v6555_v9 = vld [vmem:[#allocation8 + $0x84] sm:$0xf] }
 0x157   :  { %3541 = vmatpush.bf16.msrb.mxu0 %v5390_v4  ;;  %v5949_v4 = vld [vmem:[#allocation8 + $0x4a0] sm:$0xf] }
 0x158   :  { %3554 = vmatpush.bf16.msrb.mxu1 %v5518_v49  ;;  %v5423_v49 = vld [vmem:[#allocation8 + $0x90] sm:$0xf0]  ;;  %v5950_v13 = vor.u32 %v6689_v5, %v5949_v4  ;;  %v5869_v4 = vld [vmem:[#allocation8 + $0x400] sm:$0xf]  ;;  %v6669_v5 = vld [vmem:[#allocation8 + $0x40c] sm:$0xf0] }
 0x159   :  { %3567 = vmatpush.bf16.msrb.mxu2 %v5646_v11  ;;  %v6591_v11 = vld [vmem:[#allocation8 + $0x1a4] sm:$0xf]  ;;  %v5426_v16 = vor.u32 %v6555_v9, %v5423_v49  ;;  %v5727_v9 = vld [vmem:[#allocation8 + $0x2f0] sm:$0xf0] }
 0x15a   :  { %3580 = vmatpush.bf16.msrb.mxu3 %v5774_v25  ;;  %v5570_v23 = vor.u32 %v6591_v11, %v5567_v12  ;;  %v5407_v25 = vld [vmem:[#allocation8 + $0x70] sm:$0xf0]  ;;  %v6691_v49 = vld [vmem:[#allocation8 + $0x4c4] sm:$0xf] }
 0x15b   :  { %3542 = vmatpush.bf16.msrb.mxu0 %v5374_v21  ;;  %v6551_v21 = vld [vmem:[#allocation8 + $0x64] sm:$0xf] }
 0x15c   :  { %3555 = vmatpush.bf16.msrb.mxu1 %v5502_v27  ;;  %v6587_v27 = vld [vmem:[#allocation8 + $0x184] sm:$0xf]  ;;  %v5410_v31 = vor.u32 %v6551_v21, %v5407_v25  ;;  %v6729_v21 = vld [vmem:[#allocation8 + $0x5ec] sm:$0xf0] }
 0x15d   :  { %3568 = vmatpush.bf16.msrb.mxu2 %v5630_v28  ;;  %v5551_v28 = vld [vmem:[#allocation8 + $0x190] sm:$0xf0]  ;;  %v6571_v12 = vld [vmem:[#allocation8 + $0x104] sm:$0xf] }
 0x15e   :  { %3581 = vmatpush.bf16.msrb.mxu3 %v5758_v37  ;;  %v5554_v32 = vor.u32 %v6587_v27, %v5551_v28  ;;  %v6727_v25 = vld [vmem:[#allocation8 + $0x5e4] sm:$0xf]  ;;  %v6111_v27 = vld [vmem:[#allocation8 + $0x5f0] sm:$0xf0]  ;;  %v5490_v29 = vor.u32 %v6571_v12, %v5487_v15 }
 0x15f   :  { %3543 = vmatpush.bf16.msrb.mxu0 %v5358_v38  ;;  %v2163_v17 = vpop.f32.mrf.mxu0  ;;  %v6627_v28 = vld [vmem:[#allocation8 + $0x2c4] sm:$0xf]  ;;  %v6047_v15 = vld [vmem:[#allocation8 + $0x570] sm:$0xf0] }
 0x160   :  { %3556 = vmatpush.bf16.msrb.mxu1 %v5486_v3  ;;  %v2164_v24 = vadd.f32 %v2163_v17, %v2151_v63  ;;  %v2176_v51 = vpop.f32.mrf.mxu1  ;;  %v6677_v3 = vld [vmem:[#allocation8 + $0x44c] sm:$0xf0]  ;;  %v6109_v17 = vld [vmem:[#allocation8 + $0x5e0] sm:$0xf] }
 0x161   :  { %3569 = vmatpush.bf16.msrb.mxu2 %v5614_v40  ;;  %v5902_v50 = vor.u32 %v6677_v3, %v5901_v26  ;;  %v6683_v3 = vld [vmem:[#allocation8 + $0x484] sm:$0xf] }
 0x162   :  { %3544 = vmatmul.bf16.vlgmr.msrb.gmra.mxu0 %v7158_v55  ;;  %3582 = vmatpush.bf16.msrb.mxu3 %v5742_v56  ;;  %v2177_v18 = vadd.f32 %v2176_v51, %v2164_v24  ;;  %v5359_v56 = vld [vmem:[#allocation8 + $0x10] sm:$0xf0]  ;;  %v6110_v51 = vor.u32 %v6729_v21, %v6109_v17 }
 0x163   :  { %3588 = vmatpush.bf16.msra.mxu0 %v5982_v48  ;;  %3557 = vmatmul.bf16.vlgmr.msrb.gmra.mxu1 %v7160_v57  ;;  %v5519_v48 = vld [vmem:[#allocation8 + $0x150] sm:$0xf0]  ;;  %v5362_v63 = vor.u32 %v6539_v54, %v5359_v56  ;;  %v6061_v56 = vld [vmem:[#allocation8 + $0x580] sm:$0xf] }
 0x164   :  { %3570 = vmatmul.bf16.vlgmr.msrb.gmra.mxu2 %v7156_v39  ;;  %3601 = vmatpush.bf16.msra.mxu1 %v6110_v51  ;;  %v5647_v17 = vld [vmem:[#allocation8 + $0x250] sm:$0xf0] }
 0x165   :  { %3614 = vmatpush.bf16.msra.mxu2 %v5474_v44  ;;  %v5538_v44 = vor.u32 %v6583_v34, %v5535_v36  ;;  %v6723_v36 = vld [vmem:[#allocation8 + $0x5c4] sm:$0xf] }
 0x166   :  { %3627 = vmatpush.bf16.msra.mxu3 %v5602_v59  ;;  %v6575_v59 = vld [vmem:[#allocation8 + $0x124] sm:$0xf] }
 0x167   :  { %3589 = vmatpush.bf16.msra.mxu0 %v5966_v2  ;;  %v2189_v6 = vpop.f32.mrf.mxu2  ;;  %v2165_v45 = vpop.f32.mrf.mxu0  ;;  %v5506_v11 = vor.u32 %v6575_v59, %v5503_v60 }
 0x168   :  { %v2190_v38 = vadd.f32 %v2189_v6, %v2177_v18  ;;  %v2202_v37 = vpop.f32.mrf.mxu3  ;;  %v2178_v19 = vpop.f32.mrf.mxu1  ;;  %v6687_v18 = vld [vmem:[#allocation8 + $0x4a4] sm:$0xf]  ;;  %v5951_v6 = vld [vmem:[#allocation8 + $0x4b0] sm:$0xf0] }
 0x169   :  { %3615 = vmatpush.bf16.msra.mxu2 %v5458_v58  ;;  %v5522_v58 = vor.u32 %v6579_v47, %v5519_v48  ;;  %v5954_v26 = vor.u32 %v6687_v18, %v5951_v6  ;;  %v6719_v47 = vld [vmem:[#allocation8 + $0x5a4] sm:$0xf]  ;;  %v6079_v48 = vld [vmem:[#allocation8 + $0x5b0] sm:$0xf0] }
 0x16a   :  { %3628 = vmatpush.bf16.msra.mxu3 %v5586_v10  ;;  %v2203_v40 = vadd.f32 %v2202_v37, %v2190_v38  ;;  %v6623_v38 = vld [vmem:[#allocation8 + $0x2a4] sm:$0xf]  ;;  %v5695_v37 = vld [vmem:[#allocation8 + $0x2b0] sm:$0xf0]  ;;  %v6082_v54 = vor.u32 %v6719_v47, %v6079_v48 }
 0x16b   :  { %3590 = vmatpush.bf16.msra.mxu0 %v5950_v13  ;;  %v5698_v45 = vor.u32 %v6623_v38, %v5695_v37  ;;  %v6619_v19 = vld [vmem:[#allocation8 + $0x284] sm:$0xf]  ;;  %v5871_v38 = vld [vmem:[#allocation8 + $0x410] sm:$0xf0] }
 0x16c   :  { %6784 = vtanh.f32 %v2203_v40  ;;  %v6607_v6 = vld [vmem:[#allocation8 + $0x224] sm:$0xf]  ;;  %v5615_v48 = vld [vmem:[#allocation8 + $0x210] sm:$0xf0] }
 0x16d   :  { %3616 = vmatpush.bf16.msra.mxu2 %v5442_v8  ;;  %v6631_v8 = vld [vmem:[#allocation8 + $0x2e4] sm:$0xf] }
 0x16e   :  { %3629 = vmatpush.bf16.msra.mxu3 %v5570_v23  ;;  %v5967_v23 = vld [vmem:[#allocation8 + $0x4d0] sm:$0xf0]  ;;  %v5730_v24 = vor.u32 %v6631_v8, %v5727_v9  ;;  %v6675_v8 = vld [vmem:[#allocation8 + $0x444] sm:$0xf] }
 0x16f   :  { %3591 = vmatpush.bf16.msra.mxu0 %v5934_v1  ;;  %v2191_v61 = vpop.f32.mrf.mxu2  ;;  %v5711_v1 = vld [vmem:[#allocation8 + $0x2d0] sm:$0xf0]  ;;  %v5970_v30 = vor.u32 %v6691_v49, %v5967_v23  ;;  %v6603_v47 = vld [vmem:[#allocation8 + $0x204] sm:$0xf] }
 0x170   :  { %v2204_v2 = vpop.f32.mrf.mxu3  ;;  %v5714_v33 = vor.u32 %v6627_v28, %v5711_v1  ;;  %v5903_v49 = vld [vmem:[#allocation8 + $0x450] sm:$0xf0]  ;;  %v6029_v28 = vld [vmem:[#allocation8 + $0x540] sm:$0xf]  ;;  %v6709_v1 = vld [vmem:[#allocation8 + $0x54c] sm:$0xf0] }
 0x171   :  { %3617 = vmatpush.bf16.msra.mxu2 %v5426_v16  ;;  %v5870_v16 = vor.u32 %v6669_v5, %v5869_v4  ;;  %v6615_v2 = vld [vmem:[#allocation8 + $0x264] sm:$0xf]  ;;  %v5663_v4 = vld [vmem:[#allocation8 + $0x270] sm:$0xf0]  ;;  %v5922_v5 = vor.u32 %v6679_v52, %v5919_v7  ;;  %v5906_v23 = vor.u32 %v6675_v8, %v5903_v49  ;;  %v5717_v52 = vld [vmem:[#allocation8 + $0x2c8] sm:$0xf] }
 0x172   :  { %3630 = vmatpush.bf16.msra.mxu3 %v5554_v32  ;;  %v6785_v10 = vpop.eup %6784  ;;  %v6725_v32 = vld [vmem:[#allocation8 + $0x5cc] sm:$0xf0]  ;;  %v5997_v7 = vld [vmem:[#allocation8 + $0x500] sm:$0xf]  ;;  %v5855_v8 = vld [vmem:[#allocation8 + $0x3f0] sm:$0xf0] }
 0x173   :  { %3592 = vmatpush.bf16.msra.mxu0 %v5918_v35  ;;  %v7167_v13 = vpack.c.bf16 %v6785_v10, %v6785_v10  ;;  %v6094_v34 = vor.u32 %v6725_v32, %v6093_v20  ;;  %v6095_v35 = vld [vmem:[#allocation8 + $0x5d0] sm:$0xf0]  ;;  %v6045_v10 = vld [vmem:[#allocation8 + $0x560] sm:$0xf]  ;;  %v6707_v20 = vld [vmem:[#allocation8 + $0x544] sm:$0xf] }
 0x174   :  { %v6098_v40 = vor.u32 %v6723_v36, %v6095_v35  ;;  %v6031_v32 = vld [vmem:[#allocation8 + $0x550] sm:$0xf0]  ;;  %v6667_v36 = vld [vmem:[#allocation8 + $0x404] sm:$0xf] }
 0x175   :  { %3618 = vmatpush.bf16.msra.mxu2 %v5410_v31  ;;  %3583 = vmatmul.bf16.vlgmr.msrb.gmra.mxu3 %v7167_v13  ;;  %v6114_v31 = vor.u32 %v6727_v25, %v6111_v27  ;;  %v6034_v37 = vor.u32 %v6707_v20, %v6031_v32  ;;  %v6658_v20 = vld [vmem:[#allocation8 + $0x3b4] sm:$0xf0] }
 0x176   :  { %3631 = vmatpush.bf16.msra.mxu3 %v5538_v44  ;;  %v5935_v44 = vld [vmem:[#allocation8 + $0x490] sm:$0xf0]  ;;  %3602 = vmatpush.bf16.msra.mxu1 %v6094_v34  ;;  %v425_v34 = vperm.slane %v7153_v41, 4 }
 0x177   :  { %3593 = vmatpush.bf16.msra.mxu0 %v5902_v50  ;;  %v5679_v50 = vld [vmem:[#allocation8 + $0x290] sm:$0xf0]  ;;  %v5938_v22 = vor.u32 %v6683_v3, %v5935_v44  ;;  %v6705_v3 = vld [vmem:[#allocation8 + $0x52c] sm:$0xf0]  ;;  %v6703_v44 = vld [vmem:[#allocation8 + $0x524] sm:$0xf] }
 0x178   :  { %v5682_v60 = vor.u32 %v6619_v19, %v5679_v50 }
 0x179   :  { %3619 = vmatpush.bf16.msra.mxu2 %v5394_v42  ;;  %v6077_v42 = vld [vmem:[#allocation8 + $0x5a0] sm:$0xf] }
 0x17a   :  { %3632 = vmatpush.bf16.msra.mxu3 %v5522_v58  ;;  %v6078_v46 = vor.u32 %v6721_v43, %v6077_v42  ;;  %v6717_v58 = vld [vmem:[#allocation8 + $0x58c] sm:$0xf0] }
 0x17b   :  { %3594 = vmatpush.bf16.msra.mxu0 %v5886_v62  ;;  %v6062_v61 = vor.u32 %v6717_v58, %v6061_v56  ;;  %v6715_v62 = vld [vmem:[#allocation8 + $0x584] sm:$0xf] }
 0x17c   :  { %3603 = vmatpush.bf16.msra.mxu1 %v6078_v46  ;;  %v6066_v9 = vor.u32 %v6715_v62, %v6063_v0  ;;  %v6634_v46 = vld [vmem:[#allocation8 + $0x2f4] sm:$0xf0]  ;;  %v5618_v62 = vor.u32 %v6603_v47, %v5615_v48  ;;  %v6699_v0 = vld [vmem:[#allocation8 + $0x504] sm:$0xf]  ;;  %v5791_v48 = vld [vmem:[#allocation8 + $0x370] sm:$0xf0] }
 0x17d   :  { %3620 = vmatpush.bf16.msra.mxu2 %v5378_v53  ;;  %v6647_v47 = vld [vmem:[#allocation8 + $0x364] sm:$0xf] }
 0x17e   :  { %3633 = vmatpush.bf16.msra.mxu3 %v5506_v11  ;;  %v5666_v11 = vor.u32 %v6615_v2, %v5663_v4  ;;  %v5999_v2 = vld [vmem:[#allocation8 + $0x510] sm:$0xf0]  ;;  %v6663_v4 = vld [vmem:[#allocation8 + $0x3e4] sm:$0xf] }
 0x17f   :  { %3595 = vmatpush.bf16.msra.mxu0 %v5870_v16  ;;  %v7171_v53 = vpop.f32.mrf.mxu0  ;;  %v6611_v16 = vld [vmem:[#allocation8 + $0x244] sm:$0xf]  ;;  %v6002_v49 = vor.u32 %v6699_v0, %v5999_v2  ;;  %v6610_v0 = vld [vmem:[#allocation8 + $0x234] sm:$0xf0]  ;;  %v5477_v2 = vld [vmem:[#allocation8 + $0xe8] sm:$0xf] }
 0x180   :  { %v7173_v59 = vpop.f32.mrf.mxu1  ;;  %3604 = vmatpush.bf16.msra.mxu1 %v6062_v61  ;;  %v5650_v18 = vor.u32 %v6611_v16, %v5647_v17  ;;  %v2216_v19 = vadd.f32 %v7171_v53, %v425_v34  ;;  %v5861_v53 = vld [vmem:[#allocation8 + $0x3e8] sm:$0xf]  ;;  %v5839_v16 = vld [vmem:[#allocation8 + $0x3d0] sm:$0xf0]  ;;  %v6626_v17 = vld [vmem:[#allocation8 + $0x2b4] sm:$0xf0] }
 0x181   :  { %3621 = vmatpush.bf16.msra.mxu2 %v5362_v63  ;;  %v6713_v63 = vld [vmem:[#allocation8 + $0x56c] sm:$0xf0] }
 0x182   :  { %3634 = vmatpush.bf16.msra.mxu3 %v5490_v29  ;;  %v6046_v12 = vor.u32 %v6713_v63, %v6045_v10  ;;  %v5887_v29 = vld [vmem:[#allocation8 + $0x430] sm:$0xf0]  ;;  %v2229_v10 = vadd.f32 %v7173_v59, %v2216_v19  ;;  %v5858_v63 = vor.u32 %v6663_v4, %v5855_v8  ;;  %v6614_v19 = vld [vmem:[#allocation8 + $0x254] sm:$0xf0] }
 0x183   :  { %3640 = vmatpush.bf16.msrb.mxu0 %v5730_v24  ;;  %v6671_v24 = vld [vmem:[#allocation8 + $0x424] sm:$0xf]  ;;  %v6570_v4 = vld [vmem:[#allocation8 + $0xf4] sm:$0xf0] }
 0x184   :  { %3622 = vmatmul.bf16.vlgmr.msra.gmra.mxu2 %v7158_v55  ;;  %3605 = vmatpush.bf16.msra.mxu1 %v6046_v12  ;;  %v5890_v35 = vor.u32 %v6671_v24, %v5887_v29  ;;  %v5701_v12 = vld [vmem:[#allocation8 + $0x2a8] sm:$0xf]  ;;  %v6662_v24 = vld [vmem:[#allocation8 + $0x3d4] sm:$0xf0]  ;;  %v6655_v29 = vld [vmem:[#allocation8 + $0x3a4] sm:$0xf] }
 0x185   :  { %3666 = vmatpush.bf16.msrb.mxu2 %v5986_v14  ;;  %v6711_v14 = vld [vmem:[#allocation8 + $0x564] sm:$0xf]  ;;  %3635 = vmatmul.bf16.vlgmr.msra.gmra.mxu3 %v7160_v57  ;;  %v5702_v59 = vor.u32 %v6626_v17, %v5701_v12  ;;  %v5478_v12 = vor.u32 %v6570_v4, %v5477_v2  ;;  %v6552_v2 = vld [vmem:[#allocation8 + $0x6c] sm:$0xf]  ;;  %v5415_v4 = vld [vmem:[#allocation8 + $0x78] sm:$0xf0] }
 0x186   :  { %3679 = vmatpush.bf16.msrb.mxu3 %v6114_v31  ;;  %v6050_v27 = vor.u32 %v6711_v14, %v6047_v15  ;;  %v6030_v31 = vor.u32 %v6709_v1, %v6029_v28  ;;  %v6659_v15 = vld [vmem:[#allocation8 + $0x3c4] sm:$0xf]  ;;  %v5685_v28 = vld [vmem:[#allocation8 + $0x288] sm:$0xf] }
 0x187   :  { %3641 = vmatpush.bf16.msrb.mxu0 %v5714_v33  ;;  %v7176_v21 = vpop.f32.mrf.mxu2  ;;  %v2217_v51 = vpop.f32.mrf.mxu0  ;;  %v5631_v33 = vld [vmem:[#allocation8 + $0x230] sm:$0xf0] }
 0x188   :  { %v7178_v25 = vpop.f32.mrf.mxu3  ;;  %v5634_v42 = vor.u32 %v6607_v6, %v5631_v33  ;;  %3606 = vmatpush.bf16.msra.mxu1 %v6030_v31  ;;  %v2242_v51 = vadd.f32 %v7176_v21, %v2229_v10  ;;  %v5829_v31 = vld [vmem:[#allocation8 + $0x3a8] sm:$0xf]  ;;  %v6646_v10 = vld [vmem:[#allocation8 + $0x354] sm:$0xf0] }
 0x189   :  { %3667 = vmatpush.bf16.msrb.mxu2 %v5970_v30  ;;  %v2230_v30 = vpop.f32.mrf.mxu1  ;;  %v5669_v21 = vld [vmem:[#allocation8 + $0x268] sm:$0xf]  ;;  %v5830_v34 = vor.u32 %v6658_v20, %v5829_v31  ;;  %v6635_v20 = vld [vmem:[#allocation8 + $0x304] sm:$0xf] }
 0x18a   :  { %3680 = vmatpush.bf16.msrb.mxu3 %v6098_v40  ;;  %v5733_v40 = vld [vmem:[#allocation8 + $0x2e8] sm:$0xf]  ;;  %v5823_v30 = vld [vmem:[#allocation8 + $0x3b0] sm:$0xf0]  ;;  %v2255_v32 = vadd.f32 %v7178_v25, %v2242_v51  ;;  %v6568_v51 = vld [vmem:[#allocation8 + $0xec] sm:$0xf] }
 0x18b   :  { %3642 = vmatpush.bf16.msrb.mxu0 %v5698_v45  ;;  %v6015_v45 = vld [vmem:[#allocation8 + $0x530] sm:$0xf0]  ;;  %v5734_v61 = vor.u32 %v6634_v46, %v5733_v40  ;;  %v5826_v6 = vor.u32 %v6655_v29, %v5823_v30  ;;  %v6642_v29 = vld [vmem:[#allocation8 + $0x334] sm:$0xf0] }
 0x18c   :  { %v6018_v58 = vor.u32 %v6703_v44, %v6015_v45  ;;  %v5653_v45 = vld [vmem:[#allocation8 + $0x248] sm:$0xf] }
 0x18d   :  { %3668 = vmatpush.bf16.msrb.mxu2 %v5954_v26  ;;  %v6013_v26 = vld [vmem:[#allocation8 + $0x520] sm:$0xf] }
 0x18e   :  { %3681 = vmatpush.bf16.msrb.mxu3 %v6082_v54  ;;  %v6014_v43 = vor.u32 %v6705_v3, %v6013_v26  ;;  %v6630_v54 = vld [vmem:[#allocation8 + $0x2d4] sm:$0xf0]  ;;  %v5813_v26 = vld [vmem:[#allocation8 + $0x388] sm:$0xf] }
 0x18f   :  { %3643 = vmatpush.bf16.msrb.mxu0 %v5682_v60  ;;  %v2243_v50 = vpop.f32.mrf.mxu2  ;;  %v6701_v60 = vld [vmem:[#allocation8 + $0x50c] sm:$0xf0]  ;;  %v6654_v3 = vld [vmem:[#allocation8 + $0x394] sm:$0xf0] }
 0x190   :  { %v2256_v56 = vpop.f32.mrf.mxu3  ;;  %3607 = vmatpush.bf16.msra.mxu1 %v6014_v43  ;;  %v5814_v46 = vor.u32 %v6654_v3, %v5813_v26  ;;  %v5797_v50 = vld [vmem:[#allocation8 + $0x368] sm:$0xf]  ;;  %v6638_v3 = vld [vmem:[#allocation8 + $0x314] sm:$0xf0] }
 0x191   :  { %3669 = vmatpush.bf16.msrb.mxu2 %v5938_v22  ;;  %v5874_v22 = vor.u32 %v6667_v36, %v5871_v38  ;;  %v6651_v36 = vld [vmem:[#allocation8 + $0x384] sm:$0xf]  ;;  %v5749_v26 = vld [vmem:[#allocation8 + $0x308] sm:$0xf] }
 0x192   :  { %3682 = vmatpush.bf16.msrb.mxu3 %v6066_v9  ;;  %v6666_v9 = vld [vmem:[#allocation8 + $0x3f4] sm:$0xf0] }
 0x193   :  { %3644 = vmatpush.bf16.msrb.mxu0 %v5666_v11  ;;  %v5718_v11 = vor.u32 %v6630_v54, %v5717_v52  ;;  %v5862_v14 = vor.u32 %v6666_v9, %v5861_v53  ;;  %v5794_v52 = vor.u32 %v6647_v47, %v5791_v48  ;;  %v5654_v54 = vor.u32 %v6614_v19, %v5653_v45  ;;  %v5781_v9 = vld [vmem:[#allocation8 + $0x348] sm:$0xf]  ;;  %v6560_v45 = vld [vmem:[#allocation8 + $0xac] sm:$0xf] }
 0x194   :  { %v426_v47 = vperm.slane %v7153_v41, 5 }
 0x195   :  { %3670 = vmatpush.bf16.msrb.mxu2 %v5922_v5  ;;  %v5998_v5 = vor.u32 %v6701_v60, %v5997_v7  ;;  %v6643_v60 = vld [vmem:[#allocation8 + $0x344] sm:$0xf] }
 0x196   :  { %3683 = vmatpush.bf16.msrb.mxu3 %v6050_v27  ;;  %v5842_v27 = vor.u32 %v6659_v15, %v5839_v16  ;;  %v6639_v15 = vld [vmem:[#allocation8 + $0x324] sm:$0xf]  ;;  %v5759_v16 = vld [vmem:[#allocation8 + $0x330] sm:$0xf0] }
 0x197   :  { %3645 = vmatpush.bf16.msrb.mxu0 %v5650_v18  ;;  %3608 = vmatpush.bf16.msra.mxu1 %v5998_v5  ;;  %v6622_v18 = vld [vmem:[#allocation8 + $0x294] sm:$0xf0] }
 0x198   :  { %v5686_v33 = vor.u32 %v6622_v18, %v5685_v28  ;;  %v5762_v28 = vor.u32 %v6639_v15, %v5759_v16  ;;  %v5365_v15 = vld [vmem:[#allocation8 + $0x8] sm:$0xf]  ;;  %v6542_v16 = vld [vmem:[#allocation8 + $0x14] sm:$0xf0] }
 0x199   :  { %3671 = vmatpush.bf16.msrb.mxu2 %v5906_v23  ;;  %v5845_v23 = vld [vmem:[#allocation8 + $0x3c8] sm:$0xf] }
 0x19a   :  { %3684 = vmatpush.bf16.msrb.mxu3 %v6034_v37  ;;  %v5846_v1 = vor.u32 %v6662_v24, %v5845_v23  ;;  %v6618_v37 = vld [vmem:[#allocation8 + $0x274] sm:$0xf0]  ;;  %v5461_v23 = vld [vmem:[#allocation8 + $0xc8] sm:$0xf] }
 0x19b   :  { %3646 = vmatpush.bf16.msrb.mxu0 %v5634_v42  ;;  %3653 = vmatpush.bf16.msrb.mxu1 %v5858_v63  ;;  %v5670_v25 = vor.u32 %v6618_v37, %v5669_v21  ;;  %v5621_v63 = vld [vmem:[#allocation8 + $0x208] sm:$0xf]  ;;  %v6566_v24 = vld [vmem:[#allocation8 + $0xd4] sm:$0xf0] }
 0x19c   :  { %v5462_v18 = vor.u32 %v6566_v24, %v5461_v23  ;;  %v5445_v21 = vld [vmem:[#allocation8 + $0xa8] sm:$0xf]  ;;  %v6544_v23 = vld [vmem:[#allocation8 + $0x2c] sm:$0xf] }
 0x19d   :  { %3672 = vmatpush.bf16.msrb.mxu2 %v5890_v35  ;;  %v5807_v35 = vld [vmem:[#allocation8 + $0x390] sm:$0xf0] }
 0x19e   :  { %3685 = vmatpush.bf16.msrb.mxu3 %v6018_v58  ;;  %v5810_v43 = vor.u32 %v6651_v36, %v5807_v35  ;;  %v5637_v58 = vld [vmem:[#allocation8 + $0x228] sm:$0xf]  ;;  %v6564_v36 = vld [vmem:[#allocation8 + $0xcc] sm:$0xf] }
 0x19f   :  { %3647 = vmatpush.bf16.msrb.mxu0 %v5618_v62  ;;  %3654 = vmatpush.bf16.msrb.mxu1 %v5842_v27  ;;  %v2267_v38 = vpop.f32.mrf.mxu0  ;;  %v5782_v27 = vor.u32 %v6646_v10, %v5781_v9  ;;  %v5381_v10 = vld [vmem:[#allocation8 + $0x28] sm:$0xf] }
 0x1a0   :  { %v2268_v40 = vadd.f32 %v2267_v38, %v2255_v32  ;;  %v2280_v42 = vpop.f32.mrf.mxu1  ;;  %v5743_v32 = vld [vmem:[#allocation8 + $0x310] sm:$0xf0]  ;;  %v5463_v38 = vld [vmem:[#allocation8 + $0xd8] sm:$0xf0] }
 0x1a1   :  { %3673 = vmatpush.bf16.msrb.mxu2 %v5874_v22  ;;  %v6650_v22 = vld [vmem:[#allocation8 + $0x374] sm:$0xf0]  ;;  %v5746_v37 = vor.u32 %v6635_v20, %v5743_v32 }
 0x1a2   :  { %3686 = vmatpush.bf16.msrb.mxu3 %v6002_v49  ;;  %v2281_v44 = vadd.f32 %v2280_v42, %v2268_v40  ;;  %v5798_v7 = vor.u32 %v6650_v22, %v5797_v50  ;;  %v5466_v42 = vor.u32 %v6564_v36, %v5463_v38  ;;  %v5413_v50 = vld [vmem:[#allocation8 + $0x68] sm:$0xf]  ;;  %v6554_v22 = vld [vmem:[#allocation8 + $0x74] sm:$0xf0]  ;;  %v6696_v36 = vld [vmem:[#allocation8 + $0x4ec] sm:$0xf] }
 0x1a3   :  { %3655 = vmatpush.bf16.msrb.mxu1 %v5826_v6 }
 0x1a4   :  { %6786 = vtanh.f32 %v2281_v44  ;;  %v6558_v44 = vld [vmem:[#allocation8 + $0x94] sm:$0xf0] }
 0x1a5   :  { %3718 = vmatpush.bf16.msra.mxu2 %v5734_v61  ;;  %v5775_v61 = vld [vmem:[#allocation8 + $0x350] sm:$0xf0] }
 0x1a6   :  { %3731 = vmatpush.bf16.msra.mxu3 %v5862_v14  ;;  %v5778_v53 = vor.u32 %v6643_v60, %v5775_v61  ;;  %v6606_v14 = vld [vmem:[#allocation8 + $0x214] sm:$0xf0]  ;;  %v5397_v61 = vld [vmem:[#allocation8 + $0x48] sm:$0xf] }
 0x1a7   :  { %3656 = vmatpush.bf16.msrb.mxu1 %v5810_v43  ;;  %v7185_v56 = vpop.f32.mrf.mxu2  ;;  %v2269_v5 = vpop.f32.mrf.mxu0  ;;  %v5622_v30 = vor.u32 %v6606_v14, %v5621_v63  ;;  %v5429_v43 = vld [vmem:[#allocation8 + $0x88] sm:$0xf]  ;;  %v6546_v63 = vld [vmem:[#allocation8 + $0x34] sm:$0xf0] }
 0x1a8   :  { %v7187_v62 = vpop.f32.mrf.mxu3  ;;  %v2282_v8 = vpop.f32.mrf.mxu1  ;;  %v5430_v48 = vor.u32 %v6558_v44, %v5429_v43  ;;  %v6602_v43 = vld [vmem:[#allocation8 + $0x1f4] sm:$0xf0]  ;;  %v6600_v44 = vld [vmem:[#allocation8 + $0x1ec] sm:$0xf] }
 0x1a9   :  { %3719 = vmatpush.bf16.msra.mxu2 %v5718_v11  ;;  %v5638_v11 = vor.u32 %v6610_v0, %v5637_v58  ;;  %v2294_v58 = vadd.f32 %v7185_v56, %v426_v47  ;;  %v6550_v0 = vld [vmem:[#allocation8 + $0x54] sm:$0xf0]  ;;  %v5418_v56 = vor.u32 %v6552_v2, %v5415_v4  ;;  %v6692_v47 = vld [vmem:[#allocation8 + $0x4cc] sm:$0xf]  ;;  %v5941_v2 = vld [vmem:[#allocation8 + $0x488] sm:$0xf] }
 0x1aa   :  { %3732 = vmatpush.bf16.msra.mxu3 %v5846_v1  ;;  %v6787_v49 = vpop.eup %6786  ;;  %v5765_v1 = vld [vmem:[#allocation8 + $0x328] sm:$0xf]  ;;  %v6686_v4 = vld [vmem:[#allocation8 + $0x494] sm:$0xf0] }
 0x1ab   :  { %3657 = vmatpush.bf16.msrb.mxu1 %v5794_v52  ;;  %v7189_v17 = vpack.c.bf16 %v6787_v49, %v6787_v49  ;;  %v5766_v35 = vor.u32 %v6642_v29, %v5765_v1  ;;  %v6556_v52 = vld [vmem:[#allocation8 + $0x8c] sm:$0xf]  ;;  %v2307_v41 = vadd.f32 %v7187_v62, %v2294_v58  ;;  %v5589_v58 = vld [vmem:[#allocation8 + $0x1c8] sm:$0xf] }
 0x1ac   :  { %v6548_v49 = vld [vmem:[#allocation8 + $0x4c] sm:$0xf] }
 0x1ad   :  { %3720 = vmatpush.bf16.msra.mxu2 %v5702_v59  ;;  %v5479_v59 = vld [vmem:[#allocation8 + $0xf8] sm:$0xf0]  ;;  %3596 = vmatmul.bf16.vlgmr.msra.gmra.mxu0 %v7189_v17 }
 0x1ae   :  { %3733 = vmatpush.bf16.msra.mxu3 %v5830_v34  ;;  %3674 = vmatmul.bf16.vlgmr.msrb.gmra.mxu2 %v7189_v17  ;;  %v5482_v6 = vor.u32 %v6568_v51, %v5479_v59  ;;  %v6562_v34 = vld [vmem:[#allocation8 + $0xb4] sm:$0xf0]  ;;  %v5989_v59 = vld [vmem:[#allocation8 + $0x4e8] sm:$0xf] }
 0x1af   :  { %3658 = vmatpush.bf16.msrb.mxu1 %v5778_v53  ;;  %3692 = vmatpush.bf16.msra.mxu0 %v5478_v12  ;;  %v2295_v31 = vpop.f32.mrf.mxu2  ;;  %v5446_v40 = vor.u32 %v6562_v34, %v5445_v21  ;;  %v5398_v53 = vor.u32 %v6550_v0, %v5397_v61  ;;  %v5382_v12 = vor.u32 %v6546_v63, %v5381_v10  ;;  %v5973_v21 = vld [vmem:[#allocation8 + $0x4c8] sm:$0xf]  ;;  %v6694_v34 = vld [vmem:[#allocation8 + $0x4d4] sm:$0xf0]  ;;  %v5591_v0 = vld [vmem:[#allocation8 + $0x1d8] sm:$0xf0] }
 0x1b0   :  { %v6594_v10 = vld [vmem:[#allocation8 + $0x1b4] sm:$0xf0]  ;;  %v6592_v63 = vld [vmem:[#allocation8 + $0x1ac] sm:$0xf] }
 0x1b1   :  { %3721 = vmatpush.bf16.msra.mxu2 %v5686_v33  ;;  %v2308_v33 = vpop.f32.mrf.mxu3 }
 0x1b2   :  { %3734 = vmatpush.bf16.msra.mxu3 %v5814_v46  ;;  %v5447_v46 = vld [vmem:[#allocation8 + $0xb8] sm:$0xf0] }
 0x1b3   :  { %3659 = vmatpush.bf16.msrb.mxu1 %v5762_v28  ;;  %3693 = vmatpush.bf16.msra.mxu0 %v5462_v18  ;;  %v5450_v19 = vor.u32 %v6560_v45, %v5447_v46  ;;  %v6698_v28 = vld [vmem:[#allocation8 + $0x4f4] sm:$0xf0]  ;;  %v5366_v18 = vor.u32 %v6542_v16, %v5365_v15  ;;  %v5367_v33 = vld [vmem:[#allocation8 + $0x18] sm:$0xf0]  ;;  %v5957_v45 = vld [vmem:[#allocation8 + $0x4a8] sm:$0xf] }
 0x1b4   :  { %v5990_v32 = vor.u32 %v6698_v28, %v5989_v59  ;;  %v6690_v46 = vld [vmem:[#allocation8 + $0x4b4] sm:$0xf0]  ;;  %v6684_v15 = vld [vmem:[#allocation8 + $0x48c] sm:$0xf]  ;;  %v5943_v16 = vld [vmem:[#allocation8 + $0x498] sm:$0xf0] }
 0x1b5   :  { %3722 = vmatpush.bf16.msra.mxu2 %v5670_v25  ;;  %v5750_v25 = vor.u32 %v6638_v3, %v5749_v26  ;;  %v6590_v59 = vld [vmem:[#allocation8 + $0x194] sm:$0xf0]  ;;  %v6588_v28 = vld [vmem:[#allocation8 + $0x18c] sm:$0xf] }
 0x1b6   :  { %3735 = vmatpush.bf16.msra.mxu3 %v5798_v7  ;;  %v5414_v7 = vor.u32 %v6554_v22, %v5413_v50 }
 0x1b7   :  { %3660 = vmatpush.bf16.msrb.mxu1 %v5746_v37  ;;  %3694 = vmatpush.bf16.msra.mxu0 %v5446_v40  ;;  %v5974_v37 = vor.u32 %v6694_v34, %v5973_v21 }
 0x1b9   :  { %3723 = vmatpush.bf16.msra.mxu2 %v5654_v54  ;;  %v5431_v54 = vld [vmem:[#allocation8 + $0x98] sm:$0xf0] }
 0x1ba   :  { %3736 = vmatpush.bf16.msra.mxu3 %v5782_v27  ;;  %v5434_v60 = vor.u32 %v6556_v52, %v5431_v54  ;;  %v5383_v27 = vld [vmem:[#allocation8 + $0x38] sm:$0xf0]  ;;  %v5958_v54 = vor.u32 %v6690_v46, %v5957_v45  ;;  %v5525_v46 = vld [vmem:[#allocation8 + $0x148] sm:$0xf] }
 0x1bb   :  { %3695 = vmatpush.bf16.msra.mxu0 %v5430_v48  ;;  %v5386_v20 = vor.u32 %v6544_v23, %v5383_v27  ;;  %v5975_v48 = vld [vmem:[#allocation8 + $0x4d8] sm:$0xf0]  ;;  %v5557_v27 = vld [vmem:[#allocation8 + $0x188] sm:$0xf] }
 0x1bc   :  { %v5978_v61 = vor.u32 %v6692_v47, %v5975_v48  ;;  %v5558_v21 = vor.u32 %v6590_v59, %v5557_v27  ;;  %v5493_v27 = vld [vmem:[#allocation8 + $0x108] sm:$0xf]  ;;  %v6574_v59 = vld [vmem:[#allocation8 + $0x114] sm:$0xf0] }
 0x1bd   :  { %3724 = vmatpush.bf16.msra.mxu2 %v5638_v11  ;;  %3648 = vmatmul.bf16.vlgmr.msrb.gmra.mxu0 %v7156_v39  ;;  %v5399_v11 = vld [vmem:[#allocation8 + $0x58] sm:$0xf0] }
 0x1be   :  { %3737 = vmatpush.bf16.msra.mxu3 %v5766_v35  ;;  %v5402_v62 = vor.u32 %v6548_v49, %v5399_v11  ;;  %v5991_v35 = vld [vmem:[#allocation8 + $0x4f8] sm:$0xf0]  ;;  %v7204_v49 = vld [vmem:[#allocation10] sm:$0xf] }
 0x1bf   :  { %v2319_v5 = vpop.f32.mrf.mxu0  ;;  %3696 = vmatpush.bf16.msra.mxu0 %v5414_v7  ;;  %v5994_v40 = vor.u32 %v6696_v36, %v5991_v35  ;;  %v6598_v7 = vld [vmem:[#allocation8 + $0x1d4] sm:$0xf0]  ;;  %v5541_v35 = vld [vmem:[#allocation8 + $0x168] sm:$0xf] }
 0x1c0   :  { %v2332_v8 = vpop.f32.mrf.mxu1  ;;  %v2320_v9 = vadd.f32 %v2319_v5, %v2307_v41  ;;  %v6688_v41 = vld [vmem:[#allocation8 + $0x4ac] sm:$0xf]  ;;  %v5959_v5 = vld [vmem:[#allocation8 + $0x4b8] sm:$0xf0] }
 0x1c1   :  { %3725 = vmatpush.bf16.msra.mxu2 %v5622_v30  ;;  %v5962_v11 = vor.u32 %v6688_v41, %v5959_v5  ;;  %v6632_v41 = vld [vmem:[#allocation8 + $0x2ec] sm:$0xf]  ;;  %v5735_v5 = vld [vmem:[#allocation8 + $0x2f8] sm:$0xf0] }
 0x1c2   :  { %3738 = vmatpush.bf16.msra.mxu3 %v5750_v25  ;;  %v2333_v14 = vadd.f32 %v2332_v8, %v2320_v9  ;;  %v5607_v25 = vld [vmem:[#allocation8 + $0x1f8] sm:$0xf0]  ;;  %v5590_v8 = vor.u32 %v6598_v7, %v5589_v58  ;;  %v5877_v7 = vld [vmem:[#allocation8 + $0x408] sm:$0xf] }
 0x1c3   :  { %3697 = vmatpush.bf16.msra.mxu0 %v5398_v53  ;;  %v5610_v52 = vor.u32 %v6600_v44, %v5607_v25  ;;  %v5573_v53 = vld [vmem:[#allocation8 + $0x1a8] sm:$0xf]  ;;  %v6676_v44 = vld [vmem:[#allocation8 + $0x44c] sm:$0xf]  ;;  %v5911_v25 = vld [vmem:[#allocation8 + $0x458] sm:$0xf0] }
 0x1c4   :  { %3726 = vmatmul.bf16.vlgmr.msra.gmra.mxu2 %v7156_v39  ;;  %v5574_v23 = vor.u32 %v6594_v10, %v5573_v53  ;;  %v5914_v58 = vor.u32 %v6676_v44, %v5911_v25  ;;  %v5509_v10 = vld [vmem:[#allocation8 + $0x128] sm:$0xf]  ;;  %v5687_v44 = vld [vmem:[#allocation8 + $0x298] sm:$0xf0] }
 0x1c5   :  { %3770 = vmatpush.bf16.msrb.mxu2 %v5482_v6  ;;  %v6540_v6 = vld [vmem:[#allocation8 + $0xc] sm:$0xf] }
 0x1c6   :  { %v5370_v38 = vor.u32 %v6540_v6, %v5367_v33 }
 0x1c7   :  { %v2345_v24 = vpop.f32.mrf.mxu2  ;;  %v2321_v29 = vpop.f32.mrf.mxu0  ;;  %3698 = vmatpush.bf16.msra.mxu0 %v5382_v12  ;;  %v5575_v12 = vld [vmem:[#allocation8 + $0x1b8] sm:$0xf0] }
 0x1c8   :  { %v2358_v51 = vpop.f32.mrf.mxu3  ;;  %v2346_v1 = vadd.f32 %v2345_v24, %v2333_v14  ;;  %v2334_v30 = vpop.f32.mrf.mxu1  ;;  %v5925_v14 = vld [vmem:[#allocation8 + $0x468] sm:$0xf]  ;;  %v5578_v24 = vor.u32 %v6592_v63, %v5575_v12  ;;  %v5559_v29 = vld [vmem:[#allocation8 + $0x198] sm:$0xf0]  ;;  %v6578_v63 = vld [vmem:[#allocation8 + $0x134] sm:$0xf0]  ;;  %v5738_v12 = vor.u32 %v6632_v41, %v5735_v5 }
 0x1c9   :  { %3771 = vmatpush.bf16.msrb.mxu2 %v5466_v42  ;;  %v5605_v42 = vld [vmem:[#allocation8 + $0x1e8] sm:$0xf]  ;;  %v5562_v34 = vor.u32 %v6588_v28, %v5559_v29  ;;  %v6572_v28 = vld [vmem:[#allocation8 + $0x10c] sm:$0xf]  ;;  %v5655_v5 = vld [vmem:[#allocation8 + $0x258] sm:$0xf0] }
 0x1ca   :  { %v2359_v31 = vadd.f32 %v2358_v51, %v2346_v1  ;;  %v5606_v50 = vor.u32 %v6602_v43, %v5605_v42  ;;  %v5946_v1 = vor.u32 %v6684_v15, %v5943_v16  ;;  %v5909_v30 = vld [vmem:[#allocation8 + $0x448] sm:$0xf]  ;;  %v6674_v43 = vld [vmem:[#allocation8 + $0x434] sm:$0xf0]  ;;  %v6668_v15 = vld [vmem:[#allocation8 + $0x40c] sm:$0xf] }
 0x1cb   :  { %3699 = vmatpush.bf16.msra.mxu0 %v5366_v18  ;;  %v6678_v18 = vld [vmem:[#allocation8 + $0x454] sm:$0xf0]  ;;  %v5893_v42 = vld [vmem:[#allocation8 + $0x428] sm:$0xf]  ;;  %v5879_v16 = vld [vmem:[#allocation8 + $0x418] sm:$0xf0] }
 0x1cc   :  { %6788 = vtanh.f32 %v2359_v31  ;;  %v5910_v36 = vor.u32 %v6678_v18, %v5909_v30  ;;  %v5894_v48 = vor.u32 %v6674_v43, %v5893_v42  ;;  %v5882_v29 = vor.u32 %v6668_v15, %v5879_v16  ;;  %v5495_v18 = vld [vmem:[#allocation8 + $0x118] sm:$0xf0]  ;;  %v6620_v43 = vld [vmem:[#allocation8 + $0x28c] sm:$0xf] }
 0x1cd   :  { %3772 = vmatpush.bf16.msrb.mxu2 %v5450_v19  ;;  %v6103_v42 = vld [vmem:[#allocation8 + $0x5d8] sm:$0xf0]  ;;  %v6612_v41 = vld [vmem:[#allocation8 + $0x24c] sm:$0xf] }
 0x1ce   :  { %3700 = vmatmul.bf16.vlgmr.msra.gmra.mxu0 %v7158_v55 }
 0x1cf   :  { %3744 = vmatpush.bf16.msrb.mxu0 %v5990_v32  ;;  %v2347_v26 = vpop.f32.mrf.mxu2  ;;  %v5927_v32 = vld [vmem:[#allocation8 + $0x478] sm:$0xf0] }
 0x1d0   :  { %v2360_v3 = vpop.f32.mrf.mxu3 }
 0x1d1   :  { %3773 = vmatpush.bf16.msrb.mxu2 %v5434_v60  ;;  %v6596_v60 = vld [vmem:[#allocation8 + $0x1cc] sm:$0xf] }
 0x1d2   :  { %v6789_v19 = vpop.eup %6788  ;;  %v5594_v9 = vor.u32 %v6596_v60, %v5591_v0  ;;  %v6670_v60 = vld [vmem:[#allocation8 + $0x414] sm:$0xf0] }
 0x1d3   :  { %3745 = vmatpush.bf16.msrb.mxu0 %v5974_v37  ;;  %v7199_v22 = vpack.c.bf16 %v6789_v19, %v6789_v19  ;;  %v6584_v37 = vld [vmem:[#allocation8 + $0x16c] sm:$0xf]  ;;  %v6582_v19 = vld [vmem:[#allocation8 + $0x154] sm:$0xf0] }
 0x1d4   :  { %v5526_v53 = vor.u32 %v6582_v19, %v5525_v46  ;;  %v6085_v46 = vld [vmem:[#allocation8 + $0x5a8] sm:$0xf]  ;;  %v6720_v19 = vld [vmem:[#allocation8 + $0x5ac] sm:$0xf] }
 0x1d5   :  { %3774 = vmatpush.bf16.msrb.mxu2 %v5418_v56  ;;  %3609 = vmatmul.bf16.vlgmr.msra.gmra.mxu1 %v7199_v22  ;;  %v5942_v56 = vor.u32 %v6686_v4, %v5941_v2  ;;  %v5895_v4 = vld [vmem:[#allocation8 + $0x438] sm:$0xf0] }
 0x1d6   :  { %3687 = vmatmul.bf16.vlgmr.msrb.gmra.mxu3 %v7199_v22  ;;  %3705 = vmatpush.bf16.msra.mxu1 %v5606_v50  ;;  %v6580_v50 = vld [vmem:[#allocation8 + $0x14c] sm:$0xf] }
 0x1d7   :  { %3783 = vmatpush.bf16.msrb.mxu3 %v5610_v52  ;;  %3746 = vmatpush.bf16.msrb.mxu0 %v5958_v54  ;;  %v5527_v52 = vld [vmem:[#allocation8 + $0x158] sm:$0xf0] }
 0x1d9   :  { %3775 = vmatpush.bf16.msrb.mxu2 %v5402_v62  ;;  %v6682_v62 = vld [vmem:[#allocation8 + $0x474] sm:$0xf0] }
 0x1da   :  { %3706 = vmatpush.bf16.msra.mxu1 %v5590_v8  ;;  %v5926_v51 = vor.u32 %v6682_v62, %v5925_v14  ;;  %v6576_v14 = vld [vmem:[#allocation8 + $0x12c] sm:$0xf]  ;;  %v5511_v62 = vld [vmem:[#allocation8 + $0x138] sm:$0xf0] }
 0x1db   :  { %3784 = vmatpush.bf16.msrb.mxu3 %v5594_v9  ;;  %3747 = vmatpush.bf16.msrb.mxu0 %v5942_v56  ;;  %v5530_v9 = vor.u32 %v6580_v50, %v5527_v52  ;;  %v5878_v56 = vor.u32 %v6670_v60, %v5877_v7  ;;  %v6087_v50 = vld [vmem:[#allocation8 + $0x5b8] sm:$0xf0]  ;;  %v6616_v52 = vld [vmem:[#allocation8 + $0x26c] sm:$0xf]  ;;  %v6069_v60 = vld [vmem:[#allocation8 + $0x588] sm:$0xf] }
 0x1dc   :  { %v6090_v7 = vor.u32 %v6720_v19, %v6087_v50  ;;  %v6656_v50 = vld [vmem:[#allocation8 + $0x3ac] sm:$0xf] }
 0x1dd   :  { %3776 = vmatpush.bf16.msrb.mxu2 %v5386_v20  ;;  %v6680_v20 = vld [vmem:[#allocation8 + $0x46c] sm:$0xf] }
 0x1de   :  { %3707 = vmatpush.bf16.msra.mxu1 %v5574_v23  ;;  %v5930_v3 = vor.u32 %v6680_v20, %v5927_v32  ;;  %v6628_v23 = vld [vmem:[#allocation8 + $0x2cc] sm:$0xf]  ;;  %v6730_v20 = vld [vmem:[#allocation8 + $0x5f4] sm:$0xf0] }
 0x1df   :  { %v3545_v31 = vpop.f32.mrf.mxu0  ;;  %3785 = vmatpush.bf16.msrb.mxu3 %v5578_v24  ;;  %3748 = vmatpush.bf16.msrb.mxu0 %v5926_v51  ;;  %v5510_v24 = vor.u32 %v6578_v63, %v5509_v10  ;;  %v5514_v51 = vor.u32 %v6576_v14, %v5511_v62  ;;  %v6728_v32 = vld [vmem:[#allocation8 + $0x5ec] sm:$0xf]  ;;  %v5639_v62 = vld [vmem:[#allocation8 + $0x238] sm:$0xf0] }
 0x1e0   :  { %v3558_v33 = vpop.f32.mrf.mxu1  ;;  %v6712_v63 = vld [vmem:[#allocation8 + $0x56c] sm:$0xf] }
 0x1e1   :  { %3777 = vmatpush.bf16.msrb.mxu2 %v5370_v38  ;;  %v6586_v38 = vld [vmem:[#allocation8 + $0x174] sm:$0xf0]  ;;  %v6608_v14 = vld [vmem:[#allocation8 + $0x22c] sm:$0xf] }
 0x1e2   :  { %3708 = vmatpush.bf16.msra.mxu1 %v5558_v21  ;;  %v5542_v45 = vor.u32 %v6586_v38, %v5541_v35  ;;  %v6624_v21 = vld [vmem:[#allocation8 + $0x2ac] sm:$0xf] }
 0x1e3   :  { %3786 = vmatpush.bf16.msrb.mxu3 %v5562_v34  ;;  %3749 = vmatpush.bf16.msrb.mxu0 %v5910_v36  ;;  %v5703_v34 = vld [vmem:[#allocation8 + $0x2b8] sm:$0xf0]  ;;  %v5498_v36 = vor.u32 %v6572_v28, %v5495_v18  ;;  %v6604_v28 = vld [vmem:[#allocation8 + $0x20c] sm:$0xf]  ;;  %v6706_v18 = vld [vmem:[#allocation8 + $0x534] sm:$0xf0] }
 0x1e4   :  { %3778 = vmatmul.bf16.vlgmr.msrb.gmra.mxu2 %v7158_v55  ;;  %v2568_v55 = vperm.slane %v7204_v49, 0 }
 0x1e5   :  { %3822 = vmatpush.bf16.msra.mxu2 %v5994_v40  ;;  %v5543_v40 = vld [vmem:[#allocation8 + $0x178] sm:$0xf0]  ;;  %3661 = vmatmul.bf16.vlgmr.msrb.gmra.mxu1 %v7167_v13 }
 0x1e6   :  { %v3546_v6 = vadd.f32 %v3545_v31, %v2568_v55  ;;  %v5546_v47 = vor.u32 %v6584_v37, %v5543_v40  ;;  %3739 = vmatmul.bf16.vlgmr.msra.gmra.mxu3 %v7167_v13  ;;  %3709 = vmatpush.bf16.msra.mxu1 %v5542_v45  ;;  %v5719_v55 = vld [vmem:[#allocation8 + $0x2d8] sm:$0xf0]  ;;  %v6117_v31 = vld [vmem:[#allocation8 + $0x5e8] sm:$0xf]  ;;  %v6724_v40 = vld [vmem:[#allocation8 + $0x5cc] sm:$0xf] }
 0x1e7   :  { %v3571_v54 = vpop.f32.mrf.mxu2  ;;  %v3547_v2 = vpop.f32.mrf.mxu0  ;;  %3750 = vmatpush.bf16.msrb.mxu0 %v5894_v48  ;;  %v5722_v30 = vor.u32 %v6628_v23, %v5719_v55  ;;  %v6118_v35 = vor.u32 %v6730_v20, %v6117_v31  ;;  %v6101_v37 = vld [vmem:[#allocation8 + $0x5c8] sm:$0xf]  ;;  %v6106_v45 = vor.u32 %v6724_v40, %v6103_v42  ;;  %v5690_v48 = vor.u32 %v6620_v43, %v5687_v44  ;;  %v6710_v55 = vld [vmem:[#allocation8 + $0x554] sm:$0xf0]  ;;  %v5863_v40 = vld [vmem:[#allocation8 + $0x3f8] sm:$0xf0] }
 0x1e8   :  { %v3559_v26 = vadd.f32 %v3558_v33, %v3546_v6  ;;  %v3560_v8 = vpop.f32.mrf.mxu1  ;;  %3787 = vmatpush.bf16.msrb.mxu3 %v5546_v47  ;;  %v6119_v6 = vld [vmem:[#allocation8 + $0x5f8] sm:$0xf0]  ;;  %v5494_v33 = vor.u32 %v6574_v59, %v5493_v27  ;;  %v6722_v47 = vld [vmem:[#allocation8 + $0x5b4] sm:$0xf0]  ;;  %v6716_v2 = vld [vmem:[#allocation8 + $0x58c] sm:$0xf] }
 0x1e9   :  { %3823 = vmatpush.bf16.msra.mxu2 %v5978_v61  ;;  %v6672_v61 = vld [vmem:[#allocation8 + $0x42c] sm:$0xf]  ;;  %v6122_v38 = vor.u32 %v6728_v32, %v6119_v6  ;;  %v6037_v23 = vld [vmem:[#allocation8 + $0x548] sm:$0xf]  ;;  %v6039_v59 = vld [vmem:[#allocation8 + $0x558] sm:$0xf0] }
 0x1ea   :  { %v7207_v0 = vadd.f32 %v3571_v54, %v3559_v26  ;;  %3710 = vmatpush.bf16.msra.mxu1 %v5526_v53  ;;  %v6726_v26 = vld [vmem:[#allocation8 + $0x5d4] sm:$0xf0]  ;;  %v5671_v54 = vld [vmem:[#allocation8 + $0x278] sm:$0xf0]  ;;  %v6708_v27 = vld [vmem:[#allocation8 + $0x54c] sm:$0xf] }
 0x1eb   :  { %3751 = vmatpush.bf16.msrb.mxu0 %v5878_v56  ;;  %v6102_v25 = vor.u32 %v6726_v26, %v6101_v37  ;;  %v5658_v56 = vor.u32 %v6612_v41, %v5655_v5  ;;  %v6704_v32 = vld [vmem:[#allocation8 + $0x52c] sm:$0xf]  ;;  %v6023_v6 = vld [vmem:[#allocation8 + $0x538] sm:$0xf0] }
 0x1ec   :  { %3788 = vmatpush.bf16.msrb.mxu3 %v5530_v9  ;;  %v6053_v9 = vld [vmem:[#allocation8 + $0x568] sm:$0xf]  ;;  %v6007_v26 = vld [vmem:[#allocation8 + $0x518] sm:$0xf0]  ;;  %v6644_v5 = vld [vmem:[#allocation8 + $0x34c] sm:$0xf] }
 0x1ed   :  { %3824 = vmatpush.bf16.msra.mxu2 %v5962_v11  ;;  %v5898_v11 = vor.u32 %v6672_v61, %v5895_v4  ;;  %v5674_v61 = vor.u32 %v6616_v52, %v5671_v54  ;;  %v6071_v4 = vld [vmem:[#allocation8 + $0x598] sm:$0xf0] }
 0x1ee   :  { %3711 = vmatpush.bf16.msra.mxu1 %v5510_v24  ;;  %3752 = vmatmul.bf16.vlgmr.msrb.gmra.mxu0 %v7189_v17  ;;  %v6074_v53 = vor.u32 %v6716_v2, %v6071_v4  ;;  %v5831_v52 = vld [vmem:[#allocation8 + $0x3b8] sm:$0xf0]  ;;  %v6737_v4 = vld [vmem:[#allocation11 + $0x30] sm:$0xff] }
 0x1ef   :  { %3796 = vmatpush.bf16.msra.mxu0 %v5738_v12  ;;  %v5834_v54 = vor.u32 %v6656_v50, %v5831_v52  ;;  %v5799_v2 = vld [vmem:[#allocation8 + $0x378] sm:$0xf0] }
 0x1f0   :  { %3789 = vmatpush.bf16.msrb.mxu3 %v5514_v51  ;;  %v5642_v51 = vor.u32 %v6608_v14, %v5639_v62  ;;  %v6734_v14 = vld [vmem:[#allocation11 + $0x18] sm:$0xff] }
 0x1f1   :  { %3825 = vmatpush.bf16.msra.mxu2 %v5946_v1  ;;  %v3573_v1 = vpop.f32.mrf.mxu2  ;;  %v6750_v50 = vld [vmem:[#allocation11 + $0x98] sm:$0xff] }
 0x1f2   :  { %3712 = vmatpush.bf16.msra.mxu1 %v5494_v33  ;;  %v5623_v1 = vld [vmem:[#allocation8 + $0x218] sm:$0xf0]  ;;  %v2569_v33 = vperm.slane %v7204_v49, 1 }
 0x1f3   :  { %3797 = vmatpush.bf16.msra.mxu0 %v5722_v30  ;;  %v6021_v30 = vld [vmem:[#allocation8 + $0x528] sm:$0xf]  ;;  %v5626_v31 = vor.u32 %v6604_v28, %v5623_v1  ;;  %v6744_v28 = vld [vmem:[#allocation11 + $0x68] sm:$0xff] }
 0x1f4   :  { %3790 = vmatpush.bf16.msrb.mxu3 %v5498_v36  ;;  %v6005_v36 = vld [vmem:[#allocation8 + $0x508] sm:$0xf] }
 0x1f5   :  { %3826 = vmatpush.bf16.msra.mxu2 %v5930_v3  ;;  %v5706_v3 = vor.u32 %v6624_v21, %v5703_v34  ;;  %3713 = vmatmul.bf16.vlgmr.msra.gmra.mxu1 %v7160_v57  ;;  %v6022_v21 = vor.u32 %v6706_v18, %v6021_v30  ;;  %v6026_v34 = vor.u32 %v6704_v32, %v6023_v6  ;;  %v6743_v1 = vld [vmem:[#allocation11 + $0x60] sm:$0xff]  ;;  %v6741_v18 = vld [vmem:[#allocation11 + $0x50] sm:$0xff] }
 0x1f6   :  { %3757 = vmatpush.bf16.msrb.mxu1 %v6118_v35  ;;  %v6702_v35 = vld [vmem:[#allocation8 + $0x514] sm:$0xf0]  ;;  %v6739_v32 = vld [vmem:[#allocation11 + $0x40] sm:$0xff] }
 0x1f7   :  { %3798 = vmatpush.bf16.msra.mxu0 %v5706_v3  ;;  %3791 = vmatmul.bf16.vlgmr.msrb.gmra.mxu3 %v7160_v57  ;;  %v6714_v57 = vld [vmem:[#allocation8 + $0x574] sm:$0xf0]  ;;  %v6664_v3 = vld [vmem:[#allocation8 + $0x3ec] sm:$0xf]  ;;  %v6006_v42 = vor.u32 %v6702_v35, %v6005_v36 }
 0x1f8   :  { %3835 = vmatpush.bf16.msra.mxu3 %v6122_v38  ;;  %v3584_v10 = vpop.f32.mrf.mxu3  ;;  %v6054_v15 = vor.u32 %v6714_v57, %v6053_v9  ;;  %v6700_v38 = vld [vmem:[#allocation8 + $0x50c] sm:$0xf]  ;;  %v5767_v57 = vld [vmem:[#allocation8 + $0x338] sm:$0xf0] }
 0x1f9   :  { %3827 = vmatpush.bf16.msra.mxu2 %v5914_v58  ;;  %v6086_v58 = vor.u32 %v6722_v47, %v6085_v46  ;;  %v7216_v12 = vadd.f32 %v3584_v10, %v7207_v0  ;;  %v6042_v0 = vor.u32 %v6708_v27, %v6039_v59  ;;  %v6010_v44 = vor.u32 %v6700_v38, %v6007_v26  ;;  %v6660_v46 = vld [vmem:[#allocation8 + $0x3cc] sm:$0xf]  ;;  %v5847_v47 = vld [vmem:[#allocation8 + $0x3d8] sm:$0xf0]  ;;  %v6731_v59 = vld [vmem:[#allocation11] sm:$0xff] }
 0x1fa   :  { %3758 = vmatpush.bf16.msrb.mxu1 %v6102_v25  ;;  %v5866_v25 = vor.u32 %v6664_v3, %v5863_v40  ;;  %v5850_v19 = vor.u32 %v6660_v46, %v5847_v47  ;;  %v6640_v9 = vld [vmem:[#allocation8 + $0x32c] sm:$0xf]  ;;  %v6751_v46 = vld [vmem:[#allocation11 + $0xa0] sm:$0xff] }
 0x1fb   :  { %3799 = vmatpush.bf16.msra.mxu0 %v5690_v48  ;;  %v5770_v10 = vor.u32 %v6640_v9, %v5767_v57  ;;  %v6761_v9 = vld [vmem:[#allocation11 + $0xf0] sm:$0xff] }
 0x1fc   :  { %3836 = vmatpush.bf16.msra.mxu3 %v6106_v45 }
 0x1fd   :  { %3828 = vmatpush.bf16.msra.mxu2 %v5898_v11  ;;  %v6055_v11 = vld [vmem:[#allocation8 + $0x578] sm:$0xf0] }
 0x1fe   :  { %3759 = vmatpush.bf16.msrb.mxu1 %v6086_v58  ;;  %v6058_v16 = vor.u32 %v6712_v63, %v6055_v11  ;;  %v6652_v58 = vld [vmem:[#allocation8 + $0x38c] sm:$0xf]  ;;  %v5751_v11 = vld [vmem:[#allocation8 + $0x318] sm:$0xf0] }
 0x1ff   :  { %3800 = vmatpush.bf16.msra.mxu0 %v5674_v61  ;;  %v6648_v61 = vld [vmem:[#allocation8 + $0x36c] sm:$0xf] }
 0x200   :  { %3837 = vmatpush.bf16.msra.mxu3 %v6090_v7  ;;  %v3586_v20 = vpop.f32.mrf.mxu3  ;;  %v5815_v7 = vld [vmem:[#allocation8 + $0x398] sm:$0xf0]  ;;  %v5802_v41 = vor.u32 %v6648_v61, %v5799_v2  ;;  %v6636_v63 = vld [vmem:[#allocation8 + $0x30c] sm:$0xf] }
 0x201   :  { %3829 = vmatpush.bf16.msra.mxu2 %v5882_v29  ;;  %v6038_v29 = vor.u32 %v6710_v55, %v6037_v23  ;;  %v5754_v62 = vor.u32 %v6636_v63, %v5751_v11  ;;  %v6732_v55 = vld [vmem:[#allocation11 + $0x8] sm:$0xff] }
 0x202   :  { %v6740_v20 = vld [vmem:[#allocation11 + $0x48] sm:$0xff] }
 0x203   :  { %3801 = vmatpush.bf16.msra.mxu0 %v5658_v56  ;;  %v6735_v56 = vld [vmem:[#allocation11 + $0x20] sm:$0xff]  ;;  %v6748_v2 = vld [vmem:[#allocation11 + $0x88] sm:$0xff] }
 0x204   :  { %3830 = vmatmul.bf16.vlgmr.msra.gmra.mxu2 %v7189_v17  ;;  %v6718_v17 = vld [vmem:[#allocation8 + $0x594] sm:$0xf0]  ;;  %3838 = vmatpush.bf16.msra.mxu3 %v6074_v53  ;;  %v6736_v53 = vld [vmem:[#allocation11 + $0x28] sm:$0xff] }
 0x205   :  { %v6070_v8 = vor.u32 %v6718_v17, %v6069_v60  ;;  %v6738_v60 = vld [vmem:[#allocation11 + $0x38] sm:$0xff]  ;;  %v5818_v17 = vor.u32 %v6652_v58, %v5815_v7 }
 0x207   :  { %3760 = vmatpush.bf16.msrb.mxu1 %v6070_v8  ;;  %v3623_v24 = vpop.f32.mrf.mxu2  ;;  %3802 = vmatpush.bf16.msra.mxu0 %v5642_v51  ;;  %v5783_v8 = vld [vmem:[#allocation8 + $0x358] sm:$0xf0] }
 0x208   :  { %3839 = vmatpush.bf16.msra.mxu3 %v6058_v16  ;;  %v3624_v43 = vadd.f32 %v3623_v24, %v2569_v33  ;;  %v3636_v45 = vpop.f32.mrf.mxu3  ;;  %v6746_v16 = vld [vmem:[#allocation11 + $0x78] sm:$0xff]  ;;  %v6745_v24 = vld [vmem:[#allocation11 + $0x70] sm:$0xff] }
 0x20a   :  { %v7220_v48 = vadd.f32 %v3636_v45, %v3624_v43  ;;  %v6753_v43 = vld [vmem:[#allocation11 + $0xb0] sm:$0xff] }
 0x20b   :  { %3761 = vmatpush.bf16.msrb.mxu1 %v6054_v15  ;;  %3803 = vmatpush.bf16.msra.mxu0 %v5626_v31  ;;  %v6733_v15 = vld [vmem:[#allocation11 + $0x10] sm:$0xff] }
 0x20c   :  { %3840 = vmatpush.bf16.msra.mxu3 %v6042_v0  ;;  %v6742_v0 = vld [vmem:[#allocation11 + $0x58] sm:$0xff] }
 0x20e   :  { %3804 = vmatmul.bf16.vlgmr.msra.gmra.mxu0 %v7156_v39 }
 0x20f   :  { %3762 = vmatpush.bf16.msrb.mxu1 %v6038_v29  ;;  %v3625_v37 = vpop.f32.mrf.mxu2  ;;  %4116 = vmatpush.bf16.msrb.mxu0 %v6738_v60  ;;  %v6749_v60 = vld [vmem:[#allocation11 + $0x90] sm:$0xff] }
 0x210   :  { %3841 = vmatpush.bf16.msra.mxu3 %v6026_v34  ;;  %v3638_v39 = vpop.f32.mrf.mxu3  ;;  %v6754_v37 = vld [vmem:[#allocation11 + $0xb8] sm:$0xff] }
 0x211   :  { %4142 = vmatpush.bf16.msrb.mxu2 %v6754_v37 }
 0x213   :  { %3763 = vmatpush.bf16.msrb.mxu1 %v6022_v21  ;;  %4117 = vmatpush.bf16.msrb.mxu0 %v6737_v4 }
 0x214   :  { %3842 = vmatpush.bf16.msra.mxu3 %v6010_v44  ;;  %v6752_v44 = vld [vmem:[#allocation11 + $0xa8] sm:$0xff] }
 0x215   :  { %4143 = vmatpush.bf16.msrb.mxu2 %v6753_v43 }
 0x217   :  { %3764 = vmatpush.bf16.msrb.mxu1 %v6006_v42  ;;  %3843 = vmatmul.bf16.vlgmr.msra.gmra.mxu3 %v7199_v22 }
 0x218   :  { %4118 = vmatpush.bf16.msrb.mxu0 %v6736_v53  ;;  %v6762_v53 = vld [vmem:[#allocation11 + $0xf8] sm:$0xff] }
 0x219   :  { %4144 = vmatpush.bf16.msrb.mxu2 %v6752_v44  ;;  %4155 = vmatpush.bf16.msrb.mxu3 %v6762_v53  ;;  %v6777_v44 = vld [vmem:[#allocation13] ss:$0 sm:$0xff] }
 0x21a   :  { %3765 = vmatmul.bf16.vlgmr.msrb.gmra.mxu1 %v7199_v22  ;;  %v5786_v22 = vor.u32 %v6644_v5, %v5783_v8 }
 0x21b   :  { %3809 = vmatpush.bf16.msra.mxu1 %v5866_v25 }
 0x21c   :  { %4119 = vmatpush.bf16.msrb.mxu0 %v6735_v56  ;;  %v2570_v56 = vperm.slane %v7204_v49, 2 }
 0x21d   :  { %4145 = vmatpush.bf16.msrb.mxu2 %v6751_v46  ;;  %4156 = vmatpush.bf16.msrb.mxu3 %v6761_v9 }
 0x21f   :  { %3810 = vmatpush.bf16.msra.mxu1 %v5850_v19 }
 0x220   :  { %4120 = vmatpush.bf16.msrb.mxu0 %v6734_v14 }
 0x221   :  { %4146 = vmatpush.bf16.msrb.mxu2 %v6750_v50 }
 0x223   :  { %3811 = vmatpush.bf16.msra.mxu1 %v5834_v54 }
 0x224   :  { %4121 = vmatpush.bf16.msrb.mxu0 %v6733_v15 }
 0x225   :  { %4147 = vmatpush.bf16.msrb.mxu2 %v6749_v60 }
 0x227   :  { %3812 = vmatpush.bf16.msra.mxu1 %v5818_v17 }
 0x228   :  { %4122 = vmatpush.bf16.msrb.mxu0 %v6732_v55 }
 0x229   :  { %4148 = vmatpush.bf16.msrb.mxu2 %v6748_v2 }
 0x22a   :  { %v3597_v23 = vpop.f32.mrf.mxu0 }
 0x22b   :  { %3813 = vmatpush.bf16.msra.mxu1 %v5802_v41  ;;  %v3598_v21 = vadd.f32 %v3597_v23, %v7216_v12  ;;  %v6747_v41 = vld [vmem:[#allocation11 + $0x80] sm:$0xff] }
 0x22c   :  { %4123 = vmatpush.bf16.msrb.mxu0 %v6731_v59 }
 0x22d   :  { %4149 = vmatpush.bf16.msrb.mxu2 %v6747_v41 }
 0x22f   :  { %3814 = vmatpush.bf16.msra.mxu1 %v5786_v22 }
 0x231   :  { %v3675_v51 = vpop.f32.mrf.mxu2 }
 0x232   :  { %v3599_v27 = vpop.f32.mrf.mxu0 }
 0x233   :  { %3815 = vmatpush.bf16.msra.mxu1 %v5770_v10  ;;  %v6760_v10 = vld [vmem:[#allocation11 + $0xe8] sm:$0xff] }
 0x234   :  { %4157 = vmatpush.bf16.msrb.mxu3 %v6760_v10 }
 0x237   :  { %3816 = vmatpush.bf16.msra.mxu1 %v5754_v62  ;;  %v6759_v62 = vld [vmem:[#allocation11 + $0xe0] sm:$0xff] }
 0x238   :  { %4158 = vmatpush.bf16.msrb.mxu3 %v6759_v62 }
 0x239   :  { %v3677_v29 = vpop.f32.mrf.mxu2 }
 0x23a   :  { %3817 = vmatmul.bf16.vlgmr.msra.gmra.mxu1 %v7167_v13  ;;  %v3649_v30 = vpop.f32.mrf.mxu0 }
 0x23b   :  { %4129 = vmatpush.bf16.msrb.mxu1 %v6746_v16  ;;  %v3650_v45 = vadd.f32 %v3649_v30, %v7220_v48  ;;  %v6758_v16 = vld [vmem:[#allocation11 + $0xd8] sm:$0xff]  ;;  %v6755_v30 = vld [vmem:[#allocation11 + $0xc0] sm:$0xff] }
 0x23c   :  { %4159 = vmatpush.bf16.msrb.mxu3 %v6758_v16 }
 0x23f   :  { %4130 = vmatpush.bf16.msrb.mxu1 %v6745_v24 }
 0x242   :  { %v3651_v13 = vpop.f32.mrf.mxu0 }
 0x243   :  { %4131 = vmatpush.bf16.msrb.mxu1 %v6744_v28  ;;  %v6756_v28 = vld [vmem:[#allocation11 + $0xc8] sm:$0xff] }
 0x247   :  { %4132 = vmatpush.bf16.msrb.mxu1 %v6743_v1  ;;  %v7225_v31 = vpop.f32.mrf.mxu2 }
 0x24b   :  { %4133 = vmatpush.bf16.msrb.mxu1 %v6742_v0  ;;  %v3701_v33 = vpop.f32.mrf.mxu0 }
 0x24c   :  { %v3702_v11 = vadd.f32 %v3701_v33, %v2570_v56 }
 0x24f   :  { %4134 = vmatpush.bf16.msrb.mxu1 %v6741_v18  ;;  %v3729_v6 = vpop.f32.mrf.mxu2 }
 0x252   :  { %v3610_v34 = vpop.f32.mrf.mxu1 }
 0x253   :  { %4135 = vmatpush.bf16.msrb.mxu1 %v6740_v20  ;;  %v3611_v36 = vadd.f32 %v3610_v34, %v3598_v21  ;;  %v3703_v38 = vpop.f32.mrf.mxu0 }
 0x255   :  { %v3848_v35 = vmax.f32 %v3611_v36, 0.0 }
 0x257   :  { %4136 = vmatpush.bf16.msrb.mxu1 %v6739_v32  ;;  %v3852_v26 = vpack.c.bf16 %v3848_v35, %v3848_v35 }
 0x259   :  { %v3688_v3 = vpop.f32.mrf.mxu3  ;;  %4124 = vmatmul.bf16.vlgmr.msrb.gmra.mxu0 %v3852_v26 }
 0x25a   :  { %v3612_v42 = vpop.f32.mrf.mxu1 }
 0x261   :  { %v3690_v25 = vpop.f32.mrf.mxu3 }
 0x262   :  { %v3662_v47 = vpop.f32.mrf.mxu1 }
 0x263   :  { %v3663_v19 = vadd.f32 %v3662_v47, %v3650_v45 }
 0x265   :  { %v3676_v52 = vadd.f32 %v3675_v51, %v3663_v19  ;;  %v6757_v51 = vld [vmem:[#allocation11 + $0xd0] sm:$0xff] }
 0x266   :  { %4160 = vmatpush.bf16.msrb.mxu3 %v6757_v51 }
 0x267   :  { %v7228_v40 = vpop.f32.mrf.mxu2  ;;  %v3689_v54 = vadd.f32 %v3688_v3, %v3676_v52 }
 0x269   :  { %v3740_v39 = vpop.f32.mrf.mxu3  ;;  %v3849_v58 = vmax.f32 %v3689_v54, 0.0 }
 0x26a   :  { %v3664_v7 = vpop.f32.mrf.mxu1  ;;  %4161 = vmatpush.bf16.msrb.mxu3 %v6756_v28 }
 0x26b   :  { %v3853_v17 = vpack.c.bf16 %v3849_v58, %v3849_v58  ;;  %v3753_v61 = vpop.f32.mrf.mxu0 }
 0x26d   :  { %4137 = vmatmul.bf16.vlgmr.msrb.gmra.mxu1 %v3853_v17 }
 0x26e   :  { %4162 = vmatpush.bf16.msrb.mxu3 %v6755_v30 }
 0x26f   :  { %v3781_v12 = vpop.f32.mrf.mxu2 }
 0x271   :  { %v3742_v4 = vpop.f32.mrf.mxu3 }
 0x272   :  { %v3714_v48 = vpop.f32.mrf.mxu1 }
 0x273   :  { %v3755_v5 = vpop.f32.mrf.mxu0  ;;  %v3715_v15 = vadd.f32 %v3714_v48, %v3702_v11 }
 0x275   :  { %v3728_v23 = vadd.f32 %v7225_v31, %v3715_v15  ;;  %v2571_v31 = vperm.slane %v7204_v49, 3 }
 0x277   :  { %v3741_v24 = vadd.f32 %v3740_v39, %v3728_v23  ;;  %v3780_v6 = vadd.f32 %v7228_v40, %v2571_v31  ;;  %v4168_v40 = vlaneseq }
 0x279   :  { %v3754_v27 = vadd.f32 %v3753_v61, %v3741_v24  ;;  %v4169_v19 = vand.u32 127, %v4168_v40 }
 0x27a   :  { %v3792_v22 = vpop.f32.mrf.mxu3  ;;  %v3716_v57 = vpop.f32.mrf.mxu1 }
 0x27b   :  { %v3793_v33 = vadd.f32 %v3792_v22, %v3780_v6  ;;  %vm4170_vm0 = vcmp.lt.s32.totalorder %v4169_v19, 2 }
 0x282   :  { %v3794_v14 = vpop.f32.mrf.mxu3 }
 0x287   :  { %v3831_v8 = vpop.f32.mrf.mxu2 }
 0x28b   :  { %v3805_v55 = vpop.f32.mrf.mxu0 }
 0x28c   :  { %v3806_v21 = vadd.f32 %v3805_v55, %v3793_v33 }
 0x28f   :  { %v3833_v63 = vpop.f32.mrf.mxu2 }
 0x293   :  { %v3807_v29 = vpop.f32.mrf.mxu0 }
 0x297   :  { %v3766_v59 = vpop.f32.mrf.mxu1 }
 0x298   :  { %v3767_v1 = vadd.f32 %v3766_v59, %v3754_v27 }
 0x29a   :  { %v3850_v0 = vmax.f32 %v3767_v1, 0.0  ;;  %v3844_v13 = vpop.f32.mrf.mxu3 }
 0x29c   :  { %v3854_v18 = vpack.c.bf16 %v3850_v0, %v3850_v0 }
 0x29e   :  { %4150 = vmatmul.bf16.vlgmr.msrb.gmra.mxu2 %v3854_v18 }
 0x29f   :  { %v3768_v20 = vpop.f32.mrf.mxu1 }
 0x2a2   :  { %v3846_v32 = vpop.f32.mrf.mxu3 }
 0x2b7   :  { %v3818_v34 = vpop.f32.mrf.mxu1 }
 0x2b8   :  { %v3819_v36 = vadd.f32 %v3818_v34, %v3806_v21 }
 0x2ba   :  { %v3832_v35 = vadd.f32 %v3831_v8, %v3819_v36 }
 0x2bc   :  { %v3845_v38 = vadd.f32 %v3844_v13, %v3832_v35 }
 0x2be   :  { %v3851_v37 = vmax.f32 %v3845_v38, 0.0 }
 0x2bf   :  { %v3820_v26 = vpop.f32.mrf.mxu1 }
 0x2c0   :  { %v3855_v3 = vpack.c.bf16 %v3851_v37, %v3851_v37 }
 0x2c2   :  { %4163 = vmatmul.bf16.vlgmr.msrb.gmra.mxu3 %v3855_v3 }
 0x2d6   :  { %v4125_v42 = vpop.f32.mrf.mxu0 }
 0x2d7   :  { %v4126_v25 = vadd.f32 %v6777_v44, %v4125_v42 }
 0x2de   :  { %v4127_v43 = vpop.f32.mrf.mxu0 }
 0x2ea   :  { %v4138_v45 = vpop.f32.mrf.mxu1 }
 0x2eb   :  { %v4139_v12 = vadd.f32 %v4138_v45, %v4126_v25 }
 0x2f2   :  { %v4140_v46 = vpop.f32.mrf.mxu1 }
 0x321   :  { %v4151_v49 = vpop.f32.mrf.mxu2 }
 0x322   :  { %v4152_v50 = vadd.f32 %v4151_v49, %v4139_v12 }
 0x329   :  { %v4153_v47 = vpop.f32.mrf.mxu2 }
 0x345   :  { %v4164_v52 = vpop.f32.mrf.mxu3 }
 0x346   :  { %v4165_v54 = vadd.f32 %v4164_v52, %v4152_v50 }
 0x348   :  { %v4171_v39 = vsel %vm4170_vm0, %v4165_v54, -1e+30 }
 0x349   :  { %4172 = vmax.xlane.f32.xlu0 %v4171_v39 }
 0x34d   :  { %v4166_v58 = vpop.f32.mrf.mxu3 }
 0x3bc   :  { %v4173_v7 = vpop.xlane.xlu0 %4172 }
 0x3bd   :  { %v4174_v60 = vsub.f32 %v4171_v39, %v4173_v7 }
 0x3bf   :  { %v4175_v17 = vmul.f32 1.442695, %v4174_v60 }
 0x3c1   :  { %6790 = vpow2.f32 %v4175_v17 }
 0x3c7   :  { %v6791_v61 = vpop.eup %6790 }
 0x3c8   :  { %4177 = vadd.xlane.f32.xlu0 %v6791_v61 }
 0x43b   :  { %v4178_v2 = vpop.xlane.xlu0 %4177 }
 0x43c   :  { %6792 = vlog2.f32 %v4178_v2 }
 0x442   :  { %v6793_v4 = vpop.eup %6792 }
 0x443   :  { %v4180_v48 = vmul.f32 0.6931472, %v6793_v4 }
 0x445   :  { %v4181_v41 = vsub.f32 %v4174_v60, %v4180_v48 }
 0x447   :  { %4182 = vst [vmem:[#allocation14] sm:$0xff] %v4181_v41 }
 0x448   :  { %4193 = dma.vmem_to_hbm [thread:$0]  %s4189_s6, 128, %s4191_s15, [#allocation4]  }
 0x449   :  { %6995 = dma.done.wait [#allocation4], 128  }
 0x44a   :  { %6996 = vsyncadd [#allocation4], 4294967168 }
 0x44b   :  { %4198 = vsyncpa [#allocation3], 1 }
 0x44c   :  { %4199 = vsyncpa [#allocation6], 1 }
 0x44d   :  { %4200 = vsyncpa [#allocation9], 1 }
 0x44e   :  { %4201 = vsyncpa [#allocation12], 1 }
 0x44f   :  { %4202 = vsyncpa [#allocation4], 1 }

</bundles_post_ra>
